<compile_context>
chip_gen: v7x
topology: tpu7x:2x2x1
jax: 0.10.0
libtpu: 0.0.40
codegen_flags: <defaults>
</compile_context>

<pallas_src>
import functools

import jax
import jax.numpy as jnp
from jax import lax
from jax.experimental import pallas as pl
from jax.experimental.pallas import tpu as pltpu

KSIZE = 7
PAD = (KSIZE - 1) // 2


def _sigmoid(v):
    # exp runs on the EUP; reciprocal is kept exact (approx=False default) so
    # the kernel stays well inside the 1e-4 tolerance of the reference.
    return pl.reciprocal(1.0 + jnp.exp(-v))


def cbam_kernel(x_ref, w1_ref, w2_ref, wsp_ref, o_ref, *, H, W):
    # x_ref  : (1, C, H*W) VMEM  lane-dense input block (one batch element)
    # w1_ref : (C//r, C)   VMEM  fc1 1x1-conv weight
    # w2_ref : (C, C//r)   VMEM  fc2 1x1-conv weight
    # wsp_ref: (2*7*7,)    SMEM  spatial conv weight, flattened [in_c, kh, kw]
    # o_ref  : (1, C, H*W) VMEM
    HW = H * W

    x = x_ref[0].astype(jnp.float32)                 # (C, HW)

    # ---------------- Channel attention ----------------
    avg_c = jnp.mean(x, axis=1, keepdims=True)       # (C, 1)  global avg pool
    max_c = jnp.max(x, axis=1, keepdims=True)        # (C, 1)  global max pool

    # Fuse the two shared-MLP passes: build a (C, 2) RHS (col0=avg, col1=max)
    # so there is one w1 matmul and one w2 matmul instead of two of each.
    sel2 = lax.broadcasted_iota(jnp.int32, (1, 2), 1) == 0
    v = jnp.where(sel2, avg_c, max_c)                # (C, 2)

    h = jnp.dot(w1_ref[...], v, preferred_element_type=jnp.float32)    # (Cr, 2)
    h = jnp.maximum(h, 0.0)                                             # ReLU
    mlp = jnp.dot(w2_ref[...], h, preferred_element_type=jnp.float32)  # (C, 2)
    ca = _sigmoid(jnp.sum(mlp, axis=1, keepdims=True))                  # (C, 1)

    x_ca = x * ca                                    # (C, HW) channel-gated

    # ---------------- Spatial attention ----------------
    avg_map = jnp.mean(x_ca, axis=0, keepdims=True)  # (1, HW)
    max_map = jnp.max(x_ca, axis=0, keepdims=True)   # (1, HW)
    selr = lax.broadcasted_iota(jnp.int32, (2, 1), 0) == 0
    maps = jnp.where(selr, avg_map, max_map)         # (2, HW): row0=avg, row1=max

    # 7x7 "same" cross-correlation (2 in-channels -> 1 out), done entirely in
    # registers on the flattened lane-dense maps: each tap is one lane roll
    # (XLU, co-issues with the VPU FMAs) plus a static border mask.
    iota_p = lax.broadcasted_iota(jnp.int32, (1, HW), 1)
    if (W & (W - 1)) == 0:
        col = iota_p & (W - 1)                       # p mod W (W power of two)
    else:
        col = iota_p % W

    # column-validity masks, one per horizontal offset dj (hoisted)
    col_ok = [(col >= -dj) & (col < W - dj) for dj in range(-PAD, PAD + 1)]

    # hoist all 98 spatial-conv tap weights (scalar SMEM reads) out of the loop
    w_taps = [wsp_ref[k] for k in range(2 * KSIZE * KSIZE)]

    acc = jnp.zeros((1, HW), jnp.float32)
    for di in range(-PAD, PAD + 1):
        # row-validity mask for this vertical offset
        row_ok = (iota_p >= -di * W) & (iota_p < (H - di) * W)
        for dj in range(-PAD, PAD + 1):
            s = di * W + dj                          # flat source offset
            ki = (di + PAD) * KSIZE + (dj + PAD)
            wa = w_taps[ki]                          # weight for avg channel
            wm = w_taps[KSIZE * KSIZE + ki]          # weight for max channel
            rolled = maps if s == 0 else pltpu.roll(maps, shift=(-s) % HW, axis=1)
            tap = wa * rolled[0:1, :] + wm * rolled[1:2, :]
            acc = acc + jnp.where(row_ok & col_ok[dj + PAD], tap, 0.0)

    sa = _sigmoid(acc)                               # (1, HW) spatial gate
    o_ref[0] = (x_ca * sa).astype(o_ref.dtype)


def cbam_pallas(x, w1, w2, wsp_flat):
    B, C, H, W = x.shape
    HW = H * W
    Cr = w1.shape[0]

    # Lane-dense view: (B, C, H, W) -> (B, C, H*W); NCHW is contiguous so this
    # is a free metadata reshape outside the kernel.
    x_flat = x.reshape(B, C, HW)

    # NOTE: the (1, C, HW) f32 block is tiny here (~32 KiB).  For ResNet-scale
    # feature maps on v7x (64 MiB VMEM) tile C so 2x(in+out) buffers fit, and
    # add a second grid axis if B is small so both TensorCores pipeline.
    # TODO(synk): add a C-tiling path (with a cross-tile channel reduction) for
    # very large C on v7x.
    kernel = functools.partial(cbam_kernel, H=H, W=W)
    out_flat = pl.pallas_call(
        kernel,
        out_shape=jax.ShapeDtypeStruct((B, C, HW), x.dtype),
        grid=(B,),
        in_specs=[
            pl.BlockSpec((1, C, HW), lambda b: (b, 0, 0)),
            pl.BlockSpec((Cr, C), lambda b: (0, 0)),
            pl.BlockSpec((C, Cr), lambda b: (0, 0)),
            pl.BlockSpec(memory_space=pltpu.MemorySpace.SMEM),
        ],
        out_specs=pl.BlockSpec((1, C, HW), lambda b: (b, 0, 0)),
        compiler_params=pltpu.CompilerParams(
            dimension_semantics=("parallel",)),
    )(x_flat, w1, w2, wsp_flat)
    return out_flat.reshape(B, C, H, W)


def cbam_reference(x, w1, w2, wsp_flat):
    """Plain-JAX reference matching the PyTorch forward exactly."""
    avg = jnp.mean(x, axis=(2, 3), keepdims=True)
    mx = jnp.max(x, axis=(2, 3), keepdims=True)

    def mlp(v):  # v: (B, C, 1, 1)
        h = jnp.einsum('oc,bcij->boij', w1, v)
        h = jnp.maximum(h, 0.0)
        return jnp.einsum('co,boij->bcij', w2, h)

    ca = jax.nn.sigmoid(mlp(avg) + mlp(mx))
    x1 = x * ca
    avg_m = jnp.mean(x1, axis=1, keepdims=True)
    max_m = jnp.max(x1, axis=1, keepdims=True)
    inp = jnp.concatenate([avg_m, max_m], axis=1)
    wconv = wsp_flat.reshape(1, 2, KSIZE, KSIZE)
    conv = jax.lax.conv_general_dilated(
        inp, wconv, window_strides=(1, 1), padding=((PAD, PAD), (PAD, PAD)),
        dimension_numbers=('NCHW', 'OIHW', 'NCHW'))
    sa = jax.nn.sigmoid(conv)
    return x1 * sa


if __name__ == "__main__":
    key = jax.random.PRNGKey(0)
    B, C, H, W = 2, 32, 16, 16      # in_planes=32, ratio=16 -> hidden=2
    ratio = 16
    Cr = C // ratio

    kx, k1, k2, k3 = jax.random.split(key, 4)
    x = jax.random.normal(kx, (B, C, H, W), dtype=jnp.float32)
    # deterministic synthetic weights (no bias, as in the module)
    w1 = jax.random.normal(k1, (Cr, C), dtype=jnp.float32) * 0.2   # fc1: 1x1 conv C -> C//r
    w2 = jax.random.normal(k2, (C, Cr), dtype=jnp.float32) * 0.2   # fc2: 1x1 conv C//r -> C
    wsp = jax.random.normal(k3, (2 * KSIZE * KSIZE,), dtype=jnp.float32) * 0.1  # 7x7 conv, 2->1

    out = cbam_pallas(x, w1, w2, wsp)
    out = jax.block_until_ready(out)

    ref = cbam_reference(x, w1, w2, wsp)
    assert jnp.allclose(out, ref, rtol=1e-4, atol=1e-4), \
        f"max abs err = {jnp.max(jnp.abs(out - ref))}"

    print("KERNEL_OK")
</pallas_src>

<mosaic_0001>
module attributes {stable_mosaic.version = 11 : i64} {
  func.func @cbam_kernel(%arg0: i32, %arg1: memref<1x32x256xf32, #tpu.memory_space<vmem>>, %arg2: memref<2x32xf32, #tpu.memory_space<vmem>>, %arg3: memref<32x2xf32, #tpu.memory_space<vmem>>, %arg4: memref<98xf32, #tpu.memory_space<smem>>, %arg5: memref<1x32x256xf32, #tpu.memory_space<vmem>>) attributes {dimension_semantics = [#tpu.dimension_semantics<parallel>], iteration_bounds = array<i64: 2>, scalar_prefetch = 0 : i64, scratch_operands = 0 : i64, tpu.core_type = #tpu.core_type<tc>, window_params = [{transform_indices = @transform_0, window_bounds = array<i64: 1, 32, 256>}, {pipeline_mode = #tpu.pipeline_mode<synchronous>, transform_indices = @transform_1, window_bounds = array<i64: 2, 32>}, {pipeline_mode = #tpu.pipeline_mode<synchronous>, transform_indices = @transform_2, window_bounds = array<i64: 32, 2>}, {transform_indices = @transform_3, window_bounds = array<i64: 98>}, {transform_indices = @transform_4, window_bounds = array<i64: 1, 32, 256>}]} {
    %c0 = arith.constant 0 : index
    %c0_0 = arith.constant 0 : index
    %c0_1 = arith.constant 0 : index
    %0 = vector.load %arg1[%c0, %c0_0, %c0_1] : memref<1x32x256xf32, #tpu.memory_space<vmem>>, vector<1x32x256xf32>
    %1 = vector.shape_cast %0 : vector<1x32x256xf32> to vector<32x256xf32>
    %cst = arith.constant dense<0.000000e+00> : vector<32xf32>
    %2 = vector.multi_reduction <add>, %1, %cst [1] : vector<32x256xf32> to vector<32xf32>
    %3 = vector.shape_cast %2 : vector<32xf32> to vector<32x1xf32>
    %cst_2 = arith.constant 2.560000e+02 : f32
    %4 = vector.broadcast %cst_2 : f32 to vector<32x1xf32>
    %5 = arith.divf %3, %4 : vector<32x1xf32>
    %cst_3 = arith.constant dense<0xFF800000> : vector<32xf32>
    %6 = vector.multi_reduction <maximumf>, %1, %cst_3 [1] : vector<32x256xf32> to vector<32xf32>
    %7 = vector.shape_cast %6 : vector<32xf32> to vector<32x1xf32>
    %8 = tpu.iota {dimensions = array<i32: 1>} : vector<1x2xi32>
    %c0_i32 = arith.constant 0 : i32
    %9 = vector.broadcast %c0_i32 : i32 to vector<1x2xi32>
    %10 = arith.cmpi eq, %8, %9 : vector<1x2xi32>
    %11 = vector.shape_cast %10 : vector<1x2xi1> to vector<1x2xi1>
    %12 = vector.broadcast %11 : vector<1x2xi1> to vector<32x2xi1>
    %13 = vector.shape_cast %5 : vector<32x1xf32> to vector<32x1xf32>
    %14 = vector.broadcast %13 : vector<32x1xf32> to vector<32x2xf32>
    %15 = vector.shape_cast %7 : vector<32x1xf32> to vector<32x1xf32>
    %16 = vector.broadcast %15 : vector<32x1xf32> to vector<32x2xf32>
    %17 = arith.select %12, %14, %16 : vector<32x2xi1>, vector<32x2xf32>
    %c0_4 = arith.constant 0 : index
    %c0_5 = arith.constant 0 : index
    %18 = vector.load %arg2[%c0_4, %c0_5] : memref<2x32xf32, #tpu.memory_space<vmem>>, vector<2x32xf32>
    %cst_6 = arith.constant dense<0.000000e+00> : vector<2x2xf32>
    %19 = tpu.matmul %18, %17, %cst_6 {dimension_numbers = #tpu.dot_dimension_numbers<[1], [0], [0], [1], [0, 0, 1, 1], [], []>} : vector<2x32xf32>, vector<32x2xf32>, vector<2x2xf32> -> vector<2x2xf32>
    %cst_7 = arith.constant 0.000000e+00 : f32
    %20 = vector.broadcast %cst_7 : f32 to vector<2x2xf32>
    %21 = arith.maximumf %19, %20 : vector<2x2xf32>
    %c0_8 = arith.constant 0 : index
    %c0_9 = arith.constant 0 : index
    %22 = vector.load %arg3[%c0_8, %c0_9] : memref<32x2xf32, #tpu.memory_space<vmem>>, vector<32x2xf32>
    %cst_10 = arith.constant dense<0.000000e+00> : vector<32x2xf32>
    %23 = tpu.matmul %22, %21, %cst_10 {dimension_numbers = #tpu.dot_dimension_numbers<[1], [0], [0], [1], [0, 0, 1, 1], [], []>} : vector<32x2xf32>, vector<2x2xf32>, vector<32x2xf32> -> vector<32x2xf32>
    %cst_11 = arith.constant dense<0.000000e+00> : vector<32xf32>
    %24 = vector.multi_reduction <add>, %23, %cst_11 [1] : vector<32x2xf32> to vector<32xf32>
    %25 = vector.shape_cast %24 : vector<32xf32> to vector<32x1xf32>
    %cst_12 = arith.constant 0.000000e+00 : f32
    %26 = vector.broadcast %cst_12 : f32 to vector<32x1xf32>
    %27 = arith.subf %26, %25 : vector<32x1xf32>
    %28 = math.exp %27 : vector<32x1xf32>
    %cst_13 = arith.constant 1.000000e+00 : f32
    %29 = vector.broadcast %cst_13 : f32 to vector<32x1xf32>
    %30 = arith.addf %29, %28 : vector<32x1xf32>
    %31 = tpu.reciprocal %30 : vector<32x1xf32> -> vector<32x1xf32>
    %32 = vector.broadcast %31 : vector<32x1xf32> to vector<32x256xf32>
    %33 = arith.mulf %1, %32 : vector<32x256xf32>
    %cst_14 = arith.constant dense<0.000000e+00> : vector<256xf32>
    %34 = vector.multi_reduction <add>, %33, %cst_14 [0] : vector<32x256xf32> to vector<256xf32>
    %35 = vector.shape_cast %34 : vector<256xf32> to vector<1x256xf32>
    %cst_15 = arith.constant 3.200000e+01 : f32
    %36 = vector.broadcast %cst_15 : f32 to vector<1x256xf32>
    %37 = arith.divf %35, %36 : vector<1x256xf32>
    %cst_16 = arith.constant dense<0xFF800000> : vector<256xf32>
    %38 = vector.multi_reduction <maximumf>, %33, %cst_16 [0] : vector<32x256xf32> to vector<256xf32>
    %39 = vector.shape_cast %38 : vector<256xf32> to vector<1x256xf32>
    %40 = tpu.iota {dimensions = array<i32: 0>} : vector<2x1xi32>
    %c0_i32_17 = arith.constant 0 : i32
    %41 = vector.broadcast %c0_i32_17 : i32 to vector<2x1xi32>
    %42 = arith.cmpi eq, %40, %41 : vector<2x1xi32>
    %43 = vector.shape_cast %42 : vector<2x1xi1> to vector<2x1xi1>
    %44 = vector.broadcast %43 : vector<2x1xi1> to vector<2x256xi1>
    %45 = vector.shape_cast %37 : vector<1x256xf32> to vector<1x256xf32>
    %46 = vector.broadcast %45 : vector<1x256xf32> to vector<2x256xf32>
    %47 = vector.shape_cast %39 : vector<1x256xf32> to vector<1x256xf32>
    %48 = vector.broadcast %47 : vector<1x256xf32> to vector<2x256xf32>
    %49 = arith.select %44, %46, %48 : vector<2x256xi1>, vector<2x256xf32>
    %50 = tpu.iota {dimensions = array<i32: 1>} : vector<1x256xi32>
    %c15_i32 = arith.constant 15 : i32
    %51 = vector.broadcast %c15_i32 : i32 to vector<1x256xi32>
    %52 = arith.andi %50, %51 : vector<1x256xi32>
    %c3_i32 = arith.constant 3 : i32
    %53 = vector.broadcast %c3_i32 : i32 to vector<1x256xi32>
    %54 = arith.cmpi sge, %52, %53 : vector<1x256xi32>
    %c19_i32 = arith.constant 19 : i32
    %55 = vector.broadcast %c19_i32 : i32 to vector<1x256xi32>
    %56 = arith.cmpi slt, %52, %55 : vector<1x256xi32>
    %57 = arith.andi %54, %56 : vector<1x256xi1>
    %c2_i32 = arith.constant 2 : i32
    %58 = vector.broadcast %c2_i32 : i32 to vector<1x256xi32>
    %59 = arith.cmpi sge, %52, %58 : vector<1x256xi32>
    %c18_i32 = arith.constant 18 : i32
    %60 = vector.broadcast %c18_i32 : i32 to vector<1x256xi32>
    %61 = arith.cmpi slt, %52, %60 : vector<1x256xi32>
    %62 = arith.andi %59, %61 : vector<1x256xi1>
    %c1_i32 = arith.constant 1 : i32
    %63 = vector.broadcast %c1_i32 : i32 to vector<1x256xi32>
    %64 = arith.cmpi sge, %52, %63 : vector<1x256xi32>
    %c17_i32 = arith.constant 17 : i32
    %65 = vector.broadcast %c17_i32 : i32 to vector<1x256xi32>
    %66 = arith.cmpi slt, %52, %65 : vector<1x256xi32>
    %67 = arith.andi %64, %66 : vector<1x256xi1>
    %c0_i32_18 = arith.constant 0 : i32
    %68 = vector.broadcast %c0_i32_18 : i32 to vector<1x256xi32>
    %69 = arith.cmpi sge, %52, %68 : vector<1x256xi32>
    %c16_i32 = arith.constant 16 : i32
    %70 = vector.broadcast %c16_i32 : i32 to vector<1x256xi32>
    %71 = arith.cmpi slt, %52, %70 : vector<1x256xi32>
    %72 = arith.andi %69, %71 : vector<1x256xi1>
    %c-1_i32 = arith.constant -1 : i32
    %73 = vector.broadcast %c-1_i32 : i32 to vector<1x256xi32>
    %74 = arith.cmpi sge, %52, %73 : vector<1x256xi32>
    %c15_i32_19 = arith.constant 15 : i32
    %75 = vector.broadcast %c15_i32_19 : i32 to vector<1x256xi32>
    %76 = arith.cmpi slt, %52, %75 : vector<1x256xi32>
    %77 = arith.andi %74, %76 : vector<1x256xi1>
    %c-2_i32 = arith.constant -2 : i32
    %78 = vector.broadcast %c-2_i32 : i32 to vector<1x256xi32>
    %79 = arith.cmpi sge, %52, %78 : vector<1x256xi32>
    %c14_i32 = arith.constant 14 : i32
    %80 = vector.broadcast %c14_i32 : i32 to vector<1x256xi32>
    %81 = arith.cmpi slt, %52, %80 : vector<1x256xi32>
    %82 = arith.andi %79, %81 : vector<1x256xi1>
    %c-3_i32 = arith.constant -3 : i32
    %83 = vector.broadcast %c-3_i32 : i32 to vector<1x256xi32>
    %84 = arith.cmpi sge, %52, %83 : vector<1x256xi32>
    %c13_i32 = arith.constant 13 : i32
    %85 = vector.broadcast %c13_i32 : i32 to vector<1x256xi32>
    %86 = arith.cmpi slt, %52, %85 : vector<1x256xi32>
    %87 = arith.andi %84, %86 : vector<1x256xi1>
    %c0_20 = arith.constant 0 : index
    %88 = memref.load %arg4[%c0_20] : memref<98xf32, #tpu.memory_space<smem>>
    %c1 = arith.constant 1 : index
    %89 = memref.load %arg4[%c1] : memref<98xf32, #tpu.memory_space<smem>>
    %c2 = arith.constant 2 : index
    %90 = memref.load %arg4[%c2] : memref<98xf32, #tpu.memory_space<smem>>
    %c3 = arith.constant 3 : index
    %91 = memref.load %arg4[%c3] : memref<98xf32, #tpu.memory_space<smem>>
    %c4 = arith.constant 4 : index
    %92 = memref.load %arg4[%c4] : memref<98xf32, #tpu.memory_space<smem>>
    %c5 = arith.constant 5 : index
    %93 = memref.load %arg4[%c5] : memref<98xf32, #tpu.memory_space<smem>>
    %c6 = arith.constant 6 : index
    %94 = memref.load %arg4[%c6] : memref<98xf32, #tpu.memory_space<smem>>
    %c7 = arith.constant 7 : index
    %95 = memref.load %arg4[%c7] : memref<98xf32, #tpu.memory_space<smem>>
    %c8 = arith.constant 8 : index
    %96 = memref.load %arg4[%c8] : memref<98xf32, #tpu.memory_space<smem>>
    %c9 = arith.constant 9 : index
    %97 = memref.load %arg4[%c9] : memref<98xf32, #tpu.memory_space<smem>>
    %c10 = arith.constant 10 : index
    %98 = memref.load %arg4[%c10] : memref<98xf32, #tpu.memory_space<smem>>
    %c11 = arith.constant 11 : index
    %99 = memref.load %arg4[%c11] : memref<98xf32, #tpu.memory_space<smem>>
    %c12 = arith.constant 12 : index
    %100 = memref.load %arg4[%c12] : memref<98xf32, #tpu.memory_space<smem>>
    %c13 = arith.constant 13 : index
    %101 = memref.load %arg4[%c13] : memref<98xf32, #tpu.memory_space<smem>>
    %c14 = arith.constant 14 : index
    %102 = memref.load %arg4[%c14] : memref<98xf32, #tpu.memory_space<smem>>
    %c15 = arith.constant 15 : index
    %103 = memref.load %arg4[%c15] : memref<98xf32, #tpu.memory_space<smem>>
    %c16 = arith.constant 16 : index
    %104 = memref.load %arg4[%c16] : memref<98xf32, #tpu.memory_space<smem>>
    %c17 = arith.constant 17 : index
    %105 = memref.load %arg4[%c17] : memref<98xf32, #tpu.memory_space<smem>>
    %c18 = arith.constant 18 : index
    %106 = memref.load %arg4[%c18] : memref<98xf32, #tpu.memory_space<smem>>
    %c19 = arith.constant 19 : index
    %107 = memref.load %arg4[%c19] : memref<98xf32, #tpu.memory_space<smem>>
    %c20 = arith.constant 20 : index
    %108 = memref.load %arg4[%c20] : memref<98xf32, #tpu.memory_space<smem>>
    %c21 = arith.constant 21 : index
    %109 = memref.load %arg4[%c21] : memref<98xf32, #tpu.memory_space<smem>>
    %c22 = arith.constant 22 : index
    %110 = memref.load %arg4[%c22] : memref<98xf32, #tpu.memory_space<smem>>
    %c23 = arith.constant 23 : index
    %111 = memref.load %arg4[%c23] : memref<98xf32, #tpu.memory_space<smem>>
    %c24 = arith.constant 24 : index
    %112 = memref.load %arg4[%c24] : memref<98xf32, #tpu.memory_space<smem>>
    %c25 = arith.constant 25 : index
    %113 = memref.load %arg4[%c25] : memref<98xf32, #tpu.memory_space<smem>>
    %c26 = arith.constant 26 : index
    %114 = memref.load %arg4[%c26] : memref<98xf32, #tpu.memory_space<smem>>
    %c27 = arith.constant 27 : index
    %115 = memref.load %arg4[%c27] : memref<98xf32, #tpu.memory_space<smem>>
    %c28 = arith.constant 28 : index
    %116 = memref.load %arg4[%c28] : memref<98xf32, #tpu.memory_space<smem>>
    %c29 = arith.constant 29 : index
    %117 = memref.load %arg4[%c29] : memref<98xf32, #tpu.memory_space<smem>>
    %c30 = arith.constant 30 : index
    %118 = memref.load %arg4[%c30] : memref<98xf32, #tpu.memory_space<smem>>
    %c31 = arith.constant 31 : index
    %119 = memref.load %arg4[%c31] : memref<98xf32, #tpu.memory_space<smem>>
    %c32 = arith.constant 32 : index
    %120 = memref.load %arg4[%c32] : memref<98xf32, #tpu.memory_space<smem>>
    %c33 = arith.constant 33 : index
    %121 = memref.load %arg4[%c33] : memref<98xf32, #tpu.memory_space<smem>>
    %c34 = arith.constant 34 : index
    %122 = memref.load %arg4[%c34] : memref<98xf32, #tpu.memory_space<smem>>
    %c35 = arith.constant 35 : index
    %123 = memref.load %arg4[%c35] : memref<98xf32, #tpu.memory_space<smem>>
    %c36 = arith.constant 36 : index
    %124 = memref.load %arg4[%c36] : memref<98xf32, #tpu.memory_space<smem>>
    %c37 = arith.constant 37 : index
    %125 = memref.load %arg4[%c37] : memref<98xf32, #tpu.memory_space<smem>>
    %c38 = arith.constant 38 : index
    %126 = memref.load %arg4[%c38] : memref<98xf32, #tpu.memory_space<smem>>
    %c39 = arith.constant 39 : index
    %127 = memref.load %arg4[%c39] : memref<98xf32, #tpu.memory_space<smem>>
    %c40 = arith.constant 40 : index
    %128 = memref.load %arg4[%c40] : memref<98xf32, #tpu.memory_space<smem>>
    %c41 = arith.constant 41 : index
    %129 = memref.load %arg4[%c41] : memref<98xf32, #tpu.memory_space<smem>>
    %c42 = arith.constant 42 : index
    %130 = memref.load %arg4[%c42] : memref<98xf32, #tpu.memory_space<smem>>
    %c43 = arith.constant 43 : index
    %131 = memref.load %arg4[%c43] : memref<98xf32, #tpu.memory_space<smem>>
    %c44 = arith.constant 44 : index
    %132 = memref.load %arg4[%c44] : memref<98xf32, #tpu.memory_space<smem>>
    %c45 = arith.constant 45 : index
    %133 = memref.load %arg4[%c45] : memref<98xf32, #tpu.memory_space<smem>>
    %c46 = arith.constant 46 : index
    %134 = memref.load %arg4[%c46] : memref<98xf32, #tpu.memory_space<smem>>
    %c47 = arith.constant 47 : index
    %135 = memref.load %arg4[%c47] : memref<98xf32, #tpu.memory_space<smem>>
    %c48 = arith.constant 48 : index
    %136 = memref.load %arg4[%c48] : memref<98xf32, #tpu.memory_space<smem>>
    %c49 = arith.constant 49 : index
    %137 = memref.load %arg4[%c49] : memref<98xf32, #tpu.memory_space<smem>>
    %c50 = arith.constant 50 : index
    %138 = memref.load %arg4[%c50] : memref<98xf32, #tpu.memory_space<smem>>
    %c51 = arith.constant 51 : index
    %139 = memref.load %arg4[%c51] : memref<98xf32, #tpu.memory_space<smem>>
    %c52 = arith.constant 52 : index
    %140 = memref.load %arg4[%c52] : memref<98xf32, #tpu.memory_space<smem>>
    %c53 = arith.constant 53 : index
    %141 = memref.load %arg4[%c53] : memref<98xf32, #tpu.memory_space<smem>>
    %c54 = arith.constant 54 : index
    %142 = memref.load %arg4[%c54] : memref<98xf32, #tpu.memory_space<smem>>
    %c55 = arith.constant 55 : index
    %143 = memref.load %arg4[%c55] : memref<98xf32, #tpu.memory_space<smem>>
    %c56 = arith.constant 56 : index
    %144 = memref.load %arg4[%c56] : memref<98xf32, #tpu.memory_space<smem>>
    %c57 = arith.constant 57 : index
    %145 = memref.load %arg4[%c57] : memref<98xf32, #tpu.memory_space<smem>>
    %c58 = arith.constant 58 : index
    %146 = memref.load %arg4[%c58] : memref<98xf32, #tpu.memory_space<smem>>
    %c59 = arith.constant 59 : index
    %147 = memref.load %arg4[%c59] : memref<98xf32, #tpu.memory_space<smem>>
    %c60 = arith.constant 60 : index
    %148 = memref.load %arg4[%c60] : memref<98xf32, #tpu.memory_space<smem>>
    %c61 = arith.constant 61 : index
    %149 = memref.load %arg4[%c61] : memref<98xf32, #tpu.memory_space<smem>>
    %c62 = arith.constant 62 : index
    %150 = memref.load %arg4[%c62] : memref<98xf32, #tpu.memory_space<smem>>
    %c63 = arith.constant 63 : index
    %151 = memref.load %arg4[%c63] : memref<98xf32, #tpu.memory_space<smem>>
    %c64 = arith.constant 64 : index
    %152 = memref.load %arg4[%c64] : memref<98xf32, #tpu.memory_space<smem>>
    %c65 = arith.constant 65 : index
    %153 = memref.load %arg4[%c65] : memref<98xf32, #tpu.memory_space<smem>>
    %c66 = arith.constant 66 : index
    %154 = memref.load %arg4[%c66] : memref<98xf32, #tpu.memory_space<smem>>
    %c67 = arith.constant 67 : index
    %155 = memref.load %arg4[%c67] : memref<98xf32, #tpu.memory_space<smem>>
    %c68 = arith.constant 68 : index
    %156 = memref.load %arg4[%c68] : memref<98xf32, #tpu.memory_space<smem>>
    %c69 = arith.constant 69 : index
    %157 = memref.load %arg4[%c69] : memref<98xf32, #tpu.memory_space<smem>>
    %c70 = arith.constant 70 : index
    %158 = memref.load %arg4[%c70] : memref<98xf32, #tpu.memory_space<smem>>
    %c71 = arith.constant 71 : index
    %159 = memref.load %arg4[%c71] : memref<98xf32, #tpu.memory_space<smem>>
    %c72 = arith.constant 72 : index
    %160 = memref.load %arg4[%c72] : memref<98xf32, #tpu.memory_space<smem>>
    %c73 = arith.constant 73 : index
    %161 = memref.load %arg4[%c73] : memref<98xf32, #tpu.memory_space<smem>>
    %c74 = arith.constant 74 : index
    %162 = memref.load %arg4[%c74] : memref<98xf32, #tpu.memory_space<smem>>
    %c75 = arith.constant 75 : index
    %163 = memref.load %arg4[%c75] : memref<98xf32, #tpu.memory_space<smem>>
    %c76 = arith.constant 76 : index
    %164 = memref.load %arg4[%c76] : memref<98xf32, #tpu.memory_space<smem>>
    %c77 = arith.constant 77 : index
    %165 = memref.load %arg4[%c77] : memref<98xf32, #tpu.memory_space<smem>>
    %c78 = arith.constant 78 : index
    %166 = memref.load %arg4[%c78] : memref<98xf32, #tpu.memory_space<smem>>
    %c79 = arith.constant 79 : index
    %167 = memref.load %arg4[%c79] : memref<98xf32, #tpu.memory_space<smem>>
    %c80 = arith.constant 80 : index
    %168 = memref.load %arg4[%c80] : memref<98xf32, #tpu.memory_space<smem>>
    %c81 = arith.constant 81 : index
    %169 = memref.load %arg4[%c81] : memref<98xf32, #tpu.memory_space<smem>>
    %c82 = arith.constant 82 : index
    %170 = memref.load %arg4[%c82] : memref<98xf32, #tpu.memory_space<smem>>
    %c83 = arith.constant 83 : index
    %171 = memref.load %arg4[%c83] : memref<98xf32, #tpu.memory_space<smem>>
    %c84 = arith.constant 84 : index
    %172 = memref.load %arg4[%c84] : memref<98xf32, #tpu.memory_space<smem>>
    %c85 = arith.constant 85 : index
    %173 = memref.load %arg4[%c85] : memref<98xf32, #tpu.memory_space<smem>>
    %c86 = arith.constant 86 : index
    %174 = memref.load %arg4[%c86] : memref<98xf32, #tpu.memory_space<smem>>
    %c87 = arith.constant 87 : index
    %175 = memref.load %arg4[%c87] : memref<98xf32, #tpu.memory_space<smem>>
    %c88 = arith.constant 88 : index
    %176 = memref.load %arg4[%c88] : memref<98xf32, #tpu.memory_space<smem>>
    %c89 = arith.constant 89 : index
    %177 = memref.load %arg4[%c89] : memref<98xf32, #tpu.memory_space<smem>>
    %c90 = arith.constant 90 : index
    %178 = memref.load %arg4[%c90] : memref<98xf32, #tpu.memory_space<smem>>
    %c91 = arith.constant 91 : index
    %179 = memref.load %arg4[%c91] : memref<98xf32, #tpu.memory_space<smem>>
    %c92 = arith.constant 92 : index
    %180 = memref.load %arg4[%c92] : memref<98xf32, #tpu.memory_space<smem>>
    %c93 = arith.constant 93 : index
    %181 = memref.load %arg4[%c93] : memref<98xf32, #tpu.memory_space<smem>>
    %c94 = arith.constant 94 : index
    %182 = memref.load %arg4[%c94] : memref<98xf32, #tpu.memory_space<smem>>
    %c95 = arith.constant 95 : index
    %183 = memref.load %arg4[%c95] : memref<98xf32, #tpu.memory_space<smem>>
    %c96 = arith.constant 96 : index
    %184 = memref.load %arg4[%c96] : memref<98xf32, #tpu.memory_space<smem>>
    %c97 = arith.constant 97 : index
    %185 = memref.load %arg4[%c97] : memref<98xf32, #tpu.memory_space<smem>>
    %cst_21 = arith.constant 0.000000e+00 : f32
    %186 = vector.broadcast %cst_21 : f32 to vector<1x256xf32>
    %c48_i32 = arith.constant 48 : i32
    %187 = vector.broadcast %c48_i32 : i32 to vector<1x256xi32>
    %188 = arith.cmpi sge, %50, %187 : vector<1x256xi32>
    %c304_i32 = arith.constant 304 : i32
    %189 = vector.broadcast %c304_i32 : i32 to vector<1x256xi32>
    %190 = arith.cmpi slt, %50, %189 : vector<1x256xi32>
    %191 = arith.andi %188, %190 : vector<1x256xi1>
    %c51_i32 = arith.constant 51 : i32
    %192 = tpu.dynamic_rotate %49 by %c51_i32 dim 1 : vector<2x256xf32>, i32 -> vector<2x256xf32>
    %193 = vector.extract_strided_slice %192 {offsets = [0, 0], sizes = [1, 256], strides = [1, 1]} : vector<2x256xf32> to vector<1x256xf32>
    %194 = vector.broadcast %88 : f32 to vector<1x256xf32>
    %195 = arith.mulf %194, %193 : vector<1x256xf32>
    %196 = vector.extract_strided_slice %192 {offsets = [1, 0], sizes = [1, 256], strides = [1, 1]} : vector<2x256xf32> to vector<1x256xf32>
    %197 = vector.broadcast %137 : f32 to vector<1x256xf32>
    %198 = arith.mulf %197, %196 : vector<1x256xf32>
    %199 = arith.addf %195, %198 : vector<1x256xf32>
    %200 = arith.andi %191, %57 : vector<1x256xi1>
    %cst_22 = arith.constant 0.000000e+00 : f32
    %201 = vector.broadcast %cst_22 : f32 to vector<1x256xf32>
    %202 = arith.select %200, %199, %201 : vector<1x256xi1>, vector<1x256xf32>
    %203 = arith.addf %186, %202 : vector<1x256xf32>
    %c50_i32 = arith.constant 50 : i32
    %204 = tpu.dynamic_rotate %49 by %c50_i32 dim 1 : vector<2x256xf32>, i32 -> vector<2x256xf32>
    %205 = vector.extract_strided_slice %204 {offsets = [0, 0], sizes = [1, 256], strides = [1, 1]} : vector<2x256xf32> to vector<1x256xf32>
    %206 = vector.broadcast %89 : f32 to vector<1x256xf32>
    %207 = arith.mulf %206, %205 : vector<1x256xf32>
    %208 = vector.extract_strided_slice %204 {offsets = [1, 0], sizes = [1, 256], strides = [1, 1]} : vector<2x256xf32> to vector<1x256xf32>
    %209 = vector.broadcast %138 : f32 to vector<1x256xf32>
    %210 = arith.mulf %209, %208 : vector<1x256xf32>
    %211 = arith.addf %207, %210 : vector<1x256xf32>
    %212 = arith.andi %191, %62 : vector<1x256xi1>
    %cst_23 = arith.constant 0.000000e+00 : f32
    %213 = vector.broadcast %cst_23 : f32 to vector<1x256xf32>
    %214 = arith.select %212, %211, %213 : vector<1x256xi1>, vector<1x256xf32>
    %215 = arith.addf %203, %214 : vector<1x256xf32>
    %c49_i32 = arith.constant 49 : i32
    %216 = tpu.dynamic_rotate %49 by %c49_i32 dim 1 : vector<2x256xf32>, i32 -> vector<2x256xf32>
    %217 = vector.extract_strided_slice %216 {offsets = [0, 0], sizes = [1, 256], strides = [1, 1]} : vector<2x256xf32> to vector<1x256xf32>
    %218 = vector.broadcast %90 : f32 to vector<1x256xf32>
    %219 = arith.mulf %218, %217 : vector<1x256xf32>
    %220 = vector.extract_strided_slice %216 {offsets = [1, 0], sizes = [1, 256], strides = [1, 1]} : vector<2x256xf32> to vector<1x256xf32>
    %221 = vector.broadcast %139 : f32 to vector<1x256xf32>
    %222 = arith.mulf %221, %220 : vector<1x256xf32>
    %223 = arith.addf %219, %222 : vector<1x256xf32>
    %224 = arith.andi %191, %67 : vector<1x256xi1>
    %cst_24 = arith.constant 0.000000e+00 : f32
    %225 = vector.broadcast %cst_24 : f32 to vector<1x256xf32>
    %226 = arith.select %224, %223, %225 : vector<1x256xi1>, vector<1x256xf32>
    %227 = arith.addf %215, %226 : vector<1x256xf32>
    %c48_i32_25 = arith.constant 48 : i32
    %228 = tpu.dynamic_rotate %49 by %c48_i32_25 dim 1 : vector<2x256xf32>, i32 -> vector<2x256xf32>
    %229 = vector.extract_strided_slice %228 {offsets = [0, 0], sizes = [1, 256], strides = [1, 1]} : vector<2x256xf32> to vector<1x256xf32>
    %230 = vector.broadcast %91 : f32 to vector<1x256xf32>
    %231 = arith.mulf %230, %229 : vector<1x256xf32>
    %232 = vector.extract_strided_slice %228 {offsets = [1, 0], sizes = [1, 256], strides = [1, 1]} : vector<2x256xf32> to vector<1x256xf32>
    %233 = vector.broadcast %140 : f32 to vector<1x256xf32>
    %234 = arith.mulf %233, %232 : vector<1x256xf32>
    %235 = arith.addf %231, %234 : vector<1x256xf32>
    %236 = arith.andi %191, %72 : vector<1x256xi1>
    %cst_26 = arith.constant 0.000000e+00 : f32
    %237 = vector.broadcast %cst_26 : f32 to vector<1x256xf32>
    %238 = arith.select %236, %235, %237 : vector<1x256xi1>, vector<1x256xf32>
    %239 = arith.addf %227, %238 : vector<1x256xf32>
    %c47_i32 = arith.constant 47 : i32
    %240 = tpu.dynamic_rotate %49 by %c47_i32 dim 1 : vector<2x256xf32>, i32 -> vector<2x256xf32>
    %241 = vector.extract_strided_slice %240 {offsets = [0, 0], sizes = [1, 256], strides = [1, 1]} : vector<2x256xf32> to vector<1x256xf32>
    %242 = vector.broadcast %92 : f32 to vector<1x256xf32>
    %243 = arith.mulf %242, %241 : vector<1x256xf32>
    %244 = vector.extract_strided_slice %240 {offsets = [1, 0], sizes = [1, 256], strides = [1, 1]} : vector<2x256xf32> to vector<1x256xf32>
    %245 = vector.broadcast %141 : f32 to vector<1x256xf32>
    %246 = arith.mulf %245, %244 : vector<1x256xf32>
    %247 = arith.addf %243, %246 : vector<1x256xf32>
    %248 = arith.andi %191, %77 : vector<1x256xi1>
    %cst_27 = arith.constant 0.000000e+00 : f32
    %249 = vector.broadcast %cst_27 : f32 to vector<1x256xf32>
    %250 = arith.select %248, %247, %249 : vector<1x256xi1>, vector<1x256xf32>
    %251 = arith.addf %239, %250 : vector<1x256xf32>
    %c46_i32 = arith.constant 46 : i32
    %252 = tpu.dynamic_rotate %49 by %c46_i32 dim 1 : vector<2x256xf32>, i32 -> vector<2x256xf32>
    %253 = vector.extract_strided_slice %252 {offsets = [0, 0], sizes = [1, 256], strides = [1, 1]} : vector<2x256xf32> to vector<1x256xf32>
    %254 = vector.broadcast %93 : f32 to vector<1x256xf32>
    %255 = arith.mulf %254, %253 : vector<1x256xf32>
    %256 = vector.extract_strided_slice %252 {offsets = [1, 0], sizes = [1, 256], strides = [1, 1]} : vector<2x256xf32> to vector<1x256xf32>
    %257 = vector.broadcast %142 : f32 to vector<1x256xf32>
    %258 = arith.mulf %257, %256 : vector<1x256xf32>
    %259 = arith.addf %255, %258 : vector<1x256xf32>
    %260 = arith.andi %191, %82 : vector<1x256xi1>
    %cst_28 = arith.constant 0.000000e+00 : f32
    %261 = vector.broadcast %cst_28 : f32 to vector<1x256xf32>
    %262 = arith.select %260, %259, %261 : vector<1x256xi1>, vector<1x256xf32>
    %263 = arith.addf %251, %262 : vector<1x256xf32>
    %c45_i32 = arith.constant 45 : i32
    %264 = tpu.dynamic_rotate %49 by %c45_i32 dim 1 : vector<2x256xf32>, i32 -> vector<2x256xf32>
    %265 = vector.extract_strided_slice %264 {offsets = [0, 0], sizes = [1, 256], strides = [1, 1]} : vector<2x256xf32> to vector<1x256xf32>
    %266 = vector.broadcast %94 : f32 to vector<1x256xf32>
    %267 = arith.mulf %266, %265 : vector<1x256xf32>
    %268 = vector.extract_strided_slice %264 {offsets = [1, 0], sizes = [1, 256], strides = [1, 1]} : vector<2x256xf32> to vector<1x256xf32>
    %269 = vector.broadcast %143 : f32 to vector<1x256xf32>
    %270 = arith.mulf %269, %268 : vector<1x256xf32>
    %271 = arith.addf %267, %270 : vector<1x256xf32>
    %272 = arith.andi %191, %87 : vector<1x256xi1>
    %cst_29 = arith.constant 0.000000e+00 : f32
    %273 = vector.broadcast %cst_29 : f32 to vector<1x256xf32>
    %274 = arith.select %272, %271, %273 : vector<1x256xi1>, vector<1x256xf32>
    %275 = arith.addf %263, %274 : vector<1x256xf32>
    %c32_i32 = arith.constant 32 : i32
    %276 = vector.broadcast %c32_i32 : i32 to vector<1x256xi32>
    %277 = arith.cmpi sge, %50, %276 : vector<1x256xi32>
    %c288_i32 = arith.constant 288 : i32
    %278 = vector.broadcast %c288_i32 : i32 to vector<1x256xi32>
    %279 = arith.cmpi slt, %50, %278 : vector<1x256xi32>
    %280 = arith.andi %277, %279 : vector<1x256xi1>
    %c35_i32 = arith.constant 35 : i32
    %281 = tpu.dynamic_rotate %49 by %c35_i32 dim 1 : vector<2x256xf32>, i32 -> vector<2x256xf32>
    %282 = vector.extract_strided_slice %281 {offsets = [0, 0], sizes = [1, 256], strides = [1, 1]} : vector<2x256xf32> to vector<1x256xf32>
    %283 = vector.broadcast %95 : f32 to vector<1x256xf32>
    %284 = arith.mulf %283, %282 : vector<1x256xf32>
    %285 = vector.extract_strided_slice %281 {offsets = [1, 0], sizes = [1, 256], strides = [1, 1]} : vector<2x256xf32> to vector<1x256xf32>
    %286 = vector.broadcast %144 : f32 to vector<1x256xf32>
    %287 = arith.mulf %286, %285 : vector<1x256xf32>
    %288 = arith.addf %284, %287 : vector<1x256xf32>
    %289 = arith.andi %280, %57 : vector<1x256xi1>
    %cst_30 = arith.constant 0.000000e+00 : f32
    %290 = vector.broadcast %cst_30 : f32 to vector<1x256xf32>
    %291 = arith.select %289, %288, %290 : vector<1x256xi1>, vector<1x256xf32>
    %292 = arith.addf %275, %291 : vector<1x256xf32>
    %c34_i32 = arith.constant 34 : i32
    %293 = tpu.dynamic_rotate %49 by %c34_i32 dim 1 : vector<2x256xf32>, i32 -> vector<2x256xf32>
    %294 = vector.extract_strided_slice %293 {offsets = [0, 0], sizes = [1, 256], strides = [1, 1]} : vector<2x256xf32> to vector<1x256xf32>
    %295 = vector.broadcast %96 : f32 to vector<1x256xf32>
    %296 = arith.mulf %295, %294 : vector<1x256xf32>
    %297 = vector.extract_strided_slice %293 {offsets = [1, 0], sizes = [1, 256], strides = [1, 1]} : vector<2x256xf32> to vector<1x256xf32>
    %298 = vector.broadcast %145 : f32 to vector<1x256xf32>
    %299 = arith.mulf %298, %297 : vector<1x256xf32>
    %300 = arith.addf %296, %299 : vector<1x256xf32>
    %301 = arith.andi %280, %62 : vector<1x256xi1>
    %cst_31 = arith.constant 0.000000e+00 : f32
    %302 = vector.broadcast %cst_31 : f32 to vector<1x256xf32>
    %303 = arith.select %301, %300, %302 : vector<1x256xi1>, vector<1x256xf32>
    %304 = arith.addf %292, %303 : vector<1x256xf32>
    %c33_i32 = arith.constant 33 : i32
    %305 = tpu.dynamic_rotate %49 by %c33_i32 dim 1 : vector<2x256xf32>, i32 -> vector<2x256xf32>
    %306 = vector.extract_strided_slice %305 {offsets = [0, 0], sizes = [1, 256], strides = [1, 1]} : vector<2x256xf32> to vector<1x256xf32>
    %307 = vector.broadcast %97 : f32 to vector<1x256xf32>
    %308 = arith.mulf %307, %306 : vector<1x256xf32>
    %309 = vector.extract_strided_slice %305 {offsets = [1, 0], sizes = [1, 256], strides = [1, 1]} : vector<2x256xf32> to vector<1x256xf32>
    %310 = vector.broadcast %146 : f32 to vector<1x256xf32>
    %311 = arith.mulf %310, %309 : vector<1x256xf32>
    %312 = arith.addf %308, %311 : vector<1x256xf32>
    %313 = arith.andi %280, %67 : vector<1x256xi1>
    %cst_32 = arith.constant 0.000000e+00 : f32
    %314 = vector.broadcast %cst_32 : f32 to vector<1x256xf32>
    %315 = arith.select %313, %312, %314 : vector<1x256xi1>, vector<1x256xf32>
    %316 = arith.addf %304, %315 : vector<1x256xf32>
    %c32_i32_33 = arith.constant 32 : i32
    %317 = tpu.dynamic_rotate %49 by %c32_i32_33 dim 1 : vector<2x256xf32>, i32 -> vector<2x256xf32>
    %318 = vector.extract_strided_slice %317 {offsets = [0, 0], sizes = [1, 256], strides = [1, 1]} : vector<2x256xf32> to vector<1x256xf32>
    %319 = vector.broadcast %98 : f32 to vector<1x256xf32>
    %320 = arith.mulf %319, %318 : vector<1x256xf32>
    %321 = vector.extract_strided_slice %317 {offsets = [1, 0], sizes = [1, 256], strides = [1, 1]} : vector<2x256xf32> to vector<1x256xf32>
    %322 = vector.broadcast %147 : f32 to vector<1x256xf32>
    %323 = arith.mulf %322, %321 : vector<1x256xf32>
    %324 = arith.addf %320, %323 : vector<1x256xf32>
    %325 = arith.andi %280, %72 : vector<1x256xi1>
    %cst_34 = arith.constant 0.000000e+00 : f32
    %326 = vector.broadcast %cst_34 : f32 to vector<1x256xf32>
    %327 = arith.select %325, %324, %326 : vector<1x256xi1>, vector<1x256xf32>
    %328 = arith.addf %316, %327 : vector<1x256xf32>
    %c31_i32 = arith.constant 31 : i32
    %329 = tpu.dynamic_rotate %49 by %c31_i32 dim 1 : vector<2x256xf32>, i32 -> vector<2x256xf32>
    %330 = vector.extract_strided_slice %329 {offsets = [0, 0], sizes = [1, 256], strides = [1, 1]} : vector<2x256xf32> to vector<1x256xf32>
    %331 = vector.broadcast %99 : f32 to vector<1x256xf32>
    %332 = arith.mulf %331, %330 : vector<1x256xf32>
    %333 = vector.extract_strided_slice %329 {offsets = [1, 0], sizes = [1, 256], strides = [1, 1]} : vector<2x256xf32> to vector<1x256xf32>
    %334 = vector.broadcast %148 : f32 to vector<1x256xf32>
    %335 = arith.mulf %334, %333 : vector<1x256xf32>
    %336 = arith.addf %332, %335 : vector<1x256xf32>
    %337 = arith.andi %280, %77 : vector<1x256xi1>
    %cst_35 = arith.constant 0.000000e+00 : f32
    %338 = vector.broadcast %cst_35 : f32 to vector<1x256xf32>
    %339 = arith.select %337, %336, %338 : vector<1x256xi1>, vector<1x256xf32>
    %340 = arith.addf %328, %339 : vector<1x256xf32>
    %c30_i32 = arith.constant 30 : i32
    %341 = tpu.dynamic_rotate %49 by %c30_i32 dim 1 : vector<2x256xf32>, i32 -> vector<2x256xf32>
    %342 = vector.extract_strided_slice %341 {offsets = [0, 0], sizes = [1, 256], strides = [1, 1]} : vector<2x256xf32> to vector<1x256xf32>
    %343 = vector.broadcast %100 : f32 to vector<1x256xf32>
    %344 = arith.mulf %343, %342 : vector<1x256xf32>
    %345 = vector.extract_strided_slice %341 {offsets = [1, 0], sizes = [1, 256], strides = [1, 1]} : vector<2x256xf32> to vector<1x256xf32>
    %346 = vector.broadcast %149 : f32 to vector<1x256xf32>
    %347 = arith.mulf %346, %345 : vector<1x256xf32>
    %348 = arith.addf %344, %347 : vector<1x256xf32>
    %349 = arith.andi %280, %82 : vector<1x256xi1>
    %cst_36 = arith.constant 0.000000e+00 : f32
    %350 = vector.broadcast %cst_36 : f32 to vector<1x256xf32>
    %351 = arith.select %349, %348, %350 : vector<1x256xi1>, vector<1x256xf32>
    %352 = arith.addf %340, %351 : vector<1x256xf32>
    %c29_i32 = arith.constant 29 : i32
    %353 = tpu.dynamic_rotate %49 by %c29_i32 dim 1 : vector<2x256xf32>, i32 -> vector<2x256xf32>
    %354 = vector.extract_strided_slice %353 {offsets = [0, 0], sizes = [1, 256], strides = [1, 1]} : vector<2x256xf32> to vector<1x256xf32>
    %355 = vector.broadcast %101 : f32 to vector<1x256xf32>
    %356 = arith.mulf %355, %354 : vector<1x256xf32>
    %357 = vector.extract_strided_slice %353 {offsets = [1, 0], sizes = [1, 256], strides = [1, 1]} : vector<2x256xf32> to vector<1x256xf32>
    %358 = vector.broadcast %150 : f32 to vector<1x256xf32>
    %359 = arith.mulf %358, %357 : vector<1x256xf32>
    %360 = arith.addf %356, %359 : vector<1x256xf32>
    %361 = arith.andi %280, %87 : vector<1x256xi1>
    %cst_37 = arith.constant 0.000000e+00 : f32
    %362 = vector.broadcast %cst_37 : f32 to vector<1x256xf32>
    %363 = arith.select %361, %360, %362 : vector<1x256xi1>, vector<1x256xf32>
    %364 = arith.addf %352, %363 : vector<1x256xf32>
    %c16_i32_38 = arith.constant 16 : i32
    %365 = vector.broadcast %c16_i32_38 : i32 to vector<1x256xi32>
    %366 = arith.cmpi sge, %50, %365 : vector<1x256xi32>
    %c272_i32 = arith.constant 272 : i32
    %367 = vector.broadcast %c272_i32 : i32 to vector<1x256xi32>
    %368 = arith.cmpi slt, %50, %367 : vector<1x256xi32>
    %369 = arith.andi %366, %368 : vector<1x256xi1>
    %c19_i32_39 = arith.constant 19 : i32
    %370 = tpu.dynamic_rotate %49 by %c19_i32_39 dim 1 : vector<2x256xf32>, i32 -> vector<2x256xf32>
    %371 = vector.extract_strided_slice %370 {offsets = [0, 0], sizes = [1, 256], strides = [1, 1]} : vector<2x256xf32> to vector<1x256xf32>
    %372 = vector.broadcast %102 : f32 to vector<1x256xf32>
    %373 = arith.mulf %372, %371 : vector<1x256xf32>
    %374 = vector.extract_strided_slice %370 {offsets = [1, 0], sizes = [1, 256], strides = [1, 1]} : vector<2x256xf32> to vector<1x256xf32>
    %375 = vector.broadcast %151 : f32 to vector<1x256xf32>
    %376 = arith.mulf %375, %374 : vector<1x256xf32>
    %377 = arith.addf %373, %376 : vector<1x256xf32>
    %378 = arith.andi %369, %57 : vector<1x256xi1>
    %cst_40 = arith.constant 0.000000e+00 : f32
    %379 = vector.broadcast %cst_40 : f32 to vector<1x256xf32>
    %380 = arith.select %378, %377, %379 : vector<1x256xi1>, vector<1x256xf32>
    %381 = arith.addf %364, %380 : vector<1x256xf32>
    %c18_i32_41 = arith.constant 18 : i32
    %382 = tpu.dynamic_rotate %49 by %c18_i32_41 dim 1 : vector<2x256xf32>, i32 -> vector<2x256xf32>
    %383 = vector.extract_strided_slice %382 {offsets = [0, 0], sizes = [1, 256], strides = [1, 1]} : vector<2x256xf32> to vector<1x256xf32>
    %384 = vector.broadcast %103 : f32 to vector<1x256xf32>
    %385 = arith.mulf %384, %383 : vector<1x256xf32>
    %386 = vector.extract_strided_slice %382 {offsets = [1, 0], sizes = [1, 256], strides = [1, 1]} : vector<2x256xf32> to vector<1x256xf32>
    %387 = vector.broadcast %152 : f32 to vector<1x256xf32>
    %388 = arith.mulf %387, %386 : vector<1x256xf32>
    %389 = arith.addf %385, %388 : vector<1x256xf32>
    %390 = arith.andi %369, %62 : vector<1x256xi1>
    %cst_42 = arith.constant 0.000000e+00 : f32
    %391 = vector.broadcast %cst_42 : f32 to vector<1x256xf32>
    %392 = arith.select %390, %389, %391 : vector<1x256xi1>, vector<1x256xf32>
    %393 = arith.addf %381, %392 : vector<1x256xf32>
    %c17_i32_43 = arith.constant 17 : i32
    %394 = tpu.dynamic_rotate %49 by %c17_i32_43 dim 1 : vector<2x256xf32>, i32 -> vector<2x256xf32>
    %395 = vector.extract_strided_slice %394 {offsets = [0, 0], sizes = [1, 256], strides = [1, 1]} : vector<2x256xf32> to vector<1x256xf32>
    %396 = vector.broadcast %104 : f32 to vector<1x256xf32>
    %397 = arith.mulf %396, %395 : vector<1x256xf32>
    %398 = vector.extract_strided_slice %394 {offsets = [1, 0], sizes = [1, 256], strides = [1, 1]} : vector<2x256xf32> to vector<1x256xf32>
    %399 = vector.broadcast %153 : f32 to vector<1x256xf32>
    %400 = arith.mulf %399, %398 : vector<1x256xf32>
    %401 = arith.addf %397, %400 : vector<1x256xf32>
    %402 = arith.andi %369, %67 : vector<1x256xi1>
    %cst_44 = arith.constant 0.000000e+00 : f32
    %403 = vector.broadcast %cst_44 : f32 to vector<1x256xf32>
    %404 = arith.select %402, %401, %403 : vector<1x256xi1>, vector<1x256xf32>
    %405 = arith.addf %393, %404 : vector<1x256xf32>
    %c16_i32_45 = arith.constant 16 : i32
    %406 = tpu.dynamic_rotate %49 by %c16_i32_45 dim 1 : vector<2x256xf32>, i32 -> vector<2x256xf32>
    %407 = vector.extract_strided_slice %406 {offsets = [0, 0], sizes = [1, 256], strides = [1, 1]} : vector<2x256xf32> to vector<1x256xf32>
    %408 = vector.broadcast %105 : f32 to vector<1x256xf32>
    %409 = arith.mulf %408, %407 : vector<1x256xf32>
    %410 = vector.extract_strided_slice %406 {offsets = [1, 0], sizes = [1, 256], strides = [1, 1]} : vector<2x256xf32> to vector<1x256xf32>
    %411 = vector.broadcast %154 : f32 to vector<1x256xf32>
    %412 = arith.mulf %411, %410 : vector<1x256xf32>
    %413 = arith.addf %409, %412 : vector<1x256xf32>
    %414 = arith.andi %369, %72 : vector<1x256xi1>
    %cst_46 = arith.constant 0.000000e+00 : f32
    %415 = vector.broadcast %cst_46 : f32 to vector<1x256xf32>
    %416 = arith.select %414, %413, %415 : vector<1x256xi1>, vector<1x256xf32>
    %417 = arith.addf %405, %416 : vector<1x256xf32>
    %c15_i32_47 = arith.constant 15 : i32
    %418 = tpu.dynamic_rotate %49 by %c15_i32_47 dim 1 : vector<2x256xf32>, i32 -> vector<2x256xf32>
    %419 = vector.extract_strided_slice %418 {offsets = [0, 0], sizes = [1, 256], strides = [1, 1]} : vector<2x256xf32> to vector<1x256xf32>
    %420 = vector.broadcast %106 : f32 to vector<1x256xf32>
    %421 = arith.mulf %420, %419 : vector<1x256xf32>
    %422 = vector.extract_strided_slice %418 {offsets = [1, 0], sizes = [1, 256], strides = [1, 1]} : vector<2x256xf32> to vector<1x256xf32>
    %423 = vector.broadcast %155 : f32 to vector<1x256xf32>
    %424 = arith.mulf %423, %422 : vector<1x256xf32>
    %425 = arith.addf %421, %424 : vector<1x256xf32>
    %426 = arith.andi %369, %77 : vector<1x256xi1>
    %cst_48 = arith.constant 0.000000e+00 : f32
    %427 = vector.broadcast %cst_48 : f32 to vector<1x256xf32>
    %428 = arith.select %426, %425, %427 : vector<1x256xi1>, vector<1x256xf32>
    %429 = arith.addf %417, %428 : vector<1x256xf32>
    %c14_i32_49 = arith.constant 14 : i32
    %430 = tpu.dynamic_rotate %49 by %c14_i32_49 dim 1 : vector<2x256xf32>, i32 -> vector<2x256xf32>
    %431 = vector.extract_strided_slice %430 {offsets = [0, 0], sizes = [1, 256], strides = [1, 1]} : vector<2x256xf32> to vector<1x256xf32>
    %432 = vector.broadcast %107 : f32 to vector<1x256xf32>
    %433 = arith.mulf %432, %431 : vector<1x256xf32>
    %434 = vector.extract_strided_slice %430 {offsets = [1, 0], sizes = [1, 256], strides = [1, 1]} : vector<2x256xf32> to vector<1x256xf32>
    %435 = vector.broadcast %156 : f32 to vector<1x256xf32>
    %436 = arith.mulf %435, %434 : vector<1x256xf32>
    %437 = arith.addf %433, %436 : vector<1x256xf32>
    %438 = arith.andi %369, %82 : vector<1x256xi1>
    %cst_50 = arith.constant 0.000000e+00 : f32
    %439 = vector.broadcast %cst_50 : f32 to vector<1x256xf32>
    %440 = arith.select %438, %437, %439 : vector<1x256xi1>, vector<1x256xf32>
    %441 = arith.addf %429, %440 : vector<1x256xf32>
    %c13_i32_51 = arith.constant 13 : i32
    %442 = tpu.dynamic_rotate %49 by %c13_i32_51 dim 1 : vector<2x256xf32>, i32 -> vector<2x256xf32>
    %443 = vector.extract_strided_slice %442 {offsets = [0, 0], sizes = [1, 256], strides = [1, 1]} : vector<2x256xf32> to vector<1x256xf32>
    %444 = vector.broadcast %108 : f32 to vector<1x256xf32>
    %445 = arith.mulf %444, %443 : vector<1x256xf32>
    %446 = vector.extract_strided_slice %442 {offsets = [1, 0], sizes = [1, 256], strides = [1, 1]} : vector<2x256xf32> to vector<1x256xf32>
    %447 = vector.broadcast %157 : f32 to vector<1x256xf32>
    %448 = arith.mulf %447, %446 : vector<1x256xf32>
    %449 = arith.addf %445, %448 : vector<1x256xf32>
    %450 = arith.andi %369, %87 : vector<1x256xi1>
    %cst_52 = arith.constant 0.000000e+00 : f32
    %451 = vector.broadcast %cst_52 : f32 to vector<1x256xf32>
    %452 = arith.select %450, %449, %451 : vector<1x256xi1>, vector<1x256xf32>
    %453 = arith.addf %441, %452 : vector<1x256xf32>
    %c0_i32_53 = arith.constant 0 : i32
    %454 = vector.broadcast %c0_i32_53 : i32 to vector<1x256xi32>
    %455 = arith.cmpi sge, %50, %454 : vector<1x256xi32>
    %c256_i32 = arith.constant 256 : i32
    %456 = vector.broadcast %c256_i32 : i32 to vector<1x256xi32>
    %457 = arith.cmpi slt, %50, %456 : vector<1x256xi32>
    %458 = arith.andi %455, %457 : vector<1x256xi1>
    %c3_i32_54 = arith.constant 3 : i32
    %459 = tpu.dynamic_rotate %49 by %c3_i32_54 dim 1 : vector<2x256xf32>, i32 -> vector<2x256xf32>
    %460 = vector.extract_strided_slice %459 {offsets = [0, 0], sizes = [1, 256], strides = [1, 1]} : vector<2x256xf32> to vector<1x256xf32>
    %461 = vector.broadcast %109 : f32 to vector<1x256xf32>
    %462 = arith.mulf %461, %460 : vector<1x256xf32>
    %463 = vector.extract_strided_slice %459 {offsets = [1, 0], sizes = [1, 256], strides = [1, 1]} : vector<2x256xf32> to vector<1x256xf32>
    %464 = vector.broadcast %158 : f32 to vector<1x256xf32>
    %465 = arith.mulf %464, %463 : vector<1x256xf32>
    %466 = arith.addf %462, %465 : vector<1x256xf32>
    %467 = arith.andi %458, %57 : vector<1x256xi1>
    %cst_55 = arith.constant 0.000000e+00 : f32
    %468 = vector.broadcast %cst_55 : f32 to vector<1x256xf32>
    %469 = arith.select %467, %466, %468 : vector<1x256xi1>, vector<1x256xf32>
    %470 = arith.addf %453, %469 : vector<1x256xf32>
    %c2_i32_56 = arith.constant 2 : i32
    %471 = tpu.dynamic_rotate %49 by %c2_i32_56 dim 1 : vector<2x256xf32>, i32 -> vector<2x256xf32>
    %472 = vector.extract_strided_slice %471 {offsets = [0, 0], sizes = [1, 256], strides = [1, 1]} : vector<2x256xf32> to vector<1x256xf32>
    %473 = vector.broadcast %110 : f32 to vector<1x256xf32>
    %474 = arith.mulf %473, %472 : vector<1x256xf32>
    %475 = vector.extract_strided_slice %471 {offsets = [1, 0], sizes = [1, 256], strides = [1, 1]} : vector<2x256xf32> to vector<1x256xf32>
    %476 = vector.broadcast %159 : f32 to vector<1x256xf32>
    %477 = arith.mulf %476, %475 : vector<1x256xf32>
    %478 = arith.addf %474, %477 : vector<1x256xf32>
    %479 = arith.andi %458, %62 : vector<1x256xi1>
    %cst_57 = arith.constant 0.000000e+00 : f32
    %480 = vector.broadcast %cst_57 : f32 to vector<1x256xf32>
    %481 = arith.select %479, %478, %480 : vector<1x256xi1>, vector<1x256xf32>
    %482 = arith.addf %470, %481 : vector<1x256xf32>
    %c1_i32_58 = arith.constant 1 : i32
    %483 = tpu.dynamic_rotate %49 by %c1_i32_58 dim 1 : vector<2x256xf32>, i32 -> vector<2x256xf32>
    %484 = vector.extract_strided_slice %483 {offsets = [0, 0], sizes = [1, 256], strides = [1, 1]} : vector<2x256xf32> to vector<1x256xf32>
    %485 = vector.broadcast %111 : f32 to vector<1x256xf32>
    %486 = arith.mulf %485, %484 : vector<1x256xf32>
    %487 = vector.extract_strided_slice %483 {offsets = [1, 0], sizes = [1, 256], strides = [1, 1]} : vector<2x256xf32> to vector<1x256xf32>
    %488 = vector.broadcast %160 : f32 to vector<1x256xf32>
    %489 = arith.mulf %488, %487 : vector<1x256xf32>
    %490 = arith.addf %486, %489 : vector<1x256xf32>
    %491 = arith.andi %458, %67 : vector<1x256xi1>
    %cst_59 = arith.constant 0.000000e+00 : f32
    %492 = vector.broadcast %cst_59 : f32 to vector<1x256xf32>
    %493 = arith.select %491, %490, %492 : vector<1x256xi1>, vector<1x256xf32>
    %494 = arith.addf %482, %493 : vector<1x256xf32>
    %495 = vector.extract_strided_slice %49 {offsets = [0, 0], sizes = [1, 256], strides = [1, 1]} : vector<2x256xf32> to vector<1x256xf32>
    %496 = vector.broadcast %112 : f32 to vector<1x256xf32>
    %497 = arith.mulf %496, %495 : vector<1x256xf32>
    %498 = vector.extract_strided_slice %49 {offsets = [1, 0], sizes = [1, 256], strides = [1, 1]} : vector<2x256xf32> to vector<1x256xf32>
    %499 = vector.broadcast %161 : f32 to vector<1x256xf32>
    %500 = arith.mulf %499, %498 : vector<1x256xf32>
    %501 = arith.addf %497, %500 : vector<1x256xf32>
    %502 = arith.andi %458, %72 : vector<1x256xi1>
    %cst_60 = arith.constant 0.000000e+00 : f32
    %503 = vector.broadcast %cst_60 : f32 to vector<1x256xf32>
    %504 = arith.select %502, %501, %503 : vector<1x256xi1>, vector<1x256xf32>
    %505 = arith.addf %494, %504 : vector<1x256xf32>
    %c255_i32 = arith.constant 255 : i32
    %506 = tpu.dynamic_rotate %49 by %c255_i32 dim 1 : vector<2x256xf32>, i32 -> vector<2x256xf32>
    %507 = vector.extract_strided_slice %506 {offsets = [0, 0], sizes = [1, 256], strides = [1, 1]} : vector<2x256xf32> to vector<1x256xf32>
    %508 = vector.broadcast %113 : f32 to vector<1x256xf32>
    %509 = arith.mulf %508, %507 : vector<1x256xf32>
    %510 = vector.extract_strided_slice %506 {offsets = [1, 0], sizes = [1, 256], strides = [1, 1]} : vector<2x256xf32> to vector<1x256xf32>
    %511 = vector.broadcast %162 : f32 to vector<1x256xf32>
    %512 = arith.mulf %511, %510 : vector<1x256xf32>
    %513 = arith.addf %509, %512 : vector<1x256xf32>
    %514 = arith.andi %458, %77 : vector<1x256xi1>
    %cst_61 = arith.constant 0.000000e+00 : f32
    %515 = vector.broadcast %cst_61 : f32 to vector<1x256xf32>
    %516 = arith.select %514, %513, %515 : vector<1x256xi1>, vector<1x256xf32>
    %517 = arith.addf %505, %516 : vector<1x256xf32>
    %c254_i32 = arith.constant 254 : i32
    %518 = tpu.dynamic_rotate %49 by %c254_i32 dim 1 : vector<2x256xf32>, i32 -> vector<2x256xf32>
    %519 = vector.extract_strided_slice %518 {offsets = [0, 0], sizes = [1, 256], strides = [1, 1]} : vector<2x256xf32> to vector<1x256xf32>
    %520 = vector.broadcast %114 : f32 to vector<1x256xf32>
    %521 = arith.mulf %520, %519 : vector<1x256xf32>
    %522 = vector.extract_strided_slice %518 {offsets = [1, 0], sizes = [1, 256], strides = [1, 1]} : vector<2x256xf32> to vector<1x256xf32>
    %523 = vector.broadcast %163 : f32 to vector<1x256xf32>
    %524 = arith.mulf %523, %522 : vector<1x256xf32>
    %525 = arith.addf %521, %524 : vector<1x256xf32>
    %526 = arith.andi %458, %82 : vector<1x256xi1>
    %cst_62 = arith.constant 0.000000e+00 : f32
    %527 = vector.broadcast %cst_62 : f32 to vector<1x256xf32>
    %528 = arith.select %526, %525, %527 : vector<1x256xi1>, vector<1x256xf32>
    %529 = arith.addf %517, %528 : vector<1x256xf32>
    %c253_i32 = arith.constant 253 : i32
    %530 = tpu.dynamic_rotate %49 by %c253_i32 dim 1 : vector<2x256xf32>, i32 -> vector<2x256xf32>
    %531 = vector.extract_strided_slice %530 {offsets = [0, 0], sizes = [1, 256], strides = [1, 1]} : vector<2x256xf32> to vector<1x256xf32>
    %532 = vector.broadcast %115 : f32 to vector<1x256xf32>
    %533 = arith.mulf %532, %531 : vector<1x256xf32>
    %534 = vector.extract_strided_slice %530 {offsets = [1, 0], sizes = [1, 256], strides = [1, 1]} : vector<2x256xf32> to vector<1x256xf32>
    %535 = vector.broadcast %164 : f32 to vector<1x256xf32>
    %536 = arith.mulf %535, %534 : vector<1x256xf32>
    %537 = arith.addf %533, %536 : vector<1x256xf32>
    %538 = arith.andi %458, %87 : vector<1x256xi1>
    %cst_63 = arith.constant 0.000000e+00 : f32
    %539 = vector.broadcast %cst_63 : f32 to vector<1x256xf32>
    %540 = arith.select %538, %537, %539 : vector<1x256xi1>, vector<1x256xf32>
    %541 = arith.addf %529, %540 : vector<1x256xf32>
    %c-16_i32 = arith.constant -16 : i32
    %542 = vector.broadcast %c-16_i32 : i32 to vector<1x256xi32>
    %543 = arith.cmpi sge, %50, %542 : vector<1x256xi32>
    %c240_i32 = arith.constant 240 : i32
    %544 = vector.broadcast %c240_i32 : i32 to vector<1x256xi32>
    %545 = arith.cmpi slt, %50, %544 : vector<1x256xi32>
    %546 = arith.andi %543, %545 : vector<1x256xi1>
    %c243_i32 = arith.constant 243 : i32
    %547 = tpu.dynamic_rotate %49 by %c243_i32 dim 1 : vector<2x256xf32>, i32 -> vector<2x256xf32>
    %548 = vector.extract_strided_slice %547 {offsets = [0, 0], sizes = [1, 256], strides = [1, 1]} : vector<2x256xf32> to vector<1x256xf32>
    %549 = vector.broadcast %116 : f32 to vector<1x256xf32>
    %550 = arith.mulf %549, %548 : vector<1x256xf32>
    %551 = vector.extract_strided_slice %547 {offsets = [1, 0], sizes = [1, 256], strides = [1, 1]} : vector<2x256xf32> to vector<1x256xf32>
    %552 = vector.broadcast %165 : f32 to vector<1x256xf32>
    %553 = arith.mulf %552, %551 : vector<1x256xf32>
    %554 = arith.addf %550, %553 : vector<1x256xf32>
    %555 = arith.andi %546, %57 : vector<1x256xi1>
    %cst_64 = arith.constant 0.000000e+00 : f32
    %556 = vector.broadcast %cst_64 : f32 to vector<1x256xf32>
    %557 = arith.select %555, %554, %556 : vector<1x256xi1>, vector<1x256xf32>
    %558 = arith.addf %541, %557 : vector<1x256xf32>
    %c242_i32 = arith.constant 242 : i32
    %559 = tpu.dynamic_rotate %49 by %c242_i32 dim 1 : vector<2x256xf32>, i32 -> vector<2x256xf32>
    %560 = vector.extract_strided_slice %559 {offsets = [0, 0], sizes = [1, 256], strides = [1, 1]} : vector<2x256xf32> to vector<1x256xf32>
    %561 = vector.broadcast %117 : f32 to vector<1x256xf32>
    %562 = arith.mulf %561, %560 : vector<1x256xf32>
    %563 = vector.extract_strided_slice %559 {offsets = [1, 0], sizes = [1, 256], strides = [1, 1]} : vector<2x256xf32> to vector<1x256xf32>
    %564 = vector.broadcast %166 : f32 to vector<1x256xf32>
    %565 = arith.mulf %564, %563 : vector<1x256xf32>
    %566 = arith.addf %562, %565 : vector<1x256xf32>
    %567 = arith.andi %546, %62 : vector<1x256xi1>
    %cst_65 = arith.constant 0.000000e+00 : f32
    %568 = vector.broadcast %cst_65 : f32 to vector<1x256xf32>
    %569 = arith.select %567, %566, %568 : vector<1x256xi1>, vector<1x256xf32>
    %570 = arith.addf %558, %569 : vector<1x256xf32>
    %c241_i32 = arith.constant 241 : i32
    %571 = tpu.dynamic_rotate %49 by %c241_i32 dim 1 : vector<2x256xf32>, i32 -> vector<2x256xf32>
    %572 = vector.extract_strided_slice %571 {offsets = [0, 0], sizes = [1, 256], strides = [1, 1]} : vector<2x256xf32> to vector<1x256xf32>
    %573 = vector.broadcast %118 : f32 to vector<1x256xf32>
    %574 = arith.mulf %573, %572 : vector<1x256xf32>
    %575 = vector.extract_strided_slice %571 {offsets = [1, 0], sizes = [1, 256], strides = [1, 1]} : vector<2x256xf32> to vector<1x256xf32>
    %576 = vector.broadcast %167 : f32 to vector<1x256xf32>
    %577 = arith.mulf %576, %575 : vector<1x256xf32>
    %578 = arith.addf %574, %577 : vector<1x256xf32>
    %579 = arith.andi %546, %67 : vector<1x256xi1>
    %cst_66 = arith.constant 0.000000e+00 : f32
    %580 = vector.broadcast %cst_66 : f32 to vector<1x256xf32>
    %581 = arith.select %579, %578, %580 : vector<1x256xi1>, vector<1x256xf32>
    %582 = arith.addf %570, %581 : vector<1x256xf32>
    %c240_i32_67 = arith.constant 240 : i32
    %583 = tpu.dynamic_rotate %49 by %c240_i32_67 dim 1 : vector<2x256xf32>, i32 -> vector<2x256xf32>
    %584 = vector.extract_strided_slice %583 {offsets = [0, 0], sizes = [1, 256], strides = [1, 1]} : vector<2x256xf32> to vector<1x256xf32>
    %585 = vector.broadcast %119 : f32 to vector<1x256xf32>
    %586 = arith.mulf %585, %584 : vector<1x256xf32>
    %587 = vector.extract_strided_slice %583 {offsets = [1, 0], sizes = [1, 256], strides = [1, 1]} : vector<2x256xf32> to vector<1x256xf32>
    %588 = vector.broadcast %168 : f32 to vector<1x256xf32>
    %589 = arith.mulf %588, %587 : vector<1x256xf32>
    %590 = arith.addf %586, %589 : vector<1x256xf32>
    %591 = arith.andi %546, %72 : vector<1x256xi1>
    %cst_68 = arith.constant 0.000000e+00 : f32
    %592 = vector.broadcast %cst_68 : f32 to vector<1x256xf32>
    %593 = arith.select %591, %590, %592 : vector<1x256xi1>, vector<1x256xf32>
    %594 = arith.addf %582, %593 : vector<1x256xf32>
    %c239_i32 = arith.constant 239 : i32
    %595 = tpu.dynamic_rotate %49 by %c239_i32 dim 1 : vector<2x256xf32>, i32 -> vector<2x256xf32>
    %596 = vector.extract_strided_slice %595 {offsets = [0, 0], sizes = [1, 256], strides = [1, 1]} : vector<2x256xf32> to vector<1x256xf32>
    %597 = vector.broadcast %120 : f32 to vector<1x256xf32>
    %598 = arith.mulf %597, %596 : vector<1x256xf32>
    %599 = vector.extract_strided_slice %595 {offsets = [1, 0], sizes = [1, 256], strides = [1, 1]} : vector<2x256xf32> to vector<1x256xf32>
    %600 = vector.broadcast %169 : f32 to vector<1x256xf32>
    %601 = arith.mulf %600, %599 : vector<1x256xf32>
    %602 = arith.addf %598, %601 : vector<1x256xf32>
    %603 = arith.andi %546, %77 : vector<1x256xi1>
    %cst_69 = arith.constant 0.000000e+00 : f32
    %604 = vector.broadcast %cst_69 : f32 to vector<1x256xf32>
    %605 = arith.select %603, %602, %604 : vector<1x256xi1>, vector<1x256xf32>
    %606 = arith.addf %594, %605 : vector<1x256xf32>
    %c238_i32 = arith.constant 238 : i32
    %607 = tpu.dynamic_rotate %49 by %c238_i32 dim 1 : vector<2x256xf32>, i32 -> vector<2x256xf32>
    %608 = vector.extract_strided_slice %607 {offsets = [0, 0], sizes = [1, 256], strides = [1, 1]} : vector<2x256xf32> to vector<1x256xf32>
    %609 = vector.broadcast %121 : f32 to vector<1x256xf32>
    %610 = arith.mulf %609, %608 : vector<1x256xf32>
    %611 = vector.extract_strided_slice %607 {offsets = [1, 0], sizes = [1, 256], strides = [1, 1]} : vector<2x256xf32> to vector<1x256xf32>
    %612 = vector.broadcast %170 : f32 to vector<1x256xf32>
    %613 = arith.mulf %612, %611 : vector<1x256xf32>
    %614 = arith.addf %610, %613 : vector<1x256xf32>
    %615 = arith.andi %546, %82 : vector<1x256xi1>
    %cst_70 = arith.constant 0.000000e+00 : f32
    %616 = vector.broadcast %cst_70 : f32 to vector<1x256xf32>
    %617 = arith.select %615, %614, %616 : vector<1x256xi1>, vector<1x256xf32>
    %618 = arith.addf %606, %617 : vector<1x256xf32>
    %c237_i32 = arith.constant 237 : i32
    %619 = tpu.dynamic_rotate %49 by %c237_i32 dim 1 : vector<2x256xf32>, i32 -> vector<2x256xf32>
    %620 = vector.extract_strided_slice %619 {offsets = [0, 0], sizes = [1, 256], strides = [1, 1]} : vector<2x256xf32> to vector<1x256xf32>
    %621 = vector.broadcast %122 : f32 to vector<1x256xf32>
    %622 = arith.mulf %621, %620 : vector<1x256xf32>
    %623 = vector.extract_strided_slice %619 {offsets = [1, 0], sizes = [1, 256], strides = [1, 1]} : vector<2x256xf32> to vector<1x256xf32>
    %624 = vector.broadcast %171 : f32 to vector<1x256xf32>
    %625 = arith.mulf %624, %623 : vector<1x256xf32>
    %626 = arith.addf %622, %625 : vector<1x256xf32>
    %627 = arith.andi %546, %87 : vector<1x256xi1>
    %cst_71 = arith.constant 0.000000e+00 : f32
    %628 = vector.broadcast %cst_71 : f32 to vector<1x256xf32>
    %629 = arith.select %627, %626, %628 : vector<1x256xi1>, vector<1x256xf32>
    %630 = arith.addf %618, %629 : vector<1x256xf32>
    %c-32_i32 = arith.constant -32 : i32
    %631 = vector.broadcast %c-32_i32 : i32 to vector<1x256xi32>
    %632 = arith.cmpi sge, %50, %631 : vector<1x256xi32>
    %c224_i32 = arith.constant 224 : i32
    %633 = vector.broadcast %c224_i32 : i32 to vector<1x256xi32>
    %634 = arith.cmpi slt, %50, %633 : vector<1x256xi32>
    %635 = arith.andi %632, %634 : vector<1x256xi1>
    %c227_i32 = arith.constant 227 : i32
    %636 = tpu.dynamic_rotate %49 by %c227_i32 dim 1 : vector<2x256xf32>, i32 -> vector<2x256xf32>
    %637 = vector.extract_strided_slice %636 {offsets = [0, 0], sizes = [1, 256], strides = [1, 1]} : vector<2x256xf32> to vector<1x256xf32>
    %638 = vector.broadcast %123 : f32 to vector<1x256xf32>
    %639 = arith.mulf %638, %637 : vector<1x256xf32>
    %640 = vector.extract_strided_slice %636 {offsets = [1, 0], sizes = [1, 256], strides = [1, 1]} : vector<2x256xf32> to vector<1x256xf32>
    %641 = vector.broadcast %172 : f32 to vector<1x256xf32>
    %642 = arith.mulf %641, %640 : vector<1x256xf32>
    %643 = arith.addf %639, %642 : vector<1x256xf32>
    %644 = arith.andi %635, %57 : vector<1x256xi1>
    %cst_72 = arith.constant 0.000000e+00 : f32
    %645 = vector.broadcast %cst_72 : f32 to vector<1x256xf32>
    %646 = arith.select %644, %643, %645 : vector<1x256xi1>, vector<1x256xf32>
    %647 = arith.addf %630, %646 : vector<1x256xf32>
    %c226_i32 = arith.constant 226 : i32
    %648 = tpu.dynamic_rotate %49 by %c226_i32 dim 1 : vector<2x256xf32>, i32 -> vector<2x256xf32>
    %649 = vector.extract_strided_slice %648 {offsets = [0, 0], sizes = [1, 256], strides = [1, 1]} : vector<2x256xf32> to vector<1x256xf32>
    %650 = vector.broadcast %124 : f32 to vector<1x256xf32>
    %651 = arith.mulf %650, %649 : vector<1x256xf32>
    %652 = vector.extract_strided_slice %648 {offsets = [1, 0], sizes = [1, 256], strides = [1, 1]} : vector<2x256xf32> to vector<1x256xf32>
    %653 = vector.broadcast %173 : f32 to vector<1x256xf32>
    %654 = arith.mulf %653, %652 : vector<1x256xf32>
    %655 = arith.addf %651, %654 : vector<1x256xf32>
    %656 = arith.andi %635, %62 : vector<1x256xi1>
    %cst_73 = arith.constant 0.000000e+00 : f32
    %657 = vector.broadcast %cst_73 : f32 to vector<1x256xf32>
    %658 = arith.select %656, %655, %657 : vector<1x256xi1>, vector<1x256xf32>
    %659 = arith.addf %647, %658 : vector<1x256xf32>
    %c225_i32 = arith.constant 225 : i32
    %660 = tpu.dynamic_rotate %49 by %c225_i32 dim 1 : vector<2x256xf32>, i32 -> vector<2x256xf32>
    %661 = vector.extract_strided_slice %660 {offsets = [0, 0], sizes = [1, 256], strides = [1, 1]} : vector<2x256xf32> to vector<1x256xf32>
    %662 = vector.broadcast %125 : f32 to vector<1x256xf32>
    %663 = arith.mulf %662, %661 : vector<1x256xf32>
    %664 = vector.extract_strided_slice %660 {offsets = [1, 0], sizes = [1, 256], strides = [1, 1]} : vector<2x256xf32> to vector<1x256xf32>
    %665 = vector.broadcast %174 : f32 to vector<1x256xf32>
    %666 = arith.mulf %665, %664 : vector<1x256xf32>
    %667 = arith.addf %663, %666 : vector<1x256xf32>
    %668 = arith.andi %635, %67 : vector<1x256xi1>
    %cst_74 = arith.constant 0.000000e+00 : f32
    %669 = vector.broadcast %cst_74 : f32 to vector<1x256xf32>
    %670 = arith.select %668, %667, %669 : vector<1x256xi1>, vector<1x256xf32>
    %671 = arith.addf %659, %670 : vector<1x256xf32>
    %c224_i32_75 = arith.constant 224 : i32
    %672 = tpu.dynamic_rotate %49 by %c224_i32_75 dim 1 : vector<2x256xf32>, i32 -> vector<2x256xf32>
    %673 = vector.extract_strided_slice %672 {offsets = [0, 0], sizes = [1, 256], strides = [1, 1]} : vector<2x256xf32> to vector<1x256xf32>
    %674 = vector.broadcast %126 : f32 to vector<1x256xf32>
    %675 = arith.mulf %674, %673 : vector<1x256xf32>
    %676 = vector.extract_strided_slice %672 {offsets = [1, 0], sizes = [1, 256], strides = [1, 1]} : vector<2x256xf32> to vector<1x256xf32>
    %677 = vector.broadcast %175 : f32 to vector<1x256xf32>
    %678 = arith.mulf %677, %676 : vector<1x256xf32>
    %679 = arith.addf %675, %678 : vector<1x256xf32>
    %680 = arith.andi %635, %72 : vector<1x256xi1>
    %cst_76 = arith.constant 0.000000e+00 : f32
    %681 = vector.broadcast %cst_76 : f32 to vector<1x256xf32>
    %682 = arith.select %680, %679, %681 : vector<1x256xi1>, vector<1x256xf32>
    %683 = arith.addf %671, %682 : vector<1x256xf32>
    %c223_i32 = arith.constant 223 : i32
    %684 = tpu.dynamic_rotate %49 by %c223_i32 dim 1 : vector<2x256xf32>, i32 -> vector<2x256xf32>
    %685 = vector.extract_strided_slice %684 {offsets = [0, 0], sizes = [1, 256], strides = [1, 1]} : vector<2x256xf32> to vector<1x256xf32>
    %686 = vector.broadcast %127 : f32 to vector<1x256xf32>
    %687 = arith.mulf %686, %685 : vector<1x256xf32>
    %688 = vector.extract_strided_slice %684 {offsets = [1, 0], sizes = [1, 256], strides = [1, 1]} : vector<2x256xf32> to vector<1x256xf32>
    %689 = vector.broadcast %176 : f32 to vector<1x256xf32>
    %690 = arith.mulf %689, %688 : vector<1x256xf32>
    %691 = arith.addf %687, %690 : vector<1x256xf32>
    %692 = arith.andi %635, %77 : vector<1x256xi1>
    %cst_77 = arith.constant 0.000000e+00 : f32
    %693 = vector.broadcast %cst_77 : f32 to vector<1x256xf32>
    %694 = arith.select %692, %691, %693 : vector<1x256xi1>, vector<1x256xf32>
    %695 = arith.addf %683, %694 : vector<1x256xf32>
    %c222_i32 = arith.constant 222 : i32
    %696 = tpu.dynamic_rotate %49 by %c222_i32 dim 1 : vector<2x256xf32>, i32 -> vector<2x256xf32>
    %697 = vector.extract_strided_slice %696 {offsets = [0, 0], sizes = [1, 256], strides = [1, 1]} : vector<2x256xf32> to vector<1x256xf32>
    %698 = vector.broadcast %128 : f32 to vector<1x256xf32>
    %699 = arith.mulf %698, %697 : vector<1x256xf32>
    %700 = vector.extract_strided_slice %696 {offsets = [1, 0], sizes = [1, 256], strides = [1, 1]} : vector<2x256xf32> to vector<1x256xf32>
    %701 = vector.broadcast %177 : f32 to vector<1x256xf32>
    %702 = arith.mulf %701, %700 : vector<1x256xf32>
    %703 = arith.addf %699, %702 : vector<1x256xf32>
    %704 = arith.andi %635, %82 : vector<1x256xi1>
    %cst_78 = arith.constant 0.000000e+00 : f32
    %705 = vector.broadcast %cst_78 : f32 to vector<1x256xf32>
    %706 = arith.select %704, %703, %705 : vector<1x256xi1>, vector<1x256xf32>
    %707 = arith.addf %695, %706 : vector<1x256xf32>
    %c221_i32 = arith.constant 221 : i32
    %708 = tpu.dynamic_rotate %49 by %c221_i32 dim 1 : vector<2x256xf32>, i32 -> vector<2x256xf32>
    %709 = vector.extract_strided_slice %708 {offsets = [0, 0], sizes = [1, 256], strides = [1, 1]} : vector<2x256xf32> to vector<1x256xf32>
    %710 = vector.broadcast %129 : f32 to vector<1x256xf32>
    %711 = arith.mulf %710, %709 : vector<1x256xf32>
    %712 = vector.extract_strided_slice %708 {offsets = [1, 0], sizes = [1, 256], strides = [1, 1]} : vector<2x256xf32> to vector<1x256xf32>
    %713 = vector.broadcast %178 : f32 to vector<1x256xf32>
    %714 = arith.mulf %713, %712 : vector<1x256xf32>
    %715 = arith.addf %711, %714 : vector<1x256xf32>
    %716 = arith.andi %635, %87 : vector<1x256xi1>
    %cst_79 = arith.constant 0.000000e+00 : f32
    %717 = vector.broadcast %cst_79 : f32 to vector<1x256xf32>
    %718 = arith.select %716, %715, %717 : vector<1x256xi1>, vector<1x256xf32>
    %719 = arith.addf %707, %718 : vector<1x256xf32>
    %c-48_i32 = arith.constant -48 : i32
    %720 = vector.broadcast %c-48_i32 : i32 to vector<1x256xi32>
    %721 = arith.cmpi sge, %50, %720 : vector<1x256xi32>
    %c208_i32 = arith.constant 208 : i32
    %722 = vector.broadcast %c208_i32 : i32 to vector<1x256xi32>
    %723 = arith.cmpi slt, %50, %722 : vector<1x256xi32>
    %724 = arith.andi %721, %723 : vector<1x256xi1>
    %c211_i32 = arith.constant 211 : i32
    %725 = tpu.dynamic_rotate %49 by %c211_i32 dim 1 : vector<2x256xf32>, i32 -> vector<2x256xf32>
    %726 = vector.extract_strided_slice %725 {offsets = [0, 0], sizes = [1, 256], strides = [1, 1]} : vector<2x256xf32> to vector<1x256xf32>
    %727 = vector.broadcast %130 : f32 to vector<1x256xf32>
    %728 = arith.mulf %727, %726 : vector<1x256xf32>
    %729 = vector.extract_strided_slice %725 {offsets = [1, 0], sizes = [1, 256], strides = [1, 1]} : vector<2x256xf32> to vector<1x256xf32>
    %730 = vector.broadcast %179 : f32 to vector<1x256xf32>
    %731 = arith.mulf %730, %729 : vector<1x256xf32>
    %732 = arith.addf %728, %731 : vector<1x256xf32>
    %733 = arith.andi %724, %57 : vector<1x256xi1>
    %cst_80 = arith.constant 0.000000e+00 : f32
    %734 = vector.broadcast %cst_80 : f32 to vector<1x256xf32>
    %735 = arith.select %733, %732, %734 : vector<1x256xi1>, vector<1x256xf32>
    %736 = arith.addf %719, %735 : vector<1x256xf32>
    %c210_i32 = arith.constant 210 : i32
    %737 = tpu.dynamic_rotate %49 by %c210_i32 dim 1 : vector<2x256xf32>, i32 -> vector<2x256xf32>
    %738 = vector.extract_strided_slice %737 {offsets = [0, 0], sizes = [1, 256], strides = [1, 1]} : vector<2x256xf32> to vector<1x256xf32>
    %739 = vector.broadcast %131 : f32 to vector<1x256xf32>
    %740 = arith.mulf %739, %738 : vector<1x256xf32>
    %741 = vector.extract_strided_slice %737 {offsets = [1, 0], sizes = [1, 256], strides = [1, 1]} : vector<2x256xf32> to vector<1x256xf32>
    %742 = vector.broadcast %180 : f32 to vector<1x256xf32>
    %743 = arith.mulf %742, %741 : vector<1x256xf32>
    %744 = arith.addf %740, %743 : vector<1x256xf32>
    %745 = arith.andi %724, %62 : vector<1x256xi1>
    %cst_81 = arith.constant 0.000000e+00 : f32
    %746 = vector.broadcast %cst_81 : f32 to vector<1x256xf32>
    %747 = arith.select %745, %744, %746 : vector<1x256xi1>, vector<1x256xf32>
    %748 = arith.addf %736, %747 : vector<1x256xf32>
    %c209_i32 = arith.constant 209 : i32
    %749 = tpu.dynamic_rotate %49 by %c209_i32 dim 1 : vector<2x256xf32>, i32 -> vector<2x256xf32>
    %750 = vector.extract_strided_slice %749 {offsets = [0, 0], sizes = [1, 256], strides = [1, 1]} : vector<2x256xf32> to vector<1x256xf32>
    %751 = vector.broadcast %132 : f32 to vector<1x256xf32>
    %752 = arith.mulf %751, %750 : vector<1x256xf32>
    %753 = vector.extract_strided_slice %749 {offsets = [1, 0], sizes = [1, 256], strides = [1, 1]} : vector<2x256xf32> to vector<1x256xf32>
    %754 = vector.broadcast %181 : f32 to vector<1x256xf32>
    %755 = arith.mulf %754, %753 : vector<1x256xf32>
    %756 = arith.addf %752, %755 : vector<1x256xf32>
    %757 = arith.andi %724, %67 : vector<1x256xi1>
    %cst_82 = arith.constant 0.000000e+00 : f32
    %758 = vector.broadcast %cst_82 : f32 to vector<1x256xf32>
    %759 = arith.select %757, %756, %758 : vector<1x256xi1>, vector<1x256xf32>
    %760 = arith.addf %748, %759 : vector<1x256xf32>
    %c208_i32_83 = arith.constant 208 : i32
    %761 = tpu.dynamic_rotate %49 by %c208_i32_83 dim 1 : vector<2x256xf32>, i32 -> vector<2x256xf32>
    %762 = vector.extract_strided_slice %761 {offsets = [0, 0], sizes = [1, 256], strides = [1, 1]} : vector<2x256xf32> to vector<1x256xf32>
    %763 = vector.broadcast %133 : f32 to vector<1x256xf32>
    %764 = arith.mulf %763, %762 : vector<1x256xf32>
    %765 = vector.extract_strided_slice %761 {offsets = [1, 0], sizes = [1, 256], strides = [1, 1]} : vector<2x256xf32> to vector<1x256xf32>
    %766 = vector.broadcast %182 : f32 to vector<1x256xf32>
    %767 = arith.mulf %766, %765 : vector<1x256xf32>
    %768 = arith.addf %764, %767 : vector<1x256xf32>
    %769 = arith.andi %724, %72 : vector<1x256xi1>
    %cst_84 = arith.constant 0.000000e+00 : f32
    %770 = vector.broadcast %cst_84 : f32 to vector<1x256xf32>
    %771 = arith.select %769, %768, %770 : vector<1x256xi1>, vector<1x256xf32>
    %772 = arith.addf %760, %771 : vector<1x256xf32>
    %c207_i32 = arith.constant 207 : i32
    %773 = tpu.dynamic_rotate %49 by %c207_i32 dim 1 : vector<2x256xf32>, i32 -> vector<2x256xf32>
    %774 = vector.extract_strided_slice %773 {offsets = [0, 0], sizes = [1, 256], strides = [1, 1]} : vector<2x256xf32> to vector<1x256xf32>
    %775 = vector.broadcast %134 : f32 to vector<1x256xf32>
    %776 = arith.mulf %775, %774 : vector<1x256xf32>
    %777 = vector.extract_strided_slice %773 {offsets = [1, 0], sizes = [1, 256], strides = [1, 1]} : vector<2x256xf32> to vector<1x256xf32>
    %778 = vector.broadcast %183 : f32 to vector<1x256xf32>
    %779 = arith.mulf %778, %777 : vector<1x256xf32>
    %780 = arith.addf %776, %779 : vector<1x256xf32>
    %781 = arith.andi %724, %77 : vector<1x256xi1>
    %cst_85 = arith.constant 0.000000e+00 : f32
    %782 = vector.broadcast %cst_85 : f32 to vector<1x256xf32>
    %783 = arith.select %781, %780, %782 : vector<1x256xi1>, vector<1x256xf32>
    %784 = arith.addf %772, %783 : vector<1x256xf32>
    %c206_i32 = arith.constant 206 : i32
    %785 = tpu.dynamic_rotate %49 by %c206_i32 dim 1 : vector<2x256xf32>, i32 -> vector<2x256xf32>
    %786 = vector.extract_strided_slice %785 {offsets = [0, 0], sizes = [1, 256], strides = [1, 1]} : vector<2x256xf32> to vector<1x256xf32>
    %787 = vector.broadcast %135 : f32 to vector<1x256xf32>
    %788 = arith.mulf %787, %786 : vector<1x256xf32>
    %789 = vector.extract_strided_slice %785 {offsets = [1, 0], sizes = [1, 256], strides = [1, 1]} : vector<2x256xf32> to vector<1x256xf32>
    %790 = vector.broadcast %184 : f32 to vector<1x256xf32>
    %791 = arith.mulf %790, %789 : vector<1x256xf32>
    %792 = arith.addf %788, %791 : vector<1x256xf32>
    %793 = arith.andi %724, %82 : vector<1x256xi1>
    %cst_86 = arith.constant 0.000000e+00 : f32
    %794 = vector.broadcast %cst_86 : f32 to vector<1x256xf32>
    %795 = arith.select %793, %792, %794 : vector<1x256xi1>, vector<1x256xf32>
    %796 = arith.addf %784, %795 : vector<1x256xf32>
    %c205_i32 = arith.constant 205 : i32
    %797 = tpu.dynamic_rotate %49 by %c205_i32 dim 1 : vector<2x256xf32>, i32 -> vector<2x256xf32>
    %798 = vector.extract_strided_slice %797 {offsets = [0, 0], sizes = [1, 256], strides = [1, 1]} : vector<2x256xf32> to vector<1x256xf32>
    %799 = vector.broadcast %136 : f32 to vector<1x256xf32>
    %800 = arith.mulf %799, %798 : vector<1x256xf32>
    %801 = vector.extract_strided_slice %797 {offsets = [1, 0], sizes = [1, 256], strides = [1, 1]} : vector<2x256xf32> to vector<1x256xf32>
    %802 = vector.broadcast %185 : f32 to vector<1x256xf32>
    %803 = arith.mulf %802, %801 : vector<1x256xf32>
    %804 = arith.addf %800, %803 : vector<1x256xf32>
    %805 = arith.andi %724, %87 : vector<1x256xi1>
    %cst_87 = arith.constant 0.000000e+00 : f32
    %806 = vector.broadcast %cst_87 : f32 to vector<1x256xf32>
    %807 = arith.select %805, %804, %806 : vector<1x256xi1>, vector<1x256xf32>
    %808 = arith.addf %796, %807 : vector<1x256xf32>
    %cst_88 = arith.constant 0.000000e+00 : f32
    %809 = vector.broadcast %cst_88 : f32 to vector<1x256xf32>
    %810 = arith.subf %809, %808 : vector<1x256xf32>
    %811 = math.exp %810 : vector<1x256xf32>
    %cst_89 = arith.constant 1.000000e+00 : f32
    %812 = vector.broadcast %cst_89 : f32 to vector<1x256xf32>
    %813 = arith.addf %812, %811 : vector<1x256xf32>
    %814 = tpu.reciprocal %813 : vector<1x256xf32> -> vector<1x256xf32>
    %815 = vector.broadcast %814 : vector<1x256xf32> to vector<32x256xf32>
    %816 = arith.mulf %33, %815 : vector<32x256xf32>
    %c0_90 = arith.constant 0 : index
    %c0_91 = arith.constant 0 : index
    %c0_92 = arith.constant 0 : index
    %817 = vector.load %arg5[%c0_90, %c0_91, %c0_92] : memref<1x32x256xf32, #tpu.memory_space<vmem>>, vector<1x32x256xf32>
    %818 = vector.shape_cast %817 : vector<1x32x256xf32> to vector<32x256xf32>
    %819 = vector.shape_cast %816 : vector<32x256xf32> to vector<1x32x256xf32>
    tpu.vector_store %arg5[%c0_90, %c0_91, %c0_92], %819 {strides = array<i32>} : memref<1x32x256xf32, #tpu.memory_space<vmem>>, vector<1x32x256xf32>,
    return
  }
  func.func @transform_0(%arg0: i32) -> (i32, i32, i32) {
    %c0_i32 = arith.constant 0 : i32
    %c0_i32_0 = arith.constant 0 : i32
    %c0_i32_1 = arith.constant 0 : i32
    return %arg0, %c0_i32, %c0_i32_0 : i32, i32, i32
  }
  func.func @transform_1(%arg0: i32) -> (i32, i32) {
    %c0_i32 = arith.constant 0 : i32
    %c0_i32_0 = arith.constant 0 : i32
    %c0_i32_1 = arith.constant 0 : i32
    return %c0_i32, %c0_i32_0 : i32, i32
  }
  func.func @transform_2(%arg0: i32) -> (i32, i32) {
    %c0_i32 = arith.constant 0 : i32
    %c0_i32_0 = arith.constant 0 : i32
    %c0_i32_1 = arith.constant 0 : i32
    return %c0_i32, %c0_i32_0 : i32, i32
  }
  func.func @transform_3(%arg0: i32) -> i32 {
    %c0_i32 = arith.constant 0 : i32
    %c0_i32_0 = arith.constant 0 : i32
    return %c0_i32 : i32
  }
  func.func @transform_4(%arg0: i32) -> (i32, i32, i32) {
    %c0_i32 = arith.constant 0 : i32
    %c0_i32_0 = arith.constant 0 : i32
    %c0_i32_1 = arith.constant 0 : i32
    return %arg0, %c0_i32, %c0_i32_0 : i32, i32, i32
  }
}

</mosaic_0001>

<bundles_post_ra>
// kernel: tpu_custom_call.1
= control target key start
LH: loop header
LB: loop body
LE: loop exit
PB: predicated region body
PF: predicated region fallthrough
CT: control target
= control target key end

     0   :  { %s4564_s0 = inlined_call_operand.hbm [shape: f32[2,32,256], index: 0, kind: input, shape index: {}]   ;;  %s4565_s1 = inlined_call_operand.vmem [shape: f32[2,32], index: 1, kind: input, shape index: {}]   ;;  %s4566_s2 = inlined_call_operand.vmem [shape: f32[32,2], index: 2, kind: input, shape index: {}]   ;;  %s4567_s3 = inlined_call_operand.vmem [shape: f32[98], index: 3, kind: input, shape index: {}]   ;;  %s4568_s4 = inlined_call_operand.hbm [shape: f32[2,32,256], index: 4, kind: output, shape index: {}]  }
   0x1   :  { %4636 = sst [smem:[#allocation40_spill]] %s4564_s0 }
   0x2   :  { %4637 = sst [smem:[#allocation41_spill]] %s4565_s1 }
   0x3   :  { %4638 = sst [smem:[#allocation42_spill]] %s4566_s2 }
   0x4   :  { %4639 = sst [smem:[#allocation43_spill]] %s4567_s3 }
   0x5   :  { %4640 = sst [smem:[#allocation44_spill]] %s4568_s4 }
   0x6   :  { %9 = vsyncpa [#allocation3], 0 }
   0x7   :  { %11 = vsyncpa [#allocation3 + $0x1], 0 }
   0x8   :  { %12 = vsyncpa [#allocation5], 0 }
   0x9   :  { %13 = vsyncpa [#allocation4], 0 }
   0xa   :  { %15 = vsyncpa [#allocation4 + $0x1], 0  ;;  %s2668_s15 = smov 0   ;;  %s2670_s16 = smov 0  }
   0xb   :  { %s2672_s17 = smov 0   ;;  %s2674_s18 = smov 0  }
   0xc LB: > { %4641 = sst [smem:[#allocation11_spill]] %s2572_s15  ;;  %s2689_s19 = sadd.s32 4294967295, %s2584_s18   ;;  %s2584_s18 = sphi %s2674_s18, %s4871_s18   ;;  %s2580_s17 = sphi %s2672_s17, %s4874_s17   ;;  %s2576_s16 = sphi %s2670_s16, %s4873_s16   ;;  %s2572_s15 = sphi %s2668_s15, %s4872_s15  }
   0xd   : > { %4642 = sst [smem:[#allocation12_spill]] %s2576_s16  ;;  %s2178_s20 = sadd.s32 4294967294, %s2584_s18  }
   0xe   : > { %4643 = sst [smem:[#allocation13_spill]] %s2580_s17  ;;  %s2693_s21 = sadd.s32 1, %s2584_s18  }
   0xf   : > { %4644 = sst [smem:[#allocation14_spill]] %s2584_s18  ;;  %s28_s22 = sadd.s32 1, %s2580_s17 }
  0x10   : > { %4645 = sst [smem:[#allocation15_spill]] %s2689_s19  ;;  %s25_s23 = ssub.s32 %s2584_s18, %s2693_s21 }
  0x11   : > { %4646 = sst [smem:[#allocation16_spill]] %s2693_s21  ;;  %p35_p0 = scmp.ne.s32.totalorder %s2580_s17, %s2576_s16 }
  0x12   : > { %p26_p1 = scmp.eq.s32.totalorder %s25_s23, 0  ;;  %p36_p2 = scmp.eq.s32.totalorder %s2584_s18, 0 }
  0x13   : > { %p41_p3 = scmp.ne.s32.totalorder %s2576_s16, %s2572_s15  ;;  %p4570_p4 = scmp.eq.s32.totalorder %s2689_s19, 0 }
  0x14   : > { %s2705_s24 = scalar_select %p26_p1, %s2580_s17, %s28_s22  }
  0x15   : > { %p2707_p5 = por %p36_p2, %p35_p0  ;;  %p2713_p6 = por %p4570_p4, %p41_p3 }
  0x16   : > { %4647 = sst [smem:[#allocation17_spill]] %s2705_s24  ;;  %p128_p7 = scmp.eq.s32.totalorder %s2689_s19, 1 }
  0x17   : > { %s4649_s26 = scalar_select %p2713_p6, 1, 0 }
  0x18   : > { %p134_p8 = scmp.eq.s32.totalorder %s2178_s20, 1  ;;  %p2179_p9 = scmp.ge.s32.totalorder %s2584_s18, 1 }
  0x19   : > { %p141_p10 = scmp.lt.s32.totalorder %s2584_s18, 3  ;;  %p2720_p11 = por %p128_p7, %p35_p0 }
  0x1a   : > { %p2724_p12 = por %p134_p8, %p41_p3  ;;  %s4655_s3 = sld [smem:[#allocation43_spill]] }
  0x1b   : > { %s4650_s27 = scalar_select %p2720_p11, 1, 0 }
  0x1c   : > { %s4652_s28 = scalar_select %p2724_p12, 1, 0 }
  0x1d   : > { %4651 = sst [smem:[#allocation18_spill]] %s4650_s27  ;;  %p2728_p13 = pnand %p2179_p9, %p141_p10 }
  0x1e   : > { %4653 = sst [smem:[#allocation19_spill]] %s4652_s28  ;;  %p2355_p2 = scmp.lt.s32.totalorder %s2584_s18, 2 }
  0x1f   : > { %p2342_p1 = pneg %p2728_p13  ;;  %s171_s8 = sand.u32 1, %s2580_s17  }
  0x20   : > { %s160_s6 = sshll.u32 %s4655_s3, 4  ;;  %p2748_p3 = pnand %p2355_p2, %p2707_p5  ;;  %s161_s6 = int_to_ptr.vmem [resolvable:$true] %s160_s6 }
  0x21   : > { %p2741_p7 = pnand %p2342_p1, %p4570_p4  ;;  %s2182_s10 = sshll.u32 %s171_s8, 6 }
  0x22   : > { %s2469_s11 = scalar_lea.vmem %s161_s6, 16  ;;  %p2477_p12 = scmp.lt.s32.totalorder %s161_s6, %s161_s6 }
  0x23   : > { %p2470_p8 = scmp.ne.s32.totalorder %s161_s6, %s2469_s11  ;;  %p2471_p9 = pneg %p2741_p7 }
  0x24   : > { %p2478_p11 = scmp.lt.s32.totalorder %s2469_s11, %s2469_s11 }
  0x25   : > { %p2472_p10 = pnand %p2471_p9, %p2470_p8 }
  0x26   : > { %p2479_p1 = por %p2478_p11, %p2477_p12 }
  0x27   : > { %p2473_p0 = pneg %p2472_p10 }
  0x29   : > { %p2480_p4 = pnand %p2479_p1, %p2473_p0 }
  0x2b   : > { %2483 = shalt.err (!%p2480_p4)
}
  0x2c   : > { %s2586_s12 = smov [#allocation6]   ;;  %s2297_s13 = sshll.u32 %s2584_s18, 10 }
  0x2d   : > { %2345 = dma.vmem_to_smem (!%p2741_p7), %s161_s6, 16, %s2586_s12, [#allocation5]  }
  0x2e   : > { %s175_s14 = scalar_lea.vmem [#allocation2], %s2182_s10  ;;  %s4658_s0 = sld [smem:[#allocation40_spill]] }
  0x2f   : > { %s182_s20 = sshll.u32 %s175_s14, 4  ;;  %s2764_s30 = scalar_lea.sflag [#allocation3], %s171_s8  ;;  %s2762_s20 = int_to_ptr.vmem [resolvable:$true] %s182_s20 }
  0x30   : > { %p2486_p5 = pneg %p2748_p3 }
  0x34   : > { %s2760_s25 = scalar_lea.hbm %s4658_s0, %s2297_s13  ;;  %s2489_s10 = scalar_lea.hbm %s4658_s0, 2048 }
  0x35   : > { %s2484_s5 = scalar_lea.hbm %s2760_s25, 1024  ;;  %p2490_p0 = scmp.lt.u32.totalorder %s2760_s25, %s4658_s0 }
  0x36   : > { %p2485_p4 = scmp.ne.s32.totalorder %s2760_s25, %s2484_s5  ;;  %p2491_p2 = scmp.lt.u32.totalorder %s2489_s10, %s2484_s5 }
  0x37   : > { %p2493_p8 = scmp.lt.u32.totalorder %s2484_s5, %s2760_s25 }
  0x38   : > { %p2487_p11 = pnand %p2486_p5, %p2485_p4  ;;  %p2492_p7 = por %p2491_p2, %p2490_p0 }
  0x3a   : > { %p2488_p12 = pneg %p2487_p11  ;;  %p2494_p9 = por %p2493_p8, %p2492_p7 }
  0x3c   : > { %p2495_p10 = pnand %p2494_p9, %p2488_p12 }
  0x3e   : > { %2498 = shalt.err (!%p2495_p10)
}
  0x3f   : > { %s2499_s8 = scalar_lea.vmem %s2762_s20, 1024  ;;  %s2587_s13 = smov [#allocation2]  }
  0x40   : > { %p2500_p1 = scmp.ne.s32.totalorder %s2762_s20, %s2499_s8  ;;  %s2504_s14 = sshll.u32 %s2587_s13, 4  ;;  %s2505_s14 = int_to_ptr.vmem [resolvable:$false] %s2504_s14 }
  0x41   : > { %s2506_s22 = scalar_lea.vmem %s2505_s14, 2048  ;;  %p2507_p6 = scmp.lt.s32.totalorder %s2762_s20, %s2505_s14 }
  0x42   : > { %p2502_p4 = pnand %p2500_p1, %p2486_p5  ;;  %p2508_p0 = scmp.lt.s32.totalorder %s2506_s22, %s2499_s8 }
  0x44   : > { %p2503_p11 = pneg %p2502_p4  ;;  %p2509_p2 = por %p2508_p0, %p2507_p6 }
  0x46   : > { %p2510_p7 = pnand %p2509_p2, %p2503_p11 }
  0x48   : > { %2513 = shalt.err (!%p2510_p7)
}
  0x49   : > { %s2588_s23 = smov 256   ;;  %s2589_s5 = smov 16  }
  0x4a   : > { %2349 = dma.hbm_to_vmem [thread:$0]  (!%p2748_p3), %s2760_s25, 1024, %s2762_s20, %s2764_s30, %s2588_s23, %s2588_s23, %s2589_s5  }
  0x4b   : > { %194 = sbr.rel (%p2728_p13) target bundleno = 1270 (0x4f6), region = 36 }
  0x52   : > { %s2795_s6 = sand.u32 1, %s2576_s16   ;;  %p4660_p6 = scmp.ne.s32.totalorder %s4649_s26, 0 }
  0x53   : > { %4659 = sst [smem:[#allocation20_spill]] %s2795_s6  ;;  %s4576_s7 = sshll.u32 %s2795_s6, 6 }
  0x54   : > { %s197_s10 = scalar_lea.sflag [#allocation3], %s2795_s6  ;;  %s200_s11 = scalar_lea.vmem [#allocation2], %s4576_s7 }
  0x55   : > { %2559 = dma.done.wait (%p4660_p6), %s197_s10, 1024  }
  0x56   : > { %2561 = vsyncadd (%p4660_p6), %s197_s10, 4294966272  ;;  %p4661_p3 = scmp.eq.s32.totalorder %s2689_s19, 0 }
  0x58   : > { %2563 = dma.done.wait (%p4661_p3), [#allocation5], 16   ;;  %p4662_p13 = pmov %p4661_p3 }
  0x5a   : > { %2565 = vsyncadd (%p4662_p13), [#allocation5], 4294967280 }
  0x5b   : > { %209 = sfence }
  0x5c   : > { %v2809_v0 = vld [vmem:[%s200_s11] sm:$0xff]  ;;  %v2811_v1 = vld [vmem:[%s200_s11 + $0x8] sm:$0xff]  ;;  %v2813_v2 = vld [vmem:[%s200_s11 + $0x10] sm:$0xff]  ;;  %v2590_v16 = vmov 0.0|0.0   ;;  %vm2591_vm0 = vmmov 0   ;;  %v2592_v17 = vmov 0.0   ;;  %v267_v18 = vlaneseq }
  0x5d   : > { %v255_v3 = vmax.f32 %v2809_v0, %v2811_v1  ;;  %v238_v4 = vadd.f32 %v2811_v1, %v2809_v0  ;;  %v2819_v5 = vld [vmem:[%s200_s11 + $0x18] sm:$0xff]  ;;  %v2825_v8 = vld [vmem:[%s200_s11 + $0x30] sm:$0xff]  ;;  %v2829_v10 = vld [vmem:[%s200_s11 + $0x20] sm:$0xff]  ;;  %2328 = vmatprep.subr.bf16.mxu0 %v2590_v16  ;;  %2317 = vmatprep.mubr.msk.f32.mxu0 %vm2591_vm0, %v2592_v17  ;;  %s4663_s1 = sld [smem:[#allocation41_spill]]  ;;  %vm277_vm2 = vcmask 261120   ;;  %s4664_s2 = sld [smem:[#allocation42_spill]] }
  0x5e   : > { %v258_v6 = vmax.f32 %v2813_v2, %v2819_v5  ;;  %v241_v7 = vadd.f32 %v2819_v5, %v2813_v2  ;;  %v2827_v9 = vld [vmem:[%s200_s11 + $0x38] sm:$0xff]  ;;  %v2831_v11 = vld [vmem:[%s200_s11 + $0x28] sm:$0xff]  ;;  %v2842_v21 = vand.u32 127, %v267_v18  ;;  %vm356_vm3 = vcmask 15360   ;;  %s2593_s22 = smov 51   ;;  %s2594_s23 = smov 50  }
  0x5f   : > { %256 = vmax.xlane.f32.xlu1 %v255_v3  ;;  %239 = vadd.xlane.f32.xlu0 %v238_v4  ;;  %v247_v12 = vadd.f32 %v2827_v9, %v2825_v8  ;;  %v244_v13 = vadd.f32 %v2831_v11, %v2829_v10  ;;  %v264_v14 = vmax.f32 %v2825_v8, %v2827_v9  ;;  %vm369_vm4 = vcmask 1041408   ;;  %s2595_s5 = smov 49   ;;  %s2596_s10 = smov 48  }
  0x60   : > { %v261_v15 = vmax.f32 %v2829_v10, %v2831_v11  ;;  %vm269_vm1 = vcmp.eq.s32.totalorder %v2842_v21, 0  ;;  %s2597_s11 = smov 47   ;;  %s2598_s26 = smov 46   ;;  %vm697_vm6 = vcmp.lt.s32.totalorder %v2842_v21, 51  ;;  %vm687_vm9 = vcmp.ge.s32.totalorder %v2842_v21, 48 }
  0x61   : > { %s2599_s29 = smov 45   ;;  %s2600_s9 = smov 35   ;;  %vm724_vm12 = vcmp.lt.s32.totalorder %v2842_v21, 50  ;;  %vm751_vm13 = vcmp.lt.s32.totalorder %v2842_v21, 49  ;;  %vm778_vm15 = vcmp.lt.s32.totalorder %v2842_v21, 48 }
  0x62   : > { %s2601_s20 = smov 34   ;;  %s2602_s25 = smov 33  }
  0x63   : > { %259 = vmax.xlane.f32.xlu1 %v258_v6  ;;  %242 = vadd.xlane.f32.xlu0 %v241_v7  ;;  %v276_v38 = vld [vmem:[%s4663_s1] sm:$0x3]  ;;  %v353_v43 = vld [vmem:[%s4664_s2 + $0x8] sm:$0xff]  ;;  %v354_v44 = vld [vmem:[%s4664_s2 + $0x10] sm:$0xff]  ;;  %s2603_s30 = smov 32   ;;  %s2604_s12 = smov 31  }
  0x64   : > { %v352_v39 = vld [vmem:[%s4664_s2] sm:$0xff]  ;;  %v355_v45 = vld [vmem:[%s4664_s2 + $0x18] sm:$0xff]  ;;  %s2605_s8 = smov 30   ;;  %s2606_s13 = smov 29  }
  0x65   : > { %2322 = vmatprep.mubr.msk.f32.mxu1 %vm356_vm3, %v352_v39  ;;  %s2607_s14 = smov 19   ;;  %s3447_s7 = sld [smem:[#allocation6 + $0x44]] }
  0x66   : > { %s3469_s0 = sld [smem:[#allocation6 + $0x16]]  ;;  %s3471_s1 = sld [smem:[#allocation6 + $0x47]] }
  0x67   : > { %248 = vadd.xlane.f32.xlu1 %v247_v12  ;;  %245 = vadd.xlane.f32.xlu0 %v244_v13  ;;  %s4579_s2 = smov 79   ;;  %s3486_s3 = sld [smem:[#allocation6 + $0x48]] }
  0x68   : > { %s3492_s24 = sld [smem:[#allocation6 + $0x19]]  ;;  %s3494_s17 = sld [smem:[#allocation6 + $0x4a]] }
  0x69   : > { %s3504_s16 = sld [smem:[#allocation6 + $0x4b]]  ;;  %s3530_s18 = sld [smem:[#allocation6 + $0x4c]] }
  0x6a   : > { %s3528_s21 = sld [smem:[#allocation6 + $0x1b]]  ;;  %s3534_s28 = sld [smem:[#allocation6 + $0x1c]] }
  0x6b   : > { %265 = vmax.xlane.f32.xlu1 %v264_v14  ;;  %262 = vmax.xlane.f32.xlu0 %v261_v15  ;;  %s3536_s15 = sld [smem:[#allocation6 + $0x4d]]  ;;  %s3546_s4 = sld [smem:[#allocation6 + $0x4e]] }
  0x6c   : > { %s3544_s27 = sld [smem:[#allocation6 + $0x1d]]  ;;  %s4712_s6 = smov 79  }
  0x6d   : > { %s3566_s19 = sld [smem:[#allocation6 + $0x1f]] }
  0x6e   : > { %4701 = sst [smem:[#allocation30_spill]] %s3492_s24 }
  0x6f   : > { %4703 = sst [smem:[#allocation32_spill]] %s3504_s16 }
  0x70   : > { %4707 = sst [smem:[#allocation33_spill]] %s3528_s21  ;;  %s4716_s21 = smov 77  }
  0x71   : > { %4708 = sst [smem:[#allocation34_spill]] %s3534_s28  ;;  %s3651_s28 = sld [smem:[#allocation6 + $0x26]] }
  0x72   : > { %4709 = sst [smem:[#allocation35_spill]] %s3536_s15 }
  0x73   : > { %4710 = sst [smem:[#allocation36_spill]] %s3544_s27  ;;  %s3653_s27 = sld [smem:[#allocation6 + $0x57]] }
  0x74   : > { %s3661_s15 = sld [smem:[#allocation6 + $0x58]] }
  0xec   : > { %v257_v19 = vpop.xlane.xlu1 %256  ;;  %v240_v20 = vpop.xlane.xlu0 %239 }
  0xed   : > { %v251_v22 = vmul.f32 0.00390625, %v240_v20 }
  0xef   : > { %v272_v26 = vsel %vm269_vm1, %v251_v22, %v257_v19 }
  0xf0   : > { %v260_v23 = vpop.xlane.xlu1 %259  ;;  %v243_v24 = vpop.xlane.xlu0 %242 }
  0xf1   : > { %v252_v25 = vmul.f32 0.00390625, %v243_v24 }
  0xf3   : > { %v273_v27 = vsel %vm269_vm1, %v252_v25, %v260_v23 }
  0xf4   : > { %v249_v28 = vpop.xlane.xlu1 %248  ;;  %v246_v29 = vpop.xlane.xlu0 %245  ;;  %v2329_v30 = vpack.c.bf16 %v273_v27, %v272_v26 }
  0xf5   : > { %v254_v31 = vmul.f32 0.00390625, %v249_v28  ;;  %v253_v32 = vmul.f32 0.00390625, %v246_v29 }
  0xf6   : > { %2330 = vmatpush3.bf16.msra.mxu0 %v2329_v30 }
  0xf7   : > { %2331 = vmatprep.subr.bf16.mxu0 %v2590_v16 }
  0xf8   : > { %v266_v33 = vpop.xlane.xlu1 %265  ;;  %v263_v34 = vpop.xlane.xlu0 %262 }
  0xf9   : > { %v275_v35 = vsel %vm269_vm1, %v254_v31, %v266_v33  ;;  %v274_v36 = vsel %vm269_vm1, %v253_v32, %v263_v34  ;;  %vm805_vm1 = vcmp.lt.s32.totalorder %v2842_v21, 47 }
  0xfa   : > { %v2332_v37 = vpack.c.bf16 %v275_v35, %v274_v36 }
  0xfc   : > { %2333 = vmatpush3.bf16.msra.mxu0 %v2332_v37 }
  0xff   : > { %2318 = vmatmul.mubr.msk.f32.vlgmr.msra.gmra.mrb[0].mxu0 %vm277_vm2, %v276_v38 }
 0x1d2   : > { %v347_v40 = vpop.f32.mrb[0].mxu0 }
 0x1d3   : > { %v351_v41 = vmax.f32 %v347_v40, 0.0  ;;  %v2319_v42 = vpop.f32.mrb[1].mxu0 }
 0x1d5   : > { %2320 = vmatprep.subr.msk.mxu1 %vm369_vm4, %v351_v41 }
 0x1d6   : > { %2321 = vmatpush3.msk.msra.mxu1 %vm369_vm4, %v351_v41  ;;  %vm832_vm4 = vcmp.lt.s32.totalorder %v2842_v21, 46 }
 0x1d7   : > { %2323 = vmatmul.mubr.msk.f32.vlgmr.msra.gmra.mrb[0].mxu1 %vm356_vm3, %v353_v43 }
 0x1d8   : > { %2325 = vmatprep.mubr.msk.f32.mxu1 %vm356_vm3, %v354_v44 }
 0x1db   : > { %2326 = vmatmul.mubr.msk.f32.gmra.mrb[2].mxu1 %vm356_vm3, %v355_v45 }
 0x2aa   : > { %v2324_v46 = vpop.f32.mrb[0].mxu1 }
 0x2ab   : > { %v439_v47 = vpop.f32.mrb[1].mxu1  ;;  %v461_v48 = vsel %vm356_vm3, %v2324_v46, 0.0 }
 0x2ac   : > { %462 = vadd.xlane.f32.xlu1 %v461_v48  ;;  %v458_v49 = vsel %vm356_vm3, %v439_v47, 0.0 }
 0x2ad   : > { %459 = vadd.xlane.f32.xlu0 %v458_v49 }
 0x2ae   : > { %v2327_v50 = vpop.f32.mrb[2].mxu1 }
 0x2af   : > { %v449_v51 = vpop.f32.mrb[3].mxu1  ;;  %v467_v52 = vsel %vm356_vm3, %v2327_v50, 0.0 }
 0x2b0   : > { %468 = vadd.xlane.f32.xlu1 %v467_v52  ;;  %v464_v53 = vsel %vm356_vm3, %v449_v51, 0.0  ;;  %v2909_v52 = vshrl.u32 %v267_v18, 7  ;;  %v2977_v18 = vadd.s32 128, %v2842_v21 }
 0x2b1   : > { %465 = vadd.xlane.f32.xlu0 %v464_v53 }
 0x2b2   : > { %vm539_vm5 = vcmp.eq.s32.totalorder %v2909_v52, 0 }
 0x339   : > { %v463_v54 = vpop.xlane.xlu1 %462 }
 0x33a   : > { %v471_v55 = vsub.f32 0.0, %v463_v54  ;;  %v460_v56 = vpop.xlane.xlu0 %459 }
 0x33b   : > { %v470_v57 = vsub.f32 0.0, %v460_v56 }
 0x33c   : > { %v476_v58 = vmul.f32 1.442695, %v471_v55 }
 0x33d   : > { %v474_v59 = vmul.f32 1.442695, %v470_v57  ;;  %v469_v60 = vpop.xlane.xlu1 %468 }
 0x33e   : > { %2445 = vpow2.f32 %v476_v58  ;;  %v473_v61 = vsub.f32 0.0, %v469_v60  ;;  %v466_v62 = vpop.xlane.xlu0 %465 }
 0x33f   : > { %2447 = vpow2.f32 %v474_v59  ;;  %v472_v63 = vsub.f32 0.0, %v466_v62 }
 0x340   : > { %v480_v3 = vmul.f32 1.442695, %v473_v61 }
 0x341   : > { %v478_v4 = vmul.f32 1.442695, %v472_v63 }
 0x342   : > { %2449 = vpow2.f32 %v480_v3 }
 0x343   : > { %2451 = vpow2.f32 %v478_v4 }
 0x348   : > { %v2446_v6 = vpop.eup %2445 }
 0x349   : > { %v2448_v7 = vpop.eup %2447  ;;  %v483_v12 = vadd.f32 1.0, %v2446_v6  ;;  %v2994_v6 = vand.u32 15, %v2842_v21 }
 0x34a   : > { %v482_v13 = vadd.f32 1.0, %v2448_v7  ;;  %v2997_v7 = vand.u32 15, %v2977_v18 }
 0x34b   : > { %2453 = vrcp.f32 %v483_v12  ;;  %vm547_vm7 = vcmp.ge.s32.totalorder %v2994_v6, 3  ;;  %vm4632_vm10 = vcmp.ge.s32.totalorder %v2994_v6, 2  ;;  %vm4575_vm14 = vcmp.ge.s32.totalorder %v2994_v6, 1 }
 0x34c   : > { %v2450_v14 = vpop.eup %2449  ;;  %2455 = vrcp.f32 %v482_v13  ;;  %vm548_vm8 = vcmp.ge.s32.totalorder %v2997_v7, 3  ;;  %vm4633_vm11 = vcmp.ge.s32.totalorder %v2997_v7, 2  ;;  %vm4573_vm0 = vcmp.ge.s32.totalorder %v2997_v7, 1  ;;  %vm3066_vm2 = vmand %vm687_vm9, %vm547_vm7 }
 0x34d   : > { %v2452_v15 = vpop.eup %2451  ;;  %v485_v16 = vadd.f32 1.0, %v2450_v14  ;;  %vm3074_vm3 = vmand %vm687_vm9, %vm4632_vm10 }
 0x34e   : > { %v484_v17 = vadd.f32 1.0, %v2452_v15 }
 0x34f   : > { %2457 = vrcp.f32 %v485_v16 }
 0x350   : > { %2459 = vrcp.f32 %v484_v17 }
 0x355   : > { %v2454_v19 = vpop.eup %2453 }
 0x356   : > { %v2456_v20 = vpop.eup %2455  ;;  %v2869_v22 = vmul.f32 %v2454_v19, %v2813_v2  ;;  %v2872_v23 = vmul.f32 %v2454_v19, %v2819_v5 }
 0x357   : > { %v2875_v24 = vmul.f32 %v2456_v20, %v2809_v0  ;;  %v2878_v25 = vmul.f32 %v2456_v20, %v2811_v1 }
 0x359   : > { %v2458_v26 = vpop.eup %2457  ;;  %v498_v2 = vadd.f32 %v2869_v22, %v2875_v24  ;;  %v507_v5 = vadd.f32 %v2872_v23, %v2878_v25 }
 0x35a   : > { %v2460_v27 = vpop.eup %2459  ;;  %v2881_v28 = vmul.f32 %v2458_v26, %v2825_v8  ;;  %v2884_v29 = vmul.f32 %v2458_v26, %v2827_v9 }
 0x35b   : > { %v2891_v0 = vmul.f32 %v2460_v27, %v2829_v10  ;;  %v2894_v1 = vmul.f32 %v2460_v27, %v2831_v11 }
 0x35c   : > { %v520_v30 = vmax.f32 %v2869_v22, %v2881_v28  ;;  %v529_v8 = vmax.f32 %v2872_v23, %v2884_v29 }
 0x35d   : > { %v499_v9 = vadd.f32 %v498_v2, %v2891_v0  ;;  %v508_v31 = vadd.f32 %v507_v5, %v2894_v1  ;;  %v519_v32 = vmax.f32 %v2875_v24, %v2891_v0  ;;  %v528_v10 = vmax.f32 %v2878_v25, %v2894_v1 }
 0x35f   : > { %v500_v33 = vadd.f32 %v499_v9, %v2881_v28  ;;  %v509_v11 = vadd.f32 %v508_v31, %v2884_v29  ;;  %v521_v34 = vmax.f32 %v519_v32, %v520_v30  ;;  %v530_v35 = vmax.f32 %v528_v10, %v529_v8 }
 0x361   : > { %v501_v36 = vrot.slane %v500_v33, 4  ;;  %v510_v37 = vrot.slane %v509_v11, 4  ;;  %v522_v38 = vrot.slane %v521_v34, 4  ;;  %v531_v39 = vrot.slane %v530_v35, 4 }
 0x363   : > { %v502_v40 = vadd.f32 %v501_v36, %v500_v33  ;;  %v511_v41 = vadd.f32 %v510_v37, %v509_v11  ;;  %v523_v42 = vmax.f32 %v521_v34, %v522_v38  ;;  %v532_v43 = vmax.f32 %v530_v35, %v531_v39 }
 0x365   : > { %v503_v44 = vrot.slane %v502_v40, 2  ;;  %v512_v45 = vrot.slane %v511_v41, 2  ;;  %v524_v46 = vrot.slane %v523_v42, 2  ;;  %v533_v47 = vrot.slane %v532_v43, 2 }
 0x367   : > { %v504_v48 = vadd.f32 %v503_v44, %v502_v40  ;;  %v513_v49 = vadd.f32 %v512_v45, %v511_v41  ;;  %v525_v50 = vmax.f32 %v523_v42, %v524_v46  ;;  %v534_v51 = vmax.f32 %v532_v43, %v533_v47 }
 0x369   : > { %v505_v53 = vrot.slane %v504_v48, 1  ;;  %v514_v54 = vrot.slane %v513_v49, 1  ;;  %v526_v55 = vrot.slane %v525_v50, 1  ;;  %v535_v56 = vrot.slane %v534_v51, 1 }
 0x36b   : > { %v506_v57 = vadd.f32 %v505_v53, %v504_v48  ;;  %v515_v58 = vadd.f32 %v514_v54, %v513_v49  ;;  %v527_v61 = vmax.f32 %v525_v50, %v526_v55  ;;  %v536_v62 = vmax.f32 %v534_v51, %v535_v56 }
 0x36d   : > { %v517_v59 = vmul.f32 0.03125, %v506_v57  ;;  %v518_v60 = vmul.f32 0.03125, %v515_v58 }
 0x36f   : > { %v2912_v63 = vsel %vm539_vm5, %v517_v59, %v527_v61  ;;  %v2914_v3 = vsel %vm539_vm5, %v518_v60, %v536_v62  ;;  %vm4572_vm5 = vcmp.lt.s32.totalorder %v2994_v6, 15 }
 0x370   : > { %695 = vrot.lane.b32.xlu1 %v2914_v3, %s2593_s22  ;;  %693 = vrot.lane.b32.xlu0 %v2912_v63, %s2593_s22  ;;  %s2608_s22 = smov 18  }
 0x374   : > { %720 = vrot.lane.b32.xlu1 %v2912_v63, %s2594_s23  ;;  %747 = vrot.lane.b32.xlu0 %v2912_v63, %s2595_s5 }
 0x378   : > { %722 = vrot.lane.b32.xlu1 %v2914_v3, %s2594_s23  ;;  %774 = vrot.lane.b32.xlu0 %v2912_v63, %s2596_s10  ;;  %s2609_s23 = smov 17  }
 0x37c   : > { %749 = vrot.lane.b32.xlu1 %v2914_v3, %s2595_s5  ;;  %801 = vrot.lane.b32.xlu0 %v2912_v63, %s2597_s11  ;;  %s4574_s5 = smov 16  }
 0x380   : > { %776 = vrot.lane.b32.xlu1 %v2914_v3, %s2596_s10  ;;  %828 = vrot.lane.b32.xlu0 %v2912_v63, %s2598_s26  ;;  %s2611_s10 = smov 15  }
 0x384   : > { %803 = vrot.lane.b32.xlu1 %v2914_v3, %s2597_s11  ;;  %855 = vrot.lane.b32.xlu0 %v2912_v63, %s2599_s29  ;;  %s2612_s11 = smov 14  }
 0x388   : > { %830 = vrot.lane.b32.xlu1 %v2914_v3, %s2598_s26  ;;  %888 = vrot.lane.b32.xlu0 %v2912_v63, %s2600_s9  ;;  %s2613_s26 = smov 13  }
 0x38c   : > { %857 = vrot.lane.b32.xlu1 %v2914_v3, %s2599_s29  ;;  %915 = vrot.lane.b32.xlu0 %v2912_v63, %s2601_s20  ;;  %s2614_s29 = smov 3  }
 0x390   : > { %890 = vrot.lane.b32.xlu1 %v2914_v3, %s2600_s9  ;;  %942 = vrot.lane.b32.xlu0 %v2912_v63, %s2602_s25  ;;  %s2615_s9 = smov 2  }
 0x394   : > { %917 = vrot.lane.b32.xlu1 %v2914_v3, %s2601_s20  ;;  %969 = vrot.lane.b32.xlu0 %v2912_v63, %s2603_s30  ;;  %s2616_s20 = smov 1  }
 0x398   : > { %944 = vrot.lane.b32.xlu1 %v2914_v3, %s2602_s25  ;;  %996 = vrot.lane.b32.xlu0 %v2912_v63, %s2604_s12  ;;  %s2617_s25 = smov 127  }
 0x39c   : > { %971 = vrot.lane.b32.xlu1 %v2914_v3, %s2603_s30  ;;  %1023 = vrot.lane.b32.xlu0 %v2912_v63, %s2605_s8  ;;  %s2618_s30 = smov 126  }
 0x3a0   : > { %998 = vrot.lane.b32.xlu1 %v2914_v3, %s2604_s12  ;;  %1050 = vrot.lane.b32.xlu0 %v2912_v63, %s2606_s13  ;;  %s2619_s12 = smov 125  }
 0x3a4   : > { %1025 = vrot.lane.b32.xlu1 %v2914_v3, %s2605_s8  ;;  %1083 = vrot.lane.b32.xlu0 %v2912_v63, %s2607_s14  ;;  %s2620_s8 = smov 115  }
 0x3a8   : > { %1052 = vrot.lane.b32.xlu1 %v2914_v3, %s2606_s13  ;;  %1110 = vrot.lane.b32.xlu0 %v2912_v63, %s2608_s22  ;;  %s2243_s13 = sld [smem:[#allocation6 + $0x31]] }
 0x3ac   : > { %1085 = vrot.lane.b32.xlu1 %v2914_v3, %s2607_s14  ;;  %1137 = vrot.lane.b32.xlu0 %v2912_v63, %s2609_s23  ;;  %s2972_s14 = sld [smem:[#allocation6 + $0x49]] }
 0x3ae   : > { %v703_v12 = vstv %s2243_s13  ;;  %s3020_s13 = sld [smem:[#allocation6 + $0x35]] }
 0x3b0   : > { %1112 = vrot.lane.b32.xlu1 %v2914_v3, %s2608_s22  ;;  %1164 = vrot.lane.b32.xlu0 %v2912_v63, %s4574_s5  ;;  %s2621_s22 = smov 114  }
 0x3b2   : > { %v1362_v16 = vstv %s2972_s14  ;;  %s3028_s14 = sld [smem:[#allocation6 + $0x5]] }
 0x3b3   : > { %v3013_v27 = vmul.f32 %v1362_v16, %v2914_v3  ;;  %v3031_v9 = vmul.f32 %v1362_v16, %v2912_v63 }
 0x3b4   : > { %1139 = vrot.lane.b32.xlu1 %v2914_v3, %s2609_s23  ;;  %1191 = vrot.lane.b32.xlu0 %v2912_v63, %s2611_s10  ;;  %s2979_s23 = sld [smem:[#allocation6]]  ;;  %v811_v59 = vstv %s3020_s13  ;;  %s2627_s13 = smov 99  }
 0x3b5   : > { %v1368_v35 = vrot.slane %v3013_v27, 1  ;;  %v1367_v43 = vrot.slane %v3031_v9, 1 }
 0x3b8   : > { %1166 = vrot.lane.b32.xlu1 %v2914_v3, %s4574_s5  ;;  %1218 = vrot.lane.b32.xlu0 %v2912_v63, %s2612_s11  ;;  %v835_v62 = vstv %s3028_s14  ;;  %s3186_s5 = sld [smem:[#allocation6 + $0xa]]  ;;  %s2630_s14 = smov 96  }
 0x3ba   : > { %v700_v2 = vstv %s2979_s23  ;;  %s3051_s23 = sld [smem:[#allocation6 + $0x36]] }
 0x3bc   : > { %1193 = vrot.lane.b32.xlu1 %v2914_v3, %s2611_s10  ;;  %1245 = vrot.lane.b32.xlu0 %v2912_v63, %s2613_s26  ;;  %s2981_s10 = sld [smem:[#allocation6 + $0x18]] }
 0x3c0   : > { %1220 = vrot.lane.b32.xlu1 %v2914_v3, %s2612_s11  ;;  %1278 = vrot.lane.b32.xlu0 %v2912_v63, %s2614_s29  ;;  %s2622_s11 = smov 113  }
 0x3c2   : > { %v1359_v5 = vstv %s2981_s10  ;;  %s4706_s10 = smov 80  }
 0x3c4   : > { %1247 = vrot.lane.b32.xlu1 %v2914_v3, %s2613_s26  ;;  %1305 = vrot.lane.b32.xlu0 %v2912_v63, %s2615_s9  ;;  %s2987_s26 = sld [smem:[#allocation6 + $0x1]] }
 0x3c8   : > { %1280 = vrot.lane.b32.xlu1 %v2914_v3, %s2614_s29  ;;  %1332 = vrot.lane.b32.xlu0 %v2912_v63, %s2616_s20  ;;  %s2989_s29 = sld [smem:[#allocation6 + $0x32]] }
 0x3ca   : > { %v727_v30 = vstv %s2987_s26  ;;  %s3058_s26 = sld [smem:[#allocation6 + $0x6]] }
 0x3cc   : > { %1307 = vrot.lane.b32.xlu1 %v2914_v3, %s2615_s9  ;;  %1379 = vrot.lane.b32.xlu0 %v2912_v63, %s2617_s25  ;;  %s2991_s9 = sld [smem:[#allocation6 + $0x2]] }
 0x3ce   : > { %v730_v8 = vstv %s2989_s29  ;;  %s3060_s29 = sld [smem:[#allocation6 + $0x37]] }
 0x3d0   : > { %1334 = vrot.lane.b32.xlu1 %v2914_v3, %s2616_s20  ;;  %1406 = vrot.lane.b32.xlu0 %v2912_v63, %s2618_s30  ;;  %s2999_s20 = sld [smem:[#allocation6 + $0x33]] }
 0x3d2   : > { %v754_v10 = vstv %s2991_s9  ;;  %s2626_s9 = smov 109  }
 0x3d4   : > { %1381 = vrot.lane.b32.xlu1 %v2914_v3, %s2617_s25  ;;  %1433 = vrot.lane.b32.xlu0 %v2912_v63, %s2619_s12  ;;  %s3003_s25 = sld [smem:[#allocation6 + $0x3]] }
 0x3d6   : > { %v757_v34 = vstv %s2999_s20  ;;  %s3095_s20 = sld [smem:[#allocation6 + $0x7]] }
 0x3d8   : > { %1408 = vrot.lane.b32.xlu1 %v2914_v3, %s2618_s30  ;;  %1466 = vrot.lane.b32.xlu0 %v2912_v63, %s2620_s8  ;;  %s2623_s30 = smov 112  }
 0x3da   : > { %v781_v42 = vstv %s3003_s25  ;;  %s2628_s25 = smov 98  }
 0x3dc   : > { %1435 = vrot.lane.b32.xlu1 %v2914_v3, %s2619_s12  ;;  %1493 = vrot.lane.b32.xlu0 %v2912_v63, %s2621_s22  ;;  %s3007_s12 = sld [smem:[#allocation6 + $0x34]] }
 0x3e0   : > { %1468 = vrot.lane.b32.xlu1 %v2914_v3, %s2620_s8  ;;  %1520 = vrot.lane.b32.xlu0 %v2912_v63, %s2622_s11  ;;  %s3018_s8 = sld [smem:[#allocation6 + $0x4]] }
 0x3e2   : > { %v696_v4 = vpop.permute.xlu1 %695  ;;  %v694_v13 = vpop.permute.xlu0 %693  ;;  %v784_v46 = vstv %s3007_s12  ;;  %s3122_s12 = sld [smem:[#allocation6 + $0x8]] }
 0x3e3   : > { %v698_v14 = vsel %vm697_vm6, %v694_v13, %v696_v4  ;;  %v699_v15 = vsel %vm697_vm6, %v696_v4, %v694_v13  ;;  %vm3107_vm6 = vmand %vm687_vm9, %vm4575_vm14 }
 0x3e4   : > { %1495 = vrot.lane.b32.xlu1 %v2914_v3, %s2621_s22  ;;  %v704_v17 = vmul.f32 %v703_v12, %v699_v15  ;;  %v705_v19 = vmul.f32 %v703_v12, %v698_v14  ;;  %1547 = vrot.lane.b32.xlu0 %v2912_v63, %s2623_s30  ;;  %s2624_s22 = smov 111   ;;  %v701_v36 = vmul.f32 %v700_v2, %v699_v15 }
 0x3e5   : > { %v702_v37 = vmul.f32 %v700_v2, %v698_v14 }
 0x3e6   : > { %v721_v20 = vpop.permute.xlu1 %720  ;;  %v748_v26 = vpop.permute.xlu0 %747  ;;  %v708_v31 = vrot.slane %v704_v17, 1  ;;  %v709_v32 = vrot.slane %v705_v19, 1  ;;  %v808_v58 = vstv %s3018_s8  ;;  %s2629_s8 = smov 97  }
 0x3e8   : > { %1522 = vrot.lane.b32.xlu1 %v2914_v3, %s2622_s11  ;;  %1574 = vrot.lane.b32.xlu0 %v2912_v63, %s2624_s22  ;;  %v712_v44 = vadd.f32 %v708_v31, %v701_v36  ;;  %v713_v45 = vadd.f32 %v709_v32, %v702_v37  ;;  %s2625_s11 = smov 110  }
 0x3ea   : > { %v723_v33 = vpop.permute.xlu1 %722  ;;  %v3037_v11 = vpop.permute.xlu0 %774  ;;  %v716_v4 = vsel %vm3066_vm2, %v712_v44, 0.0  ;;  %v717_v12 = vsel %vm548_vm8, %v713_v45, 0.0  ;;  %vm579_vm2 = vcmp.lt.s32.totalorder %v2994_v6, 14 }
 0x3eb   : > { %v725_v38 = vsel %vm724_vm12, %v721_v20, %v723_v33  ;;  %v726_v39 = vsel %vm724_vm12, %v723_v33, %v721_v20  ;;  %vm574_vm12 = vcmp.lt.s32.totalorder %v2997_v7, 15  ;;  %vm3208_vm14 = vmand %vm687_vm9, %vm579_vm2 }
 0x3ec   : > { %v731_v40 = vmul.f32 %v730_v8, %v726_v39  ;;  %v732_v41 = vmul.f32 %v730_v8, %v725_v38  ;;  %1549 = vrot.lane.b32.xlu1 %v2914_v3, %s2623_s30  ;;  %1601 = vrot.lane.b32.xlu0 %v2912_v63, %s2625_s11  ;;  %v728_v48 = vmul.f32 %v727_v30, %v726_v39  ;;  %s3097_s30 = sld [smem:[#allocation6 + $0x38]] }
 0x3ed   : > { %v729_v49 = vmul.f32 %v727_v30, %v725_v38  ;;  %v862_v38 = vstv %s3058_s26  ;;  %s2632_s26 = smov 94  }
 0x3ee   : > { %v735_v50 = vrot.slane %v731_v40, 1  ;;  %v736_v51 = vrot.slane %v732_v41, 1  ;;  %v750_v53 = vpop.permute.xlu1 %749  ;;  %v802_v54 = vpop.permute.xlu0 %801 }
 0x3ef   : > { %v752_v56 = vsel %vm751_vm13, %v748_v26, %v750_v53  ;;  %v753_v57 = vsel %vm751_vm13, %v750_v53, %v748_v26  ;;  %vm859_vm13 = vcmp.lt.s32.totalorder %v2842_v21, 45 }
 0x3f0   : > { %v739_v60 = vadd.f32 %v735_v50, %v728_v48  ;;  %v740_v61 = vadd.f32 %v736_v51, %v729_v49  ;;  %1576 = vrot.lane.b32.xlu1 %v2914_v3, %s2624_s22  ;;  %v758_v13 = vmul.f32 %v757_v34, %v753_v57  ;;  %v759_v14 = vmul.f32 %v757_v34, %v752_v56  ;;  %s3135_s22 = sld [smem:[#allocation6 + $0x39]] }
 0x3f1   : > { %1628 = vrot.lane.b32.xlu0 %v2912_v63, %s2626_s9  ;;  %v755_v17 = vmul.f32 %v754_v10, %v753_v57  ;;  %v756_v19 = vmul.f32 %v754_v10, %v752_v56  ;;  %v838_v34 = vstv %s3051_s23  ;;  %s3228_s23 = sld [smem:[#allocation6 + $0xb]] }
 0x3f2   : > { %v743_v15 = vsel %vm3074_vm3, %v739_v60, 0.0  ;;  %v744_v16 = vsel %vm4633_vm11, %v740_v61, 0.0  ;;  %v777_v20 = vpop.permute.xlu1 %776  ;;  %v829_v26 = vpop.permute.xlu0 %828  ;;  %v762_v8 = vrot.slane %v758_v13, 1  ;;  %v763_v31 = vrot.slane %v759_v14, 1 }
 0x3f3   : > { %v745_v2 = vadd.f32 %v743_v15, %v716_v4  ;;  %v746_v30 = vadd.f32 %v744_v16, %v717_v12  ;;  %v779_v10 = vsel %vm778_vm15, %v3037_v11, %v777_v20  ;;  %v780_v33 = vsel %vm778_vm15, %v777_v20, %v3037_v11 }
 0x3f4   : > { %1603 = vrot.lane.b32.xlu1 %v2914_v3, %s2625_s11  ;;  %v766_v36 = vadd.f32 %v762_v8, %v755_v17  ;;  %v767_v37 = vadd.f32 %v763_v31, %v756_v19  ;;  %v865_v11 = vstv %s3060_s29  ;;  %v782_v39 = vmul.f32 %v781_v42, %v780_v33  ;;  %s3154_s11 = sld [smem:[#allocation6 + $0x9]]  ;;  %s2631_s29 = smov 95  }
 0x3f5   : > { %1661 = vrot.lane.b32.xlu0 %v2912_v63, %s2627_s13  ;;  %v783_v40 = vmul.f32 %v781_v42, %v779_v10  ;;  %v785_v41 = vmul.f32 %v784_v46, %v780_v33  ;;  %v786_v44 = vmul.f32 %v784_v46, %v779_v10  ;;  %vm892_vm15 = vcmp.lt.s32.totalorder %v2842_v21, 35 }
 0x3f6   : > { %v804_v45 = vpop.permute.xlu1 %803  ;;  %v3133_v47 = vpop.permute.xlu0 %855  ;;  %v770_v48 = vsel %vm3107_vm6, %v766_v36, 0.0  ;;  %v771_v49 = vsel %vm4573_vm0, %v767_v37, 0.0  ;;  %vm580_vm3 = vcmp.lt.s32.totalorder %v2997_v7, 14  ;;  %v898_v60 = vstv %s3097_s30  ;;  %vm3172_vm6 = vmand %vm687_vm9, %vm4572_vm5  ;;  %s3288_s30 = sld [smem:[#allocation6 + $0xc]] }
 0x3f7   : > { %v806_v50 = vsel %vm805_vm1, %v802_v54, %v804_v45  ;;  %v807_v42 = vsel %vm805_vm1, %v804_v45, %v802_v54  ;;  %v772_v46 = vadd.f32 %v770_v48, %v745_v2  ;;  %v773_v51 = vadd.f32 %v771_v49, %v746_v30 }
 0x3f8   : > { %v789_v53 = vrot.slane %v785_v41, 1  ;;  %v790_v55 = vrot.slane %v786_v44, 1  ;;  %1630 = vrot.lane.b32.xlu1 %v2914_v3, %s2626_s9  ;;  %v812_v56 = vmul.f32 %v811_v59, %v807_v42  ;;  %v813_v57 = vmul.f32 %v811_v59, %v806_v50  ;;  %s3160_s9 = sld [smem:[#allocation6 + $0x3a]] }
 0x3f9   : > { %1688 = vrot.lane.b32.xlu0 %v2912_v63, %s2628_s25  ;;  %vm585_vm1 = vcmp.lt.s32.totalorder %v2994_v6, 13  ;;  %v895_v54 = vstv %s3095_s20  ;;  %v809_v12 = vmul.f32 %v808_v58, %v807_v42  ;;  %v810_v13 = vmul.f32 %v808_v58, %v806_v50  ;;  %s3295_s20 = sld [smem:[#allocation6 + $0x3d]] }
 0x3fa   : > { %v793_v61 = vadd.f32 %v789_v53, %v782_v39  ;;  %v794_v4 = vadd.f32 %v790_v55, %v783_v40  ;;  %v831_v59 = vpop.permute.xlu1 %830  ;;  %v889_v14 = vpop.permute.xlu0 %888  ;;  %v816_v15 = vrot.slane %v812_v56, 1  ;;  %v817_v16 = vrot.slane %v813_v57, 1 }
 0x3fb   : > { %v833_v17 = vsel %vm832_vm4, %v829_v26, %v831_v59  ;;  %v834_v19 = vsel %vm832_vm4, %v831_v59, %v829_v26  ;;  %vm919_vm4 = vcmp.lt.s32.totalorder %v2842_v21, 34  ;;  %v922_v26 = vstv %s3122_s12  ;;  %s3327_s12 = sld [smem:[#allocation6 + $0xd]] }
 0x3fc   : > { %v797_v20 = vsel %vm687_vm9, %v793_v61, 0.0  ;;  %v800_v2 = vadd.f32 %v794_v4, %v773_v51  ;;  %1663 = vrot.lane.b32.xlu1 %v2914_v3, %s2627_s13  ;;  %v820_v8 = vadd.f32 %v816_v15, %v809_v12  ;;  %v821_v31 = vadd.f32 %v817_v16, %v810_v13  ;;  %s3195_s13 = sld [smem:[#allocation6 + $0x3b]] }
 0x3fd   : > { %v799_v30 = vadd.f32 %v797_v20, %v772_v46  ;;  %v839_v32 = vmul.f32 %v838_v34, %v834_v19  ;;  %1715 = vrot.lane.b32.xlu0 %v2912_v63, %s2629_s8  ;;  %vm586_vm5 = vcmp.lt.s32.totalorder %v2997_v7, 13  ;;  %vm882_vm0 = vcmp.ge.s32.totalorder %v2842_v21, 32 }
 0x3fe   : > { %v836_v10 = vmul.f32 %v835_v62, %v834_v19  ;;  %v837_v33 = vmul.f32 %v835_v62, %v833_v17  ;;  %v840_v36 = vmul.f32 %v838_v34, %v833_v17  ;;  %v858_v37 = vpop.permute.xlu1 %857  ;;  %v916_v39 = vpop.permute.xlu0 %915  ;;  %v925_v40 = vstv %s3135_s22  ;;  %s2633_s22 = smov 93  }
 0x3ff   : > { %v824_v41 = vsel %vm3172_vm6, %v820_v8, 0.0  ;;  %v825_v44 = vsel %vm574_vm12, %v821_v31, 0.0  ;;  %v843_v45 = vrot.slane %v839_v32, 1  ;;  %v860_v62 = vsel %vm859_vm13, %v3133_v47, %v858_v37 }
 0x400   : > { %v826_v34 = vadd.f32 %v824_v41, %v799_v30  ;;  %v827_v48 = vadd.f32 %v825_v44, %v800_v2  ;;  %v844_v50 = vrot.slane %v840_v36, 1  ;;  %v861_v42 = vsel %vm859_vm13, %v858_v37, %v3133_v47  ;;  %1690 = vrot.lane.b32.xlu1 %v2914_v3, %s2628_s25  ;;  %vm3242_vm13 = vmand %vm687_vm9, %vm585_vm1  ;;  %s3256_s25 = sld [smem:[#allocation6 + $0x3c]] }
 0x401   : > { %v847_v46 = vadd.f32 %v843_v45, %v836_v10  ;;  %v866_v51 = vmul.f32 %v865_v11, %v861_v42  ;;  %1742 = vrot.lane.b32.xlu0 %v2912_v63, %s2630_s14  ;;  %vm946_vm6 = vcmp.lt.s32.totalorder %v2842_v21, 33  ;;  %v949_v53 = vstv %s3154_s11  ;;  %vm3275_vm9 = vmand %vm882_vm0, %vm547_vm7  ;;  %s3373_s11 = sld [smem:[#allocation6 + $0xe]] }
 0x402   : > { %v848_v55 = vadd.f32 %v844_v50, %v837_v33  ;;  %v863_v56 = vmul.f32 %v862_v38, %v861_v42  ;;  %v867_v57 = vmul.f32 %v865_v11, %v860_v62  ;;  %v891_v47 = vpop.permute.xlu1 %890  ;;  %v943_v61 = vpop.permute.xlu0 %942  ;;  %v952_v4 = vstv %s3160_s9  ;;  %s2634_s9 = smov 83  }
 0x403   : > { %v851_v12 = vsel %vm3208_vm14, %v847_v46, 0.0  ;;  %v870_v13 = vrot.slane %v866_v51, 1  ;;  %v893_v59 = vsel %vm892_vm15, %v889_v14, %v891_v47  ;;  %v894_v15 = vsel %vm892_vm15, %v891_v47, %v889_v14 }
 0x404   : > { %v852_v11 = vsel %vm580_vm3, %v848_v55, 0.0  ;;  %v853_v16 = vadd.f32 %v851_v12, %v826_v34  ;;  %v864_v19 = vmul.f32 %v862_v38, %v860_v62  ;;  %v871_v20 = vrot.slane %v867_v57, 1  ;;  %1717 = vrot.lane.b32.xlu1 %v2914_v3, %s2629_s8  ;;  %s3354_s8 = sld [smem:[#allocation6 + $0x3e]] }
 0x405   : > { %vm973_vm14 = vcmp.lt.s32.totalorder %v2842_v21, 32  ;;  %v854_v14 = vadd.f32 %v852_v11, %v827_v48  ;;  %v874_v2 = vadd.f32 %v870_v13, %v863_v56  ;;  %v899_v58 = vmul.f32 %v898_v60, %v894_v15  ;;  %1769 = vrot.lane.b32.xlu0 %v2912_v63, %s2631_s29 }
 0x406   : > { %v976_v30 = vstv %s3186_s5  ;;  %v875_v38 = vadd.f32 %v871_v20, %v864_v19  ;;  %v896_v8 = vmul.f32 %v895_v54, %v894_v15  ;;  %v900_v31 = vmul.f32 %v898_v60, %v893_v59  ;;  %v918_v32 = vpop.permute.xlu1 %917  ;;  %v970_v10 = vpop.permute.xlu0 %969  ;;  %s3389_s5 = sld [smem:[#allocation6 + $0xf]] }
 0x407   : > { %v979_v33 = vstv %s3195_s13  ;;  %v878_v36 = vsel %vm3242_vm13, %v874_v2, 0.0  ;;  %v903_v37 = vrot.slane %v899_v58, 1  ;;  %v920_v41 = vsel %vm919_vm4, %v916_v39, %v918_v32  ;;  %s2635_s13 = smov 82  }
 0x408   : > { %v921_v44 = vsel %vm919_vm4, %v918_v32, %v916_v39  ;;  %v879_v45 = vsel %vm586_vm5, %v875_v38, 0.0  ;;  %v880_v60 = vadd.f32 %v878_v36, %v853_v16  ;;  %v897_v34 = vmul.f32 %v895_v54, %v893_v59  ;;  %1744 = vrot.lane.b32.xlu1 %v2914_v3, %s2630_s14  ;;  %vm3309_vm4 = vmand %vm882_vm0, %vm4632_vm10  ;;  %s3378_s14 = sld [smem:[#allocation6 + $0x3f]] }
 0x409   : > { %v904_v48 = vrot.slane %v900_v31, 1  ;;  %v881_v39 = vadd.f32 %v879_v45, %v854_v14  ;;  %v907_v49 = vadd.f32 %v903_v37, %v896_v8  ;;  %v926_v50 = vmul.f32 %v925_v40, %v921_v44  ;;  %1796 = vrot.lane.b32.xlu0 %v2912_v63, %s2632_s26 }
 0x40a   : > { %vm1000_vm15 = vcmp.lt.s32.totalorder %v2842_v21, 31  ;;  %v923_v54 = vmul.f32 %v922_v26, %v921_v44  ;;  %v927_v46 = vmul.f32 %v925_v40, %v920_v41  ;;  %v945_v51 = vpop.permute.xlu1 %944  ;;  %v997_v55 = vpop.permute.xlu0 %996  ;;  %v1003_v56 = vstv %s3228_s23  ;;  %s3415_s23 = sld [smem:[#allocation6 + $0x11]] }
 0x40b   : > { %v908_v42 = vadd.f32 %v904_v48, %v897_v34  ;;  %v911_v57 = vsel %vm3275_vm9, %v907_v49, 0.0  ;;  %v930_v47 = vrot.slane %v926_v50, 1  ;;  %v947_v12 = vsel %vm946_vm6, %v943_v61, %v945_v51 }
 0x40c   : > { %v948_v13 = vsel %vm946_vm6, %v945_v51, %v943_v61  ;;  %v913_v59 = vadd.f32 %v911_v57, %v880_v60  ;;  %v924_v11 = vmul.f32 %v922_v26, %v920_v41  ;;  %v931_v16 = vrot.slane %v927_v46, 1  ;;  %1771 = vrot.lane.b32.xlu1 %v2914_v3, %s2631_s29  ;;  %s3403_s29 = sld [smem:[#allocation6 + $0x40]] }
 0x40d   : > { %v912_v40 = vsel %vm548_vm8, %v908_v42, 0.0  ;;  %v934_v61 = vadd.f32 %v930_v47, %v923_v54  ;;  %v953_v19 = vmul.f32 %v952_v4, %v948_v13  ;;  %1823 = vrot.lane.b32.xlu0 %v2912_v63, %s2633_s22  ;;  %v1006_v20 = vstv %s3256_s25  ;;  %s2636_s25 = smov 81  }
 0x40e   : > { %v914_v17 = vadd.f32 %v912_v40, %v881_v39  ;;  %v935_v14 = vadd.f32 %v931_v16, %v924_v11  ;;  %v950_v2 = vmul.f32 %v949_v53, %v948_v13  ;;  %v954_v58 = vmul.f32 %v952_v4, %v947_v12  ;;  %v972_v26 = vpop.permute.xlu1 %971  ;;  %v1024_v38 = vpop.permute.xlu0 %1023 }
 0x40f   : > { %vm1027_vm6 = vcmp.lt.s32.totalorder %v2842_v21, 30  ;;  %v938_v8 = vsel %vm3309_vm4, %v934_v61, 0.0  ;;  %v957_v31 = vrot.slane %v953_v19, 1  ;;  %v974_v32 = vsel %vm973_vm14, %v970_v10, %v972_v26 }
 0x410   : > { %v975_v36 = vsel %vm973_vm14, %v972_v26, %v970_v10  ;;  %v939_v4 = vsel %vm4633_vm11, %v935_v14, 0.0  ;;  %v940_v37 = vadd.f32 %v938_v8, %v913_v59  ;;  %vm4681_vm13 = vcmp.ge.s32.totalorder %v2994_v6, 1  ;;  %1798 = vrot.lane.b32.xlu1 %v2914_v3, %s2632_s26  ;;  %s3408_s26 = sld [smem:[#allocation6 + $0x10]]  ;;  %4689 = sst [smem:[#allocation22_spill]] %s3415_s23 }
 0x411   : > { %vm3341_vm9 = vmand %vm882_vm0, %vm4681_vm13  ;;  %v951_v44 = vmul.f32 %v949_v53, %v947_v12  ;;  %v958_v45 = vrot.slane %v954_v58, 1  ;;  %v941_v10 = vadd.f32 %v939_v4, %v914_v17  ;;  %v961_v60 = vadd.f32 %v957_v31, %v950_v2  ;;  %1856 = vrot.lane.b32.xlu0 %v2912_v63, %s2634_s9 }
 0x412   : > { %v980_v62 = vmul.f32 %v979_v33, %v975_v36  ;;  %v1030_v34 = vstv %s3288_s30  ;;  %v977_v39 = vmul.f32 %v976_v30, %v975_v36  ;;  %v981_v53 = vmul.f32 %v979_v33, %v974_v32  ;;  %v999_v49 = vpop.permute.xlu1 %998  ;;  %v1051_v50 = vpop.permute.xlu0 %1050  ;;  %s3410_s30 = sld [smem:[#allocation6 + $0x41]] }
 0x413   : > { %v962_v48 = vadd.f32 %v958_v45, %v951_v44  ;;  %v1033_v42 = vstv %s3295_s20  ;;  %v965_v54 = vsel %vm3341_vm9, %v961_v60, 0.0  ;;  %v1001_v51 = vsel %vm1000_vm15, %v997_v55, %v999_v49  ;;  %s3421_s20 = sld [smem:[#allocation6 + $0x42]]  ;;  %vm3429_vm9 = vmand %vm882_vm0, %vm579_vm2 }
 0x414   : > { %v984_v46 = vrot.slane %v980_v62, 1  ;;  %v1002_v57 = vsel %vm1000_vm15, %v999_v49, %v997_v55  ;;  %vm4684_vm14 = vcmp.ge.s32.totalorder %v2997_v7, 1  ;;  %v967_v12 = vadd.f32 %v965_v54, %v940_v37  ;;  %1825 = vrot.lane.b32.xlu1 %v2914_v3, %s2633_s22  ;;  %s3438_s22 = sld [smem:[#allocation6 + $0x12]] }
 0x415   : > { %v966_v47 = vsel %vm4684_vm14, %v962_v48, 0.0  ;;  %v978_v33 = vmul.f32 %v976_v30, %v974_v32  ;;  %v985_v13 = vrot.slane %v981_v53, 1  ;;  %v1007_v15 = vmul.f32 %v1006_v20, %v1002_v57  ;;  %1883 = vrot.lane.b32.xlu0 %v2912_v63, %s2635_s13  ;;  %vm3477_vm14 = vmand %vm882_vm0, %vm585_vm1 }
 0x416   : > { %v968_v40 = vadd.f32 %v966_v47, %v941_v10  ;;  %v988_v59 = vadd.f32 %v984_v46, %v977_v39  ;;  %vm1054_vm15 = vcmp.lt.s32.totalorder %v2842_v21, 29  ;;  %v1004_v55 = vmul.f32 %v1003_v56, %v1002_v57  ;;  %v1026_v16 = vpop.permute.xlu1 %1025  ;;  %v1084_v17 = vpop.permute.xlu0 %1083  ;;  %4688 = sst [smem:[#allocation21_spill]] %s3408_s26 }
 0x417   : > { %v989_v30 = vadd.f32 %v985_v13, %v978_v33  ;;  %v1008_v11 = vmul.f32 %v1006_v20, %v1001_v51  ;;  %v1057_v61 = vstv %s3327_s12  ;;  %v1011_v14 = vrot.slane %v1007_v15, 1  ;;  %s3440_s12 = sld [smem:[#allocation6 + $0x43]] }
 0x418   : > { %v992_v19 = vsel %vm882_vm0, %v988_v59, 0.0  ;;  %v1028_v2 = vsel %vm1027_vm6, %v1024_v38, %v1026_v16  ;;  %v1029_v58 = vsel %vm1027_vm6, %v1026_v16, %v1024_v38  ;;  %vm4685_vm4 = vcmp.lt.s32.totalorder %v2994_v6, 15  ;;  %1858 = vrot.lane.b32.xlu1 %v2914_v3, %s2634_s9  ;;  %s4577_s9 = smov 80  }
 0x419   : > { %v994_v26 = vadd.f32 %v992_v19, %v967_v12  ;;  %v995_v8 = vadd.f32 %v989_v30, %v968_v40  ;;  %vm3395_vm13 = vmand %vm882_vm0, %vm4685_vm4  ;;  %v1005_v31 = vmul.f32 %v1003_v56, %v1001_v51  ;;  %v1012_v32 = vrot.slane %v1008_v11, 1  ;;  %1910 = vrot.lane.b32.xlu0 %v2912_v63, %s2636_s25  ;;  %4690 = sst [smem:[#allocation23_spill]] %s3421_s20 }
 0x41a   : > { %v1015_v38 = vadd.f32 %v1011_v14, %v1004_v55  ;;  %v1034_v36 = vmul.f32 %v1033_v42, %v1029_v58  ;;  %v1035_v4 = vmul.f32 %v1033_v42, %v1028_v2  ;;  %v1060_v37 = vstv %s3354_s8  ;;  %v1053_v45 = vpop.permute.xlu1 %1052  ;;  %v3412_v10 = vpop.permute.xlu0 %1110  ;;  %4693 = sst [smem:[#allocation24_spill]] %s3438_s22  ;;  %s3445_s8 = sld [smem:[#allocation6 + $0x13]] }
 0x41b   : > { %v1016_v41 = vadd.f32 %v1012_v32, %v1005_v31  ;;  %v1031_v56 = vmul.f32 %v1030_v34, %v1029_v58  ;;  %v1032_v44 = vmul.f32 %v1030_v34, %v1028_v2  ;;  %vm1087_vm6 = vcmp.lt.s32.totalorder %v2842_v21, 19 }
 0x41c   : > { %v1019_v60 = vsel %vm3395_vm13, %v1015_v38, 0.0  ;;  %v1038_v62 = vrot.slane %v1034_v36, 1  ;;  %v1039_v48 = vrot.slane %v1035_v4, 1  ;;  %v1055_v39 = vsel %vm1054_vm15, %v1051_v50, %v1053_v45  ;;  %1885 = vrot.lane.b32.xlu1 %v2914_v3, %s2635_s13  ;;  %s3453_s13 = sld [smem:[#allocation6 + $0x45]] }
 0x41d   : > { %v1020_v34 = vsel %vm574_vm12, %v1016_v41, 0.0  ;;  %v1021_v53 = vadd.f32 %v1019_v60, %v994_v26  ;;  %v1056_v42 = vsel %vm1054_vm15, %v1053_v45, %v1051_v50  ;;  %v1090_v54 = vstv %s3373_s11  ;;  %1937 = vrot.lane.b32.xlu0 %v2912_v63, %s4577_s9  ;;  %s3451_s11 = sld [smem:[#allocation6 + $0x14]]  ;;  %s3465_s9 = sld [smem:[#allocation6 + $0x46]] }
 0x41e   : > { %v1022_v46 = vadd.f32 %v1020_v34, %v995_v8  ;;  %v1042_v51 = vadd.f32 %v1038_v62, %v1031_v56  ;;  %v1043_v57 = vadd.f32 %v1039_v48, %v1032_v44  ;;  %v1093_v47 = vstv %s3378_s14  ;;  %v1086_v40 = vpop.permute.xlu1 %1085  ;;  %v3449_v59 = vpop.permute.xlu0 %1137  ;;  %s3463_s14 = sld [smem:[#allocation6 + $0x15]] }
 0x41f   : > { %v1058_v50 = vmul.f32 %v1057_v61, %v1056_v42  ;;  %v1059_v12 = vmul.f32 %v1057_v61, %v1055_v39  ;;  %v1061_v33 = vmul.f32 %v1060_v37, %v1056_v42  ;;  %v1062_v13 = vmul.f32 %v1060_v37, %v1055_v39 }
 0x420   : > { %4694 = sst [smem:[#allocation25_spill]] %s3445_s8  ;;  %v1046_v15 = vsel %vm3429_vm9, %v1042_v51, 0.0  ;;  %v1047_v30 = vsel %vm580_vm3, %v1043_v57, 0.0  ;;  %v1088_v55 = vsel %vm1087_vm6, %v1084_v17, %v1086_v40  ;;  %v1089_v11 = vsel %vm1087_vm6, %v1086_v40, %v1084_v17  ;;  %1912 = vrot.lane.b32.xlu1 %v2914_v3, %s2636_s25  ;;  %s3484_s25 = sld [smem:[#allocation6 + $0x17]] }
 0x421   : > { %v1048_v16 = vadd.f32 %v1046_v15, %v1021_v53  ;;  %v1049_v61 = vadd.f32 %v1047_v30, %v1022_v46  ;;  %v1065_v19 = vrot.slane %v1061_v33, 1  ;;  %v1066_v14 = vrot.slane %v1062_v13, 1  ;;  %1964 = vrot.lane.b32.xlu0 %v2912_v63, %s4579_s2  ;;  %s3502_s2 = sld [smem:[#allocation6 + $0x1a]] }
 0x422   : > { %vm1077_vm15 = vcmp.ge.s32.totalorder %v2842_v21, 16  ;;  %v1094_v2 = vmul.f32 %v1093_v47, %v1089_v11  ;;  %v1095_v58 = vmul.f32 %v1093_v47, %v1088_v55  ;;  %v3488_v20 = vpop.permute.xlu1 %1112  ;;  %v3490_v31 = vpop.permute.xlu0 %1164  ;;  %v1361_v32 = vmul.f32 %v1359_v5, %v2914_v3 }
 0x423   : > { %4695 = sst [smem:[#allocation26_spill]] %s3451_s11  ;;  %v1069_v26 = vadd.f32 %v1065_v19, %v1058_v50  ;;  %v1070_v8 = vadd.f32 %v1066_v14, %v1059_v12  ;;  %v1360_v38 = vmul.f32 %v1359_v5, %v2912_v63  ;;  %v1091_v36 = vmul.f32 %v1090_v54, %v1089_v11  ;;  %vm3514_vm0 = vmand %vm1077_vm15, %vm547_vm7 }
 0x424   : > { %4696 = sst [smem:[#allocation27_spill]] %s3463_s14  ;;  %v1092_v4 = vmul.f32 %v1090_v54, %v1088_v55  ;;  %v1098_v37 = vrot.slane %v1094_v2, 1  ;;  %v1099_v41 = vrot.slane %v1095_v58, 1  ;;  %1939 = vrot.lane.b32.xlu1 %v2914_v3, %s4706_s10  ;;  %v3522_v45 = vadd.f32 %v1368_v35, %v1361_v32  ;;  %s4589_s10 = smov 78  }
 0x425   : > { %4697 = sst [smem:[#allocation28_spill]] %s3465_s9  ;;  %v1073_v56 = vsel %vm3477_vm14, %v1069_v26, 0.0  ;;  %v1074_v44 = vsel %vm586_vm5, %v1070_v8, 0.0  ;;  %v3526_v60 = vadd.f32 %v1367_v43, %v1360_v38  ;;  %1991 = vrot.lane.b32.xlu0 %v2912_v63, %s4589_s10  ;;  %vm1114_vm4 = vcmp.lt.s32.totalorder %v2842_v21, 18  ;;  %s3556_s10 = sld [smem:[#allocation6 + $0x4f]] }
 0x426   : > { %4700 = sst [smem:[#allocation29_spill]] %s3484_s25  ;;  %v1075_v62 = vadd.f32 %v1073_v56, %v1048_v16  ;;  %v1076_v48 = vadd.f32 %v1074_v44, %v1049_v61  ;;  %v1102_v39 = vadd.f32 %v1098_v37, %v1091_v36  ;;  %v1103_v34 = vadd.f32 %v1099_v41, %v1092_v4  ;;  %v1140_v43 = vpop.permute.xlu1 %1139  ;;  %v3542_v53 = vpop.permute.xlu0 %1191 }
 0x427   : > { %4702 = sst [smem:[#allocation31_spill]] %s3502_s2  ;;  %v1117_v27 = vstv %s3389_s5  ;;  %v1120_v9 = vstv %s3403_s29  ;;  %v1144_v35 = vstv %s3408_s26  ;;  %v1147_v54 = vstv %s3410_s30  ;;  %s3554_s29 = sld [smem:[#allocation6 + $0x1e]] }
 0x428   : > { %v1106_v49 = vsel %vm3514_vm0, %v1102_v39, 0.0  ;;  %v1107_v42 = vsel %vm548_vm8, %v1103_v34, 0.0  ;;  %v1171_v46 = vstv %s3415_s23  ;;  %1966 = vrot.lane.b32.xlu1 %v2914_v3, %s4712_s6  ;;  %v1174_v47 = vstv %s3421_s20  ;;  %s3568_s23 = sld [smem:[#allocation6 + $0x50]]  ;;  %s4599_s26 = smov 77  }
 0x429   : > { %v3558_v51 = vadd.f32 %v1106_v49, %v1075_v62  ;;  %v3560_v57 = vadd.f32 %v1107_v42, %v1076_v48  ;;  %v1198_v50 = vstv %s3438_s22  ;;  %vm1141_vm13 = vcmp.lt.s32.totalorder %v2842_v21, 17  ;;  %2018 = vrot.lane.b32.xlu0 %v2912_v63, %s4599_s26  ;;  %s3576_s6 = sld [smem:[#allocation6 + $0x20]]  ;;  %s3578_s20 = sld [smem:[#allocation6 + $0x51]] }
 0x42a   : > { %v1201_v12 = vstv %s3440_s12  ;;  %v1225_v33 = vstv %s3445_s8  ;;  %v1228_v13 = vstv %s3447_s7  ;;  %v3580_v40 = vpop.permute.xlu1 %1166  ;;  %v3582_v15 = vpop.permute.xlu0 %1218  ;;  %v1252_v30 = vstv %s3451_s11  ;;  %s3588_s26 = sld [smem:[#allocation6 + $0x21]]  ;;  %s3590_s8 = sld [smem:[#allocation6 + $0x52]] }
 0x42b   : > { %v1255_v55 = vstv %s3453_s13  ;;  %v1285_v11 = vstv %s3463_s14  ;;  %v1288_v63 = vstv %s3465_s9  ;;  %v1115_v16 = vsel %vm1114_vm4, %v3412_v10, %v3488_v20  ;;  %s3602_s14 = sld [smem:[#allocation6 + $0x22]]  ;;  %s3604_s11 = sld [smem:[#allocation6 + $0x53]] }
 0x42c   : > { %v1116_v61 = vsel %vm1114_vm4, %v3488_v20, %v3412_v10  ;;  %v1312_v19 = vstv %s3469_s0  ;;  %v1315_v14 = vstv %s3471_s1  ;;  %vm1168_vm6 = vcmp.lt.s32.totalorder %v2842_v21, 16  ;;  %s4714_s9 = smov 78   ;;  %s3612_s22 = sld [smem:[#allocation6 + $0x23]] }
 0x42d   : > { %4711 = sst [smem:[#allocation37_spill]] %s3554_s29  ;;  %1993 = vrot.lane.b32.xlu1 %v2914_v3, %s4714_s9  ;;  %v1339_v17 = vstv %s3484_s25  ;;  %v1342_v2 = vstv %s3486_s3  ;;  %v1386_v58 = vstv %s3492_s24  ;;  %v1142_v10 = vsel %vm1141_vm13, %v3449_v59, %v1140_v43  ;;  %s3621_s9 = sld [smem:[#allocation6 + $0x54]] }
 0x42e   : > { %vm1195_vm9 = vcmp.lt.s32.totalorder %v2842_v21, 15  ;;  %v1389_v26 = vstv %s3494_s17  ;;  %v1416_v20 = vstv %s3504_s16  ;;  %s3623_s25 = sld [smem:[#allocation6 + $0x24]]  ;;  %v1121_v32 = vmul.f32 %v1120_v9, %v1116_v61  ;;  %v3625_v36 = vpop.permute.xlu1 %1193  ;;  %v3627_v4 = vpop.permute.xlu0 %1245  ;;  %s3631_s24 = sld [smem:[#allocation6 + $0x55]] }
 0x42f   : > { %4713 = sst [smem:[#allocation38_spill]] %s3576_s6  ;;  %v1122_v38 = vmul.f32 %v1120_v9, %v1115_v16  ;;  %v1443_v41 = vstv %s3530_s18  ;;  %v1143_v56 = vsel %vm1141_vm13, %v1140_v43, %v3449_v59  ;;  %s3639_s2 = sld [smem:[#allocation6 + $0x25]]  ;;  %v1149_v48 = vmul.f32 %v1147_v54, %v1142_v10  ;;  %vm3700_vm13 = vmand %vm1077_vm15, %vm4632_vm10 }
 0x430   : > { %s3641_s16 = sld [smem:[#allocation6 + $0x56]]  ;;  %vm1222_vm14 = vcmp.lt.s32.totalorder %v2842_v21, 14  ;;  %v1148_v62 = vmul.f32 %v1147_v54, %v1143_v56  ;;  %vm1249_vm0 = vcmp.lt.s32.totalorder %v2842_v21, 13  ;;  %v1170_v42 = vsel %vm1168_vm6, %v3580_v40, %v3490_v31  ;;  %s3676_s30 = sld [smem:[#allocation6 + $0x28]] }
 0x431   : > { %2020 = vrot.lane.b32.xlu1 %v2914_v3, %s4716_s21  ;;  %s3659_s21 = sld [smem:[#allocation6 + $0x27]]  ;;  %v1125_v3 = vrot.slane %v1121_v32, 1  ;;  %v1126_v34 = vrot.slane %v1122_v38, 1  ;;  %v1118_v54 = vmul.f32 %v1117_v27, %v1116_v61  ;;  %v1119_v44 = vmul.f32 %v1117_v27, %v1115_v16  ;;  %s3717_s5 = sld [smem:[#allocation6 + $0x59]] }
 0x432   : > { %v1221_v59 = vpop.permute.xlu1 %1220  ;;  %v3665_v9 = vpop.permute.xlu0 %1278  ;;  %v1153_v39 = vrot.slane %v1149_v48, 1  ;;  %v1169_v49 = vsel %vm1168_vm6, %v3490_v31, %v3580_v40  ;;  %v1146_v32 = vmul.f32 %v1144_v35, %v1142_v10  ;;  %v1152_v8 = vrot.slane %v1148_v62, 1  ;;  %s3871_s1 = sld [smem:[#allocation6 + $0x5a]]  ;;  %s3880_s6 = sld [smem:[#allocation6 + $0x5b]] }
 0x433   : > { %v1129_v5 = vadd.f32 %v1125_v3, %v1118_v54  ;;  %v1130_v61 = vadd.f32 %v1126_v34, %v1119_v44  ;;  %v1175_v27 = vmul.f32 %v1174_v47, %v1170_v42  ;;  %vm1282_vm4 = vcmp.lt.s32.totalorder %v2842_v21, 3  ;;  %s3878_s12 = sld [smem:[#allocation6 + $0x2a]]  ;;  %s3896_s0 = sld [smem:[#allocation6 + $0x2b]] }
 0x434   : > { %4715 = sst [smem:[#allocation39_spill]] %s3623_s25  ;;  %v1176_v40 = vmul.f32 %v1174_v47, %v1169_v49  ;;  %v1145_v34 = vmul.f32 %v1144_v35, %v1143_v56  ;;  %v1157_v3 = vadd.f32 %v1153_v39, %v1146_v32  ;;  %v1197_v54 = vsel %vm1195_vm9, %v3625_v36, %v3542_v53  ;;  %s3719_s25 = sld [smem:[#allocation6 + $0x29]] }
 0x435   : > { %vm1309_vm6 = vcmp.lt.s32.totalorder %v2842_v21, 2  ;;  %v1196_v35 = vsel %vm1195_vm9, %v3542_v53, %v3625_v36  ;;  %v1133_v32 = vsel %vm3700_vm13, %v1129_v5, 0.0  ;;  %v1134_v37 = vsel %vm4633_vm11, %v1130_v61, 0.0  ;;  %s3925_s7 = sld [smem:[#allocation6 + $0x5c]]  ;;  %s4747_s29 = sld [smem:[#allocation35_spill]] }
 0x436   : > { %v1248_v16 = vpop.permute.xlu1 %1247  ;;  %v3693_v48 = vpop.permute.xlu0 %1305  ;;  %v1156_v44 = vadd.f32 %v1152_v8, %v1145_v34  ;;  %v1179_v62 = vrot.slane %v1175_v27, 1  ;;  %vm4722_vm10 = vcmp.ge.s32.totalorder %v2994_v6, 1  ;;  %v1180_v36 = vrot.slane %v1176_v40, 1  ;;  %s3927_s17 = sld [smem:[#allocation6 + $0x2c]]  ;;  %s3970_s18 = sld [smem:[#allocation6 + $0x5d]] }
 0x437   : > { %vm3738_vm9 = vmand %vm1077_vm15, %vm4722_vm10  ;;  %v1202_v5 = vmul.f32 %v1201_v12, %v1197_v54  ;;  %v1224_v8 = vsel %vm1222_vm14, %v1221_v59, %v3582_v15  ;;  %vm1336_vm13 = vcmp.lt.s32.totalorder %v2842_v21, 1  ;;  %vm4725_vm11 = vcmp.ge.s32.totalorder %v2997_v7, 1  ;;  %s4745_s3 = sld [smem:[#allocation31_spill]]  ;;  %s4754_s13 = sld [smem:[#allocation34_spill]] }
 0x438   : > { %v1161_v27 = vsel %vm4725_vm11, %v1157_v3, 0.0  ;;  %v1172_v31 = vmul.f32 %v1171_v46, %v1170_v42  ;;  %v1203_v34 = vmul.f32 %v1201_v12, %v1196_v35  ;;  %v1223_v40 = vsel %vm1222_vm14, %v3582_v15, %v1221_v59 }
 0x439   : > { %v1135_v56 = vadd.f32 %v1133_v32, %v3558_v51  ;;  %v1136_v39 = vadd.f32 %v1134_v37, %v3560_v57  ;;  %v1173_v61 = vmul.f32 %v1171_v46, %v1169_v49  ;;  %v1251_v42 = vsel %vm1249_vm0, %v1248_v16, %v3627_v4  ;;  %4739 = sst [smem:[#allocation21_spill]] %s3896_s0 }
 0x43a   : > { %v1281_v43 = vpop.permute.xlu1 %1280  ;;  %v3732_v10 = vpop.permute.xlu0 %1332  ;;  %v1160_v12 = vsel %vm3738_vm9, %v1156_v44, 0.0  ;;  %v1183_v3 = vadd.f32 %v1179_v62, %v1172_v31  ;;  %v1229_v15 = vmul.f32 %v1228_v13, %v1224_v8  ;;  %v1250_v51 = vsel %vm1249_vm0, %v3627_v4, %v1248_v16  ;;  %vm3853_vm9 = vmand %vm1077_vm15, %vm585_vm1 }
 0x43b   : > { %v1163_v46 = vadd.f32 %v1161_v27, %v1136_v39  ;;  %v1184_v59 = vadd.f32 %v1180_v36, %v1173_v61  ;;  %v1206_v49 = vrot.slane %v1202_v5, 1  ;;  %v1230_v32 = vmul.f32 %v1228_v13, %v1223_v40 }
 0x43c   : > { %v1207_v53 = vrot.slane %v1203_v34, 1  ;;  %v1256_v44 = vmul.f32 %v1255_v55, %v1251_v42  ;;  %v1806_v47 = vstv %s3717_s5  ;;  %v1830_v62 = vstv %s3719_s25  ;;  %s4862_s5 = sld [smem:[#allocation44_spill]] }
 0x43d   : > { %v1162_v31 = vadd.f32 %v1160_v12, %v1135_v56  ;;  %v1199_v38 = vmul.f32 %v1198_v50, %v1197_v54  ;;  %v1257_v4 = vmul.f32 %v1255_v55, %v1250_v51  ;;  %v1284_v16 = vsel %vm1282_vm4, %v1281_v43, %v3665_v9 }
 0x43e   : > { %v1308_v57 = vpop.permute.xlu1 %1307  ;;  %v3772_v37 = vpop.permute.xlu0 %1379  ;;  %v1187_v39 = vsel %vm1077_vm15, %v1183_v3, 0.0  ;;  %v1200_v13 = vmul.f32 %v1198_v50, %v1196_v35  ;;  %v1233_v36 = vrot.slane %v1229_v15, 1  ;;  %v1283_v54 = vsel %vm1282_vm4, %v3665_v9, %v1281_v43  ;;  %vm3835_vm4 = vmand %vm1077_vm15, %vm579_vm2 }
 0x43f   : > { %v1190_v55 = vadd.f32 %v1184_v59, %v1163_v46  ;;  %v1210_v61 = vadd.f32 %v1206_v49, %v1199_v38  ;;  %v1234_v27 = vrot.slane %v1230_v32, 1  ;;  %v1311_v34 = vsel %vm1309_vm6, %v1308_v57, %v3693_v48 }
 0x440   : > { %vm1383_vm10 = vcmp.lt.s32.totalorder %v2842_v21, 127  ;;  %vm4730_vm11 = vcmp.lt.s32.totalorder %v2994_v6, 15  ;;  %v1211_v9 = vadd.f32 %v1207_v53, %v1200_v13  ;;  %v1226_v43 = vmul.f32 %v1225_v33, %v1224_v8 }
 0x441   : > { %vm3804_vm14 = vmand %vm1077_vm15, %vm4730_vm11  ;;  %v1260_v38 = vrot.slane %v1256_v44, 1  ;;  %v1289_v35 = vmul.f32 %v1288_v63, %v1284_v16  ;;  %v1227_v12 = vmul.f32 %v1225_v33, %v1223_v40  ;;  %v1261_v3 = vrot.slane %v1257_v4, 1 }
 0x442   : > { %v1335_v56 = vpop.permute.xlu1 %1334  ;;  %v3794_v5 = vpop.permute.xlu0 %1406  ;;  %v1290_v15 = vmul.f32 %v1288_v63, %v1283_v54  ;;  %v1310_v46 = vsel %vm1309_vm6, %v3693_v48, %v1308_v57  ;;  %vm1410_vm0 = vcmp.lt.s32.totalorder %v2842_v21, 126  ;;  %v1237_v59 = vadd.f32 %v1233_v36, %v1226_v43 }
 0x443   : > { %v1253_v49 = vmul.f32 %v1252_v30, %v1251_v42  ;;  %v1316_v8 = vmul.f32 %v1315_v14, %v1311_v34  ;;  %v1338_v32 = vsel %vm1336_vm13, %v1335_v56, %v3732_v10  ;;  %v1214_v63 = vsel %vm3804_vm14, %v1210_v61, 0.0 }
 0x444   : > { %v1238_v42 = vadd.f32 %v1234_v27, %v1227_v12  ;;  %v1254_v57 = vmul.f32 %v1252_v30, %v1250_v51  ;;  %v1337_v53 = vsel %vm1336_vm13, %v3732_v10, %v1335_v56  ;;  %v1215_v44 = vsel %vm574_vm12, %v1211_v9, 0.0 }
 0x445   : > { %v1264_v4 = vadd.f32 %v1260_v38, %v1253_v49  ;;  %v1293_v13 = vrot.slane %v1289_v35, 1  ;;  %v1317_v36 = vmul.f32 %v1315_v14, %v1310_v46  ;;  %vm1437_vm6 = vcmp.lt.s32.totalorder %v2842_v21, 125 }
 0x446   : > { %v1382_v33 = vpop.permute.xlu1 %1381  ;;  %v3827_v40 = vpop.permute.xlu0 %1433  ;;  %v1189_v61 = vadd.f32 %v1187_v39, %v1162_v31  ;;  %v1265_v10 = vadd.f32 %v1261_v3, %v1254_v57  ;;  %v1294_v51 = vrot.slane %v1290_v15, 1  ;;  %v1343_v56 = vmul.f32 %v1342_v2, %v1338_v32 }
 0x447   : > { %v1241_v14 = vsel %vm3835_vm4, %v1237_v59, 0.0  ;;  %v1286_v27 = vmul.f32 %v1285_v11, %v1284_v16  ;;  %v1320_v50 = vrot.slane %v1316_v8, 1  ;;  %v1344_v31 = vmul.f32 %v1342_v2, %v1337_v53 }
 0x448   : > { %v1216_v43 = vadd.f32 %v1214_v63, %v1189_v61  ;;  %v1217_v38 = vadd.f32 %v1215_v44, %v1190_v55  ;;  %v1242_v35 = vsel %vm580_vm3, %v1238_v42, 0.0  ;;  %v1287_v12 = vmul.f32 %v1285_v11, %v1283_v54 }
 0x449   : > { %v1268_v3 = vsel %vm3853_vm9, %v1264_v4, 0.0  ;;  %v1297_v16 = vadd.f32 %v1293_v13, %v1286_v27  ;;  %v1313_v15 = vmul.f32 %v1312_v19, %v1311_v34  ;;  %v1321_v2 = vrot.slane %v1317_v36, 1 }
 0x44a   : > { %v1409_v39 = vpop.permute.xlu1 %1408  ;;  %v3865_v9 = vpop.permute.xlu0 %1466  ;;  %vm1470_vm15 = vcmp.lt.s32.totalorder %v2842_v21, 115  ;;  %v1243_v55 = vadd.f32 %v1241_v14, %v1216_v43  ;;  %v1269_v11 = vsel %vm586_vm5, %v1265_v10, 0.0  ;;  %v1298_v54 = vadd.f32 %v1294_v51, %v1287_v12 }
 0x44b   : > { %v1347_v59 = vrot.slane %v1343_v56, 1  ;;  %v1314_v49 = vmul.f32 %v1312_v19, %v1310_v46  ;;  %v1324_v8 = vadd.f32 %v1320_v50, %v1313_v15  ;;  %v1348_v63 = vrot.slane %v1344_v31, 1 }
 0x44c   : > { %v1384_v34 = vsel %vm1383_vm10, %v3772_v37, %v1382_v33  ;;  %v1244_v57 = vadd.f32 %v1242_v35, %v1217_v38  ;;  %v1270_v44 = vadd.f32 %v1268_v3, %v1243_v55  ;;  %v1340_v4 = vmul.f32 %v1339_v17, %v1338_v32 }
 0x44d   : > { %v1385_v13 = vsel %vm1383_vm10, %v1382_v33, %v3772_v37  ;;  %v1301_v19 = vsel %vm547_vm7, %v1297_v16, 0.0  ;;  %v1325_v46 = vadd.f32 %v1321_v2, %v1314_v49  ;;  %v1341_v36 = vmul.f32 %v1339_v17, %v1337_v53 }
 0x44e   : > { %v1436_v48 = vpop.permute.xlu1 %1435  ;;  %v3889_v42 = vpop.permute.xlu0 %1493  ;;  %v1411_v61 = vsel %vm1410_vm0, %v3794_v5, %v1409_v39  ;;  %v1271_v30 = vadd.f32 %v1269_v11, %v1244_v57  ;;  %v1302_v32 = vsel %vm548_vm8, %v1298_v54, 0.0  ;;  %v1351_v10 = vadd.f32 %v1347_v59, %v1340_v4 }
 0x44f   : > { %v1390_v37 = vmul.f32 %v1389_v26, %v1384_v34  ;;  %vm1497_vm13 = vcmp.lt.s32.totalorder %v2842_v21, 114  ;;  %vm4741_vm10 = vcmp.ge.s32.totalorder %v2994_v6, 2  ;;  %v1352_v17 = vadd.f32 %v1348_v63, %v1341_v36 }
 0x450   : > { %v1328_v33 = vsel %vm4741_vm10, %v1324_v8, 0.0  ;;  %v1391_v53 = vmul.f32 %v1389_v26, %v1385_v13  ;;  %v1412_v51 = vsel %vm1410_vm0, %v1409_v39, %v3794_v5  ;;  %v1303_v27 = vadd.f32 %v1301_v19, %v1270_v44 }
 0x451   : > { %v1417_v50 = vmul.f32 %v1416_v20, %v1411_v61  ;;  %v1438_v31 = vsel %vm1437_vm6, %v3827_v40, %v1436_v48  ;;  %v1833_v43 = vstv %s3871_s1  ;;  %v1304_v26 = vadd.f32 %v1302_v32, %v1271_v30 }
 0x452   : > { %v1469_v56 = vpop.permute.xlu1 %1468  ;;  %v3917_v14 = vpop.permute.xlu0 %1520  ;;  %vm4742_vm11 = vcmp.ge.s32.totalorder %v2997_v7, 2  ;;  %vm1524_vm14 = vcmp.lt.s32.totalorder %v2842_v21, 113  ;;  %v1863_v39 = vstv %s3878_s12  ;;  %v1866_v38 = vstv %s3880_s6  ;;  %s4863_s12 = sld [smem:[#allocation18_spill]] }
 0x453   : > { %v1329_v5 = vsel %vm4742_vm11, %v1325_v46, 0.0  ;;  %v1330_v35 = vadd.f32 %v1328_v33, %v1303_v27  ;;  %vm4744_vm0 = vcmp.ge.s32.totalorder %v2994_v6, 1  ;;  %v1394_v3 = vrot.slane %v1390_v37, 1 }
 0x454   : > { %v1355_v12 = vsel %vm4744_vm0, %v1351_v10, 0.0  ;;  %v1418_v16 = vmul.f32 %v1416_v20, %v1412_v51  ;;  %vm4746_vm4 = vcmp.ge.s32.totalorder %v2997_v7, 1  ;;  %v1395_v2 = vrot.slane %v1391_v53, 1 }
 0x455   : > { %v1356_v15 = vsel %vm4746_vm4, %v1352_v17, 0.0  ;;  %v1439_v55 = vsel %vm1437_vm6, %v1436_v48, %v3827_v40  ;;  %v1444_v11 = vmul.f32 %v1443_v41, %v1438_v31  ;;  %v1331_v59 = vadd.f32 %v1329_v5, %v1304_v26 }
 0x456   : > { %v1496_v54 = vpop.permute.xlu1 %1495  ;;  %v1421_v49 = vrot.slane %v1417_v50, 1  ;;  %v1471_v8 = vsel %vm1470_vm15, %v3865_v9, %v1469_v56  ;;  %v3948_v20 = vpop.permute.xlu0 %1547  ;;  %v1890_v63 = vstv %s3896_s0  ;;  %v1357_v57 = vadd.f32 %v1355_v12, %v1330_v35  ;;  %s4749_s0 = sld [smem:[#allocation33_spill]] }
 0x457   : > { %v1387_v44 = vmul.f32 %v1386_v58, %v1384_v34  ;;  %v1388_v4 = vmul.f32 %v1386_v58, %v1385_v13  ;;  %v4748_v40 = vstv %s4745_s3  ;;  %v1358_v19 = vadd.f32 %v1356_v15, %v1331_v59 }
 0x458   : > { %v1414_v48 = vmul.f32 %v4748_v40, %v1411_v61  ;;  %v1422_v46 = vrot.slane %v1418_v16, 1  ;;  %v1445_v36 = vmul.f32 %v1443_v41, %v1439_v55  ;;  %v1472_v30 = vsel %vm1470_vm15, %v1469_v56, %v3865_v9  ;;  %p4864_p12 = scmp.ne.s32.totalorder %s4863_s12, 0 }
 0x459   : > { %vm1551_vm6 = vcmp.lt.s32.totalorder %v2842_v21, 112  ;;  %v1398_v32 = vadd.f32 %v1394_v3, %v1387_v44  ;;  %v1399_v34 = vadd.f32 %v1395_v2, %v1388_v4  ;;  %v1448_v10 = vrot.slane %v1444_v11, 1 }
 0x45a   : > { %vm1463_vm9 = vcmp.lt.s32.totalorder %v2977_v18, 240  ;;  %v4750_v58 = vstv %s4747_s29  ;;  %v1523_v61 = vpop.permute.xlu1 %1522  ;;  %vm1578_vm10 = vcmp.lt.s32.totalorder %v2842_v21, 111  ;;  %v4751_v37 = vmov %v4748_v40  ;;  %v1575_v17 = vpop.permute.xlu0 %1574 }
 0x45b   : > { %v1477_v13 = vmul.f32 %v4750_v58, %v1471_v8  ;;  %v1415_v41 = vmul.f32 %v4751_v37, %v1412_v51  ;;  %v1425_v33 = vadd.f32 %v1421_v49, %v1414_v48  ;;  %v1893_v53 = vstv %s3925_s7 }
 0x45c   : > { %v1917_v9 = vstv %s3927_s17  ;;  %v1377_v56 = vadd.f32 %v3526_v60, %v1357_v57  ;;  %v4752_v27 = vstv %s4749_s0  ;;  %v4753_v26 = vmov %v4750_v58  ;;  %s4074_s0 = sld [smem:[#allocation6 + $0x2d]]  ;;  %s2641_s17 = smov [#allocation7]  }
 0x45d   : > { %v1441_v50 = vmul.f32 %v4752_v27, %v1438_v31  ;;  %v1478_v5 = vmul.f32 %v4753_v26, %v1472_v30  ;;  %v1498_v35 = vsel %vm1497_vm13, %v3889_v42, %v1496_v54  ;;  %v1378_v51 = vadd.f32 %v3522_v45, %v1358_v19  ;;  %s2518_s3 = sshll.u32 %s2641_s17, 4  ;;  %s2519_s3 = int_to_ptr.vmem [resolvable:$false] %s2518_s3 }
 0x45e   : > { %v1426_v12 = vadd.f32 %v1422_v46, %v1415_v41  ;;  %v1449_v3 = vrot.slane %v1445_v36, 1  ;;  %v1499_v16 = vsel %vm1497_vm13, %v1496_v54, %v3889_v42  ;;  %vm4755_vm15 = vcmp.lt.s32.totalorder %v2994_v6, 15  ;;  %v1550_v11 = vpop.permute.xlu1 %1549  ;;  %v1602_v44 = vpop.permute.xlu0 %1601  ;;  %s2520_s29 = scalar_lea.vmem %s2519_s3, 2048 }
 0x45f   : > { %v1402_v60 = vsel %vm4755_vm15, %v1398_v32, 0.0  ;;  %v1403_v31 = vsel %vm574_vm12, %v1399_v34, 0.0  ;;  %v1452_v15 = vadd.f32 %v1448_v10, %v1441_v50  ;;  %v1481_v2 = vrot.slane %v1477_v13, 1 }
 0x460   : > { %vm1605_vm11 = vcmp.lt.s32.totalorder %v2842_v21, 110  ;;  %v1429_v45 = vsel %vm579_vm2, %v1425_v33, 0.0  ;;  %v4756_v59 = vmov %v4752_v27  ;;  %v4757_v57 = vstv %s3546_s4  ;;  %s4762_s4 = sld [smem:[#allocation36_spill]] }
 0x461   : > { %v1442_v49 = vmul.f32 %v4756_v59, %v1439_v55  ;;  %v1504_v42 = vmul.f32 %v4757_v57, %v1498_v35  ;;  %v1525_v54 = vsel %vm1524_vm14, %v3917_v14, %v1523_v61  ;;  %v4758_v4 = vstv %s4754_s13 }
 0x462   : > { %v1474_v40 = vmul.f32 %v4758_v4, %v1471_v8  ;;  %v1482_v48 = vrot.slane %v1478_v5, 1  ;;  %v4759_v19 = vmov %v4757_v57  ;;  %v1526_v36 = vsel %vm1524_vm14, %v1523_v61, %v3917_v14  ;;  %v1577_v27 = vpop.permute.xlu1 %1576  ;;  %vm4027_vm14 = vmand %vm1463_vm9, %vm548_vm8 }
 0x463   : > { %v1505_v46 = vmul.f32 %v4759_v19, %v1499_v16  ;;  %v1404_v32 = vadd.f32 %v1402_v60, %v1377_v56  ;;  %v1405_v55 = vadd.f32 %v1403_v31, %v1378_v51  ;;  %v1430_v34 = vsel %vm580_vm3, %v1426_v12, 0.0  ;;  %v1629_v26 = vpop.permute.xlu0 %1628 }
 0x464   : > { %v1453_v10 = vadd.f32 %v1449_v3, %v1442_v49  ;;  %v1456_v58 = vsel %vm585_vm1, %v1452_v15, 0.0  ;;  %v4760_v13 = vmov %v4758_v4  ;;  %v1485_v37 = vadd.f32 %v1481_v2, %v1474_v40 }
 0x465   : > { %v1475_v8 = vmul.f32 %v4760_v13, %v1472_v30  ;;  %v4761_v41 = vstv %s3556_s10  ;;  %vm1632_vm13 = vcmp.lt.s32.totalorder %v2842_v21, 109  ;;  %v1431_v14 = vadd.f32 %v1429_v45, %v1404_v32  ;;  %s4767_s10 = sld [smem:[#allocation37_spill]] }
 0x466   : > { %v1531_v33 = vmul.f32 %v4761_v41, %v1525_v54  ;;  %v1508_v61 = vrot.slane %v1504_v42, 1  ;;  %v4763_v56 = vmov %v4761_v41  ;;  %v1920_v5 = vstv %s3970_s18 }
 0x467   : > { %v1532_v50 = vmul.f32 %v4763_v56, %v1526_v36  ;;  %v1432_v51 = vadd.f32 %v1430_v34, %v1405_v55  ;;  %v1486_v12 = vadd.f32 %v1482_v48, %v1475_v8  ;;  %v1509_v3 = vrot.slane %v1505_v46, 1  ;;  %v1604_v48 = vpop.permute.xlu1 %1603  ;;  %v1662_v34 = vpop.permute.xlu0 %1661 }
 0x468   : > { %v1553_v30 = vsel %vm1551_vm6, %v1550_v11, %v3948_v20  ;;  %v1457_v60 = vsel %vm586_vm5, %v1453_v10, 0.0  ;;  %v1458_v31 = vadd.f32 %v1456_v58, %v1431_v14  ;;  %v4766_v2 = vstv %s4762_s4 }
 0x469   : > { %v1501_v45 = vmul.f32 %v4766_v2, %v1498_v35  ;;  %v1579_v59 = vsel %vm1578_vm10, %v1575_v17, %v1577_v27  ;;  %v1489_v49 = vsel %vm547_vm7, %v1485_v37, 0.0  ;;  %v4768_v57 = vmov %v4766_v2 }
 0x46a   : > { %v1502_v42 = vmul.f32 %v4768_v57, %v1499_v16  ;;  %v1535_v4 = vrot.slane %v1531_v33, 1  ;;  %v1552_v40 = vsel %vm1551_vm6, %v3948_v20, %v1550_v11  ;;  %vm1665_vm0 = vcmp.lt.s32.totalorder %v2842_v21, 99 }
 0x46b   : > { %v1512_v35 = vadd.f32 %v1508_v61, %v1501_v45  ;;  %v1536_v19 = vrot.slane %v1532_v50, 1  ;;  %v4769_v46 = vstv %s3568_s23  ;;  %v1580_v55 = vsel %vm1578_vm10, %v1577_v27, %v1575_v17  ;;  %s4779_s23 = sld [smem:[#allocation38_spill]] }
 0x46c   : > { %v1559_v32 = vmul.f32 %v4769_v46, %v1553_v30  ;;  %v1490_v16 = vsel %vm4027_vm14, %v1486_v12, 0.0  ;;  %v1513_v10 = vadd.f32 %v1509_v3, %v1502_v42  ;;  %v4770_v58 = vstv %s4767_s10  ;;  %v1631_v12 = vpop.permute.xlu1 %1630 }
 0x46d   : > { %v1528_v13 = vmul.f32 %v4770_v58, %v1525_v54  ;;  %v4771_v8 = vstv %s3578_s20  ;;  %v1459_v11 = vadd.f32 %v1457_v60, %v1432_v51  ;;  %vm4772_vm4 = vcmp.ge.s32.totalorder %v2997_v7, 2  ;;  %s4134_s20 = sld [smem:[#allocation6 + $0x2e]] }
 0x46e   : > { %v1585_v20 = vmul.f32 %v4771_v8, %v1579_v59  ;;  %vm4057_vm6 = vmand %vm1463_vm9, %vm4772_vm4  ;;  %v4775_v41 = vmov %v4770_v58  ;;  %v4776_v33 = vmov %v4769_v46  ;;  %v1606_v14 = vsel %vm1605_vm11, %v1602_v44, %v1604_v48 }
 0x46f   : > { %v1529_v17 = vmul.f32 %v4775_v41, %v1526_v36  ;;  %v1558_v27 = vmul.f32 %v4776_v33, %v1552_v40  ;;  %v1491_v54 = vadd.f32 %v1489_v49, %v1458_v31  ;;  %v1539_v61 = vadd.f32 %v1535_v4, %v1528_v13  ;;  %v1689_v31 = vpop.permute.xlu0 %1688 }
 0x470   : > { %v4777_v56 = vmov %v4771_v8  ;;  %v1607_v51 = vsel %vm1605_vm11, %v1604_v48, %v1602_v44  ;;  %vm1692_vm10 = vcmp.lt.s32.totalorder %v2842_v21, 98  ;;  %v1492_v36 = vadd.f32 %v1490_v16, %v1459_v11 }
 0x471   : > { %v1586_v50 = vmul.f32 %v4777_v56, %v1580_v55  ;;  %vm4778_vm15 = vcmp.ge.s32.totalorder %v2994_v6, 2  ;;  %v1540_v60 = vadd.f32 %v1536_v19, %v1529_v17  ;;  %v1563_v15 = vrot.slane %v1559_v32, 1 }
 0x472   : > { %v1516_v3 = vsel %vm4778_vm15, %v1512_v35, 0.0  ;;  %v1517_v2 = vsel %vm4057_vm6, %v1513_v10, 0.0  ;;  %vm4780_vm14 = vcmp.ge.s32.totalorder %v2997_v7, 1  ;;  %v4783_v45 = vstv %s3566_s19  ;;  %vm4124_vm15 = vmand %vm1463_vm9, %vm574_vm12  ;;  %s4131_s19 = sld [smem:[#allocation6 + $0x5e]] }
 0x473   : > { %vm4082_vm11 = vmand %vm1463_vm9, %vm4780_vm14  ;;  %v1555_v49 = vmul.f32 %v4783_v45, %v1552_v40  ;;  %v1589_v57 = vrot.slane %v1585_v20, 1  ;;  %v4784_v42 = vstv %s3590_s8  ;;  %vm1719_vm4 = vcmp.lt.s32.totalorder %v2842_v21, 97  ;;  %v1664_v20 = vpop.permute.xlu1 %1663  ;;  %v1716_v17 = vpop.permute.xlu0 %1715  ;;  %s4192_s8 = sld [smem:[#allocation6 + $0x2f]] }
 0x474   : > { %v1612_v4 = vmul.f32 %v4784_v42, %v1606_v14  ;;  %v4785_v48 = vmov %v4783_v45  ;;  %v1562_v19 = vrot.slane %v1558_v27, 1  ;;  %v4786_v46 = vmov %v4784_v42 }
 0x475   : > { %v1556_v35 = vmul.f32 %v4785_v48, %v1553_v30  ;;  %v1613_v32 = vmul.f32 %v4786_v46, %v1607_v51  ;;  %v1633_v16 = vsel %vm1632_vm13, %v1629_v26, %v1631_v12  ;;  %v1518_v10 = vadd.f32 %v1516_v3, %v1491_v54 }
 0x476   : > { %vm4787_vm6 = vcmp.ge.s32.totalorder %v2994_v6, 1  ;;  %v4788_v40 = vstv %s4779_s23  ;;  %v1590_v8 = vrot.slane %v1586_v50, 1  ;;  %v1519_v11 = vadd.f32 %v1517_v2, %v1492_v36 }
 0x477   : > { %v1543_v58 = vsel %vm4787_vm6, %v1539_v61, 0.0  ;;  %v1582_v13 = vmul.f32 %v4788_v40, %v1579_v59  ;;  %v1544_v30 = vsel %vm4082_vm11, %v1540_v60, 0.0  ;;  %v1567_v37 = vadd.f32 %v1563_v15, %v1556_v35  ;;  %vm4151_vm6 = vmand %vm1463_vm9, %vm580_vm3 }
 0x478   : > { %v1634_v41 = vsel %vm1632_vm13, %v1631_v12, %v1629_v26  ;;  %v4789_v33 = vmov %v4788_v40  ;;  %v1616_v61 = vrot.slane %v1612_v4, 1  ;;  %v4790_v56 = vstv %s3604_s11  ;;  %v1691_v12 = vpop.permute.xlu1 %1690 }
 0x479   : > { %v1583_v27 = vmul.f32 %v4789_v33, %v1580_v55  ;;  %v1593_v54 = vadd.f32 %v1589_v57, %v1582_v13  ;;  %v1639_v59 = vmul.f32 %v4790_v56, %v1633_v16  ;;  %v1545_v50 = vadd.f32 %v1543_v58, %v1518_v10 }
 0x47a   : > { %v1566_v3 = vadd.f32 %v1562_v19, %v1555_v49  ;;  %v1617_v45 = vrot.slane %v1613_v32, 1  ;;  %v1666_v36 = vsel %vm1665_vm0, %v1662_v34, %v1664_v20  ;;  %v4791_v15 = vstv %s3588_s26  ;;  %s4189_s26 = sld [smem:[#allocation6 + $0x5f]] }
 0x47b   : > { %v1594_v60 = vadd.f32 %v1590_v8, %v1583_v27  ;;  %v1609_v2 = vmul.f32 %v4791_v15, %v1606_v14  ;;  %v4792_v44 = vmov %v4790_v56  ;;  %v1667_v55 = vsel %vm1665_vm0, %v1664_v20, %v1662_v34  ;;  %v1743_v34 = vpop.permute.xlu0 %1742 }
 0x47c   : > { %v1640_v26 = vmul.f32 %v4792_v44, %v1634_v41  ;;  %vm1746_vm13 = vcmp.lt.s32.totalorder %v2842_v21, 96  ;;  %v1546_v57 = vadd.f32 %v1544_v30, %v1519_v11  ;;  %v1571_v49 = vsel %vm1463_vm9, %v1567_v37, 0.0 }
 0x47d   : > { %v4795_v42 = vmov %v4791_v15  ;;  %vm1658_vm0 = vcmp.lt.s32.totalorder %v2977_v18, 224  ;;  %v1944_v48 = vstv %s4074_s0  ;;  %vm4796_vm14 = vcmp.lt.s32.totalorder %v2994_v6, 15 }
 0x47e   : > { %v1610_v4 = vmul.f32 %v4795_v42, %v1607_v51  ;;  %v1597_v35 = vsel %vm4796_vm14, %v1593_v54, 0.0  ;;  %v1620_v19 = vadd.f32 %v1616_v61, %v1609_v2  ;;  %v1643_v46 = vrot.slane %v1639_v59, 1  ;;  %v1718_v54 = vpop.permute.xlu1 %1717 }
 0x47f   : > { %v4797_v32 = vstv %s3621_s9  ;;  %vm1773_vm11 = vcmp.lt.s32.totalorder %v2842_v21, 95  ;;  %v1572_v51 = vadd.f32 %v1566_v3, %v1545_v50  ;;  %v1693_v8 = vsel %vm1692_vm10, %v1689_v31, %v1691_v12 }
 0x480   : > { %v1672_v10 = vmul.f32 %v4797_v32, %v1666_v36  ;;  %v1621_v58 = vadd.f32 %v1617_v45, %v1610_v4  ;;  %v4798_v40 = vmov %v4797_v32  ;;  %v1598_v20 = vsel %vm4124_vm15, %v1594_v60, 0.0  ;;  %v1770_v45 = vpop.permute.xlu0 %1769  ;;  %vm4182_vm15 = vmand %vm1463_vm9, %vm586_vm5 }
 0x481   : > { %v1673_v13 = vmul.f32 %v4798_v40, %v1667_v55  ;;  %v4801_v30 = vstv %s3602_s14  ;;  %v1644_v33 = vrot.slane %v1640_v26, 1  ;;  %v1694_v27 = vsel %vm1692_vm10, %v1691_v12, %v1689_v31 }
 0x482   : > { %v1636_v37 = vmul.f32 %v4801_v30, %v1633_v16  ;;  %v1573_v61 = vadd.f32 %v1571_v49, %v1546_v57  ;;  %v1599_v56 = vadd.f32 %v1597_v35, %v1572_v51  ;;  %v4802_v59 = vmov %v4801_v30 }
 0x483   : > { %v1637_v50 = vmul.f32 %v4802_v59, %v1634_v41  ;;  %v1720_v3 = vsel %vm1719_vm4, %v1716_v17, %v1718_v54  ;;  %v1624_v60 = vsel %vm579_vm2, %v1620_v19, 0.0  ;;  %v1676_v15 = vrot.slane %v1672_v10, 1 }
 0x484   : > { %v1647_v16 = vadd.f32 %v1643_v46, %v1636_v37  ;;  %v4803_v2 = vstv %s3631_s24  ;;  %v1600_v44 = vadd.f32 %v1598_v20, %v1573_v61  ;;  %v1625_v26 = vsel %vm4151_vm6, %v1621_v58, 0.0  ;;  %v1745_v46 = vpop.permute.xlu1 %1744  ;;  %v1797_v40 = vpop.permute.xlu0 %1796  ;;  %s4810_s24 = sld [smem:[#allocation39_spill]] }
 0x485   : > { %v1699_v31 = vmul.f32 %v4803_v2, %v1693_v8  ;;  %v1677_v12 = vrot.slane %v1673_v13, 1  ;;  %v4804_v41 = vmov %v4803_v2  ;;  %vm1800_vm10 = vcmp.lt.s32.totalorder %v2842_v21, 94 }
 0x486   : > { %v1700_v57 = vmul.f32 %v4804_v41, %v1694_v27  ;;  %v1648_v49 = vadd.f32 %v1644_v33, %v1637_v50  ;;  %v4805_v14 = vstv %s3612_s22  ;;  %v1721_v4 = vsel %vm1719_vm4, %v1718_v54, %v1716_v17  ;;  %vm4207_vm4 = vmand %vm1658_vm0, %vm548_vm8  ;;  %s4860_s22 = sld [smem:[#allocation20_spill]] }
 0x487   : > { %v1669_v42 = vmul.f32 %v4805_v14, %v1666_v36  ;;  %v4806_v35 = vstv %s3641_s16  ;;  %v1626_v32 = vadd.f32 %v1624_v60, %v1599_v56  ;;  %v4809_v51 = vmov %v4805_v14  ;;  %s4247_s16 = sld [smem:[#allocation6 + $0x60]] }
 0x488   : > { %v1726_v19 = vmul.f32 %v4806_v35, %v1720_v3  ;;  %v1670_v58 = vmul.f32 %v4809_v51, %v1667_v55  ;;  %v1947_v36 = vstv %s4131_s19  ;;  %v1971_v17 = vstv %s4134_s20  ;;  %v1772_v2 = vpop.permute.xlu1 %1771 }
 0x489   : > { %v1627_v13 = vadd.f32 %v1625_v26, %v1600_v44  ;;  %v1651_v20 = vsel %vm585_vm1, %v1647_v16, 0.0  ;;  %v1680_v11 = vadd.f32 %v1676_v15, %v1669_v42  ;;  %v1703_v30 = vrot.slane %v1699_v31, 1 }
 0x48a   : > { %vm1827_vm9 = vcmp.lt.s32.totalorder %v2842_v21, 93  ;;  %v1681_v37 = vadd.f32 %v1677_v12, %v1670_v58  ;;  %v1704_v33 = vrot.slane %v1700_v57, 1  ;;  %v4811_v55 = vmov %v4806_v35  ;;  %v1824_v57 = vpop.permute.xlu0 %1823 }
 0x48b   : > { %v1727_v54 = vmul.f32 %v4811_v55, %v1721_v4  ;;  %v1748_v61 = vsel %vm1746_vm13, %v1745_v46, %v1743_v34  ;;  %v1652_v56 = vsel %vm4182_vm15, %v1648_v49, 0.0  ;;  %v4814_v50 = vstv %s4810_s24 }
 0x48c   : > { %v1696_v60 = vmul.f32 %v4814_v50, %v1693_v8  ;;  %v1730_v16 = vrot.slane %v1726_v19, 1  ;;  %v1747_v15 = vsel %vm1746_vm13, %v1743_v34, %v1745_v46  ;;  %v1653_v31 = vadd.f32 %v1651_v20, %v1626_v32  ;;  %v1799_v55 = vpop.permute.xlu1 %1798  ;;  %s4861_s14 = sshll.u32 %s4860_s22, 6  ;;  %s2080_s6 = scalar_lea.sflag [#allocation4], %s4860_s22 }
 0x48d   : > { %v4815_v44 = vmov %v4814_v50  ;;  %v1774_v12 = vsel %vm1773_vm11, %v1770_v45, %v1772_v2  ;;  %v1775_v41 = vsel %vm1773_vm11, %v1772_v2, %v1770_v45  ;;  %v1684_v8 = vsel %vm547_vm7, %v1680_v11, 0.0  ;;  %s229_s25 = scalar_lea.vmem [#allocation7], %s4861_s14 }
 0x48e   : > { %v1697_v26 = vmul.f32 %v4815_v44, %v1694_v27  ;;  %v1707_v49 = vadd.f32 %v1703_v30, %v1696_v60  ;;  %v4816_v14 = vstv %s3639_s2  ;;  %v4817_v42 = vstv %s3653_s27  ;;  %v1857_v59 = vpop.permute.xlu0 %1856  ;;  %s4250_s27 = sld [smem:[#allocation6 + $0x30]]  ;;  %s4290_s2 = sld [smem:[#allocation6 + $0x61]] }
 0x48f   : > { %v1723_v34 = vmul.f32 %v4816_v14, %v1720_v3  ;;  %v1754_v35 = vmul.f32 %v4817_v42, %v1748_v61  ;;  %vm1860_vm13 = vcmp.lt.s32.totalorder %v2842_v21, 83  ;;  %v1685_v27 = vsel %vm4207_vm4, %v1681_v37, 0.0  ;;  %s2093_s9 = sshll.u32 %s229_s25, 4  ;;  %s4519_s9 = int_to_ptr.vmem [resolvable:$true] %s2093_s9 }
 0x490   : > { %v1708_v19 = vadd.f32 %v1704_v33, %v1697_v26  ;;  %v1731_v46 = vrot.slane %v1727_v54, 1  ;;  %v4818_v45 = vmov %v4817_v42  ;;  %v1654_v10 = vadd.f32 %v1652_v56, %v1627_v13  ;;  %s2514_s7 = scalar_lea.vmem %s4519_s9, 1024  ;;  %p2521_p10 = scmp.lt.s32.totalorder %s4519_s9, %s2519_s3 }
 0x491   : > { %v1753_v32 = vmul.f32 %v4818_v45, %v1747_v15  ;;  %vm4819_vm14 = vcmp.ge.s32.totalorder %v2997_v7, 2  ;;  %v1734_v51 = vadd.f32 %v1730_v16, %v1723_v34  ;;  %v4822_v58 = vstv %s3661_s15  ;;  %p2515_p5 = scmp.ne.s32.totalorder %s4519_s9, %s2514_s7  ;;  %p2522_p1 = scmp.lt.s32.totalorder %s2520_s29, %s2514_s7 }
 0x492   : > { %vm4236_vm11 = vmand %vm1658_vm0, %vm4819_vm14  ;;  %v1780_v20 = vmul.f32 %v4822_v58, %v1774_v12  ;;  %v4823_v11 = vmov %v4822_v58  ;;  %v1686_v37 = vadd.f32 %v1684_v8, %v1653_v31  ;;  %v4824_v33 = vmov %v4816_v14 }
 0x493   : > { %v1781_v30 = vmul.f32 %v4823_v11, %v1775_v41  ;;  %v1724_v54 = vmul.f32 %v4824_v33, %v1721_v4  ;;  %v1974_v13 = vstv %s4189_s26  ;;  %v1998_v56 = vstv %s4192_s8  ;;  %p2516_p8 = pnand %p2515_p5, %p4864_p12  ;;  %p2523_p4 = por %p2522_p1, %p2521_p10 }
 0x494   : > { %v1687_v50 = vadd.f32 %v1685_v27, %v1654_v10  ;;  %vm4825_vm6 = vcmp.ge.s32.totalorder %v2994_v6, 2  ;;  %v1758_v16 = vrot.slane %v1754_v35, 1  ;;  %v1801_v2 = vsel %vm1800_vm10, %v1797_v40, %v1799_v55  ;;  %v1826_v27 = vpop.permute.xlu1 %1825  ;;  %v1884_v10 = vpop.permute.xlu0 %1883 }
 0x495   : > { %v1711_v60 = vsel %vm4825_vm6, %v1707_v49, 0.0  ;;  %vm1887_vm15 = vcmp.lt.s32.totalorder %v2842_v21, 82  ;;  %v1712_v4 = vsel %vm4236_vm11, %v1708_v19, 0.0  ;;  %v1735_v31 = vadd.f32 %v1731_v46, %v1724_v54  ;;  %vm4298_vm11 = vmand %vm1658_vm0, %vm574_vm12  ;;  %p2517_p9 = pneg %p2516_p8 }
 0x496   : > { %v1757_v44 = vrot.slane %v1753_v32, 1  ;;  %v1802_v26 = vsel %vm1800_vm10, %v1799_v55, %v1797_v40  ;;  %vm4826_vm4 = vcmp.ge.s32.totalorder %v2997_v7, 1  ;;  %vm4829_vm6 = vcmp.ge.s32.totalorder %v2994_v6, 1 }
 0x497   : > { %vm4265_vm14 = vmand %vm1658_vm0, %vm4826_vm4  ;;  %v1738_v49 = vsel %vm4829_vm6, %v1734_v51, 0.0  ;;  %v4830_v14 = vstv %s3651_s28  ;;  %v1784_v42 = vrot.slane %v1780_v20, 1  ;;  %v1785_v35 = vrot.slane %v1781_v30, 1  ;;  %s4859_s28 = sld [smem:[#allocation15_spill]]  ;;  %p2524_p11 = pnand %p2523_p4, %p2517_p9 }
 0x498   : > { %v1751_v34 = vmul.f32 %v4830_v14, %v1748_v61  ;;  %v1713_v19 = vadd.f32 %v1711_v60, %v1686_v37  ;;  %v4831_v46 = vmov %v4830_v14  ;;  %v1807_v40 = vmul.f32 %v1806_v47, %v1801_v2  ;;  %v1859_v54 = vpop.permute.xlu1 %1858  ;;  %vm4337_vm6 = vmand %vm1658_vm0, %vm580_vm3 }
 0x499   : > { %v1750_v45 = vmul.f32 %v4831_v46, %v1747_v15  ;;  %v1828_v32 = vsel %vm1827_vm9, %v1824_v57, %v1826_v27  ;;  %v4832_v58 = vstv %s3659_s21  ;;  %v1808_v61 = vmul.f32 %v1806_v47, %v1802_v26 }
 0x49a   : > { %v1762_v3 = vadd.f32 %v1758_v16, %v1751_v34  ;;  %v1777_v11 = vmul.f32 %v4832_v58, %v1774_v12  ;;  %v4833_v55 = vmov %v4832_v58  ;;  %vm1914_vm10 = vcmp.lt.s32.totalorder %v2842_v21, 81  ;;  %v1911_v16 = vpop.permute.xlu0 %1910 }
 0x49b   : > { %v1778_v51 = vmul.f32 %v4833_v55, %v1775_v41  ;;  %v1739_v15 = vsel %vm4265_vm14, %v1735_v31, 0.0  ;;  %v1740_v20 = vadd.f32 %v1738_v49, %v1713_v19  ;;  %v1761_v30 = vadd.f32 %v1757_v44, %v1750_v45 }
 0x49c   : > { %v1829_v37 = vsel %vm1827_vm9, %v1826_v27, %v1824_v57  ;;  %v1714_v12 = vadd.f32 %v1712_v4, %v1687_v50  ;;  %v1788_v33 = vadd.f32 %v1784_v42, %v1777_v11  ;;  %v1834_v47 = vmul.f32 %v1833_v43, %v1828_v32  ;;  %v1886_v58 = vpop.permute.xlu1 %1885 }
 0x49d   : > { %v1789_v41 = vadd.f32 %v1785_v35, %v1778_v51  ;;  %v1811_v57 = vrot.slane %v1807_v40, 1  ;;  %v1861_v50 = vsel %vm1860_vm13, %v1857_v59, %v1859_v54  ;;  %v2001_v4 = vstv %s4247_s16  ;;  %s2298_s11 = sshll.u32 %s4859_s28, 10 }
 0x49e   : > { %v2025_v31 = vstv %s4250_s27  ;;  %v1741_v44 = vadd.f32 %v1739_v15, %v1714_v12  ;;  %v1766_v8 = vsel %vm1658_vm0, %v1762_v3, 0.0  ;;  %v1812_v49 = vrot.slane %v1808_v61, 1  ;;  %s4513_s1 = scalar_lea.hbm %s4862_s5, %s2298_s11 }
 0x49f   : > { %v1835_v14 = vmul.f32 %v1833_v43, %v1829_v37  ;;  %vm1941_vm9 = vcmp.lt.s32.totalorder %v2842_v21, 80  ;;  %v1767_v34 = vadd.f32 %v1761_v30, %v1740_v20  ;;  %v4836_v42 = vstv %s3676_s30  ;;  %v1938_v20 = vpop.permute.xlu0 %1937 }
 0x4a0   : > { %v1804_v35 = vmul.f32 %v4836_v42, %v1801_v2  ;;  %v1862_v27 = vsel %vm1860_vm13, %v1859_v54, %v1857_v59  ;;  %v1867_v19 = vmul.f32 %v1866_v38, %v1861_v50  ;;  %vm4837_vm4 = vcmp.lt.s32.totalorder %v2994_v6, 15  ;;  %v1913_v60 = vpop.permute.xlu1 %1912 }
 0x4a1   : > { %v1792_v46 = vsel %vm4837_vm4, %v1788_v33, 0.0  ;;  %v1793_v45 = vsel %vm4298_vm11, %v1789_v41, 0.0  ;;  %v4838_v40 = vmov %v4836_v42  ;;  %v1838_v3 = vrot.slane %v1834_v47, 1  ;;  %vm4363_vm11 = vmand %vm1658_vm0, %vm586_vm5 }
 0x4a2   : > { %v1805_v43 = vmul.f32 %v4838_v40, %v1802_v26  ;;  %vm1853_vm14 = vcmp.lt.s32.totalorder %v2977_v18, 208  ;;  %v1768_v2 = vadd.f32 %v1766_v8, %v1741_v44  ;;  %v1815_v11 = vadd.f32 %v1811_v57, %v1804_v35 }
 0x4a3   : > { %v1888_v59 = vsel %vm1887_vm15, %v1884_v10, %v1886_v58  ;;  %v1889_v55 = vsel %vm1887_vm15, %v1886_v58, %v1884_v10  ;;  %v1831_v61 = vmul.f32 %v1830_v62, %v1828_v32  ;;  %v1839_v26 = vrot.slane %v1835_v14, 1 }
 0x4a4   : > { %v1816_v51 = vadd.f32 %v1812_v49, %v1805_v43  ;;  %v1868_v15 = vmul.f32 %v1866_v38, %v1862_v27  ;;  %vm1968_vm13 = vcmp.lt.s32.totalorder %v2842_v21, 79  ;;  %v1794_v30 = vadd.f32 %v1792_v46, %v1767_v34  ;;  %v1965_v43 = vpop.permute.xlu0 %1964 }
 0x4a5   : > { %v1795_v12 = vadd.f32 %v1793_v45, %v1768_v2  ;;  %v1871_v10 = vrot.slane %v1867_v19, 1  ;;  %v2028_v41 = vstv %s4290_s2  ;;  %v1832_v32 = vmul.f32 %v1830_v62, %v1829_v37 }
 0x4a6   : > { %v1842_v47 = vadd.f32 %v1838_v3, %v1831_v61  ;;  %v1894_v38 = vmul.f32 %v1893_v53, %v1888_v59  ;;  %v1895_v54 = vmul.f32 %v1893_v53, %v1889_v55  ;;  %v1819_v57 = vsel %vm579_vm2, %v1815_v11, 0.0  ;;  %v1940_v3 = vpop.permute.xlu1 %1939 }
 0x4a7   : > { %v1864_v44 = vmul.f32 %v1863_v39, %v1861_v50  ;;  %v1915_v8 = vsel %vm1914_vm10, %v1911_v16, %v1913_v60  ;;  %v1916_v62 = vsel %vm1914_vm10, %v1913_v60, %v1911_v16  ;;  %v1820_v37 = vsel %vm4337_vm6, %v1816_v51, 0.0  ;;  %vm4392_vm10 = vmand %vm1853_vm14, %vm548_vm8 }
 0x4a8   : > { %v1843_v49 = vadd.f32 %v1839_v26, %v1832_v32  ;;  %v1872_v53 = vrot.slane %v1868_v15, 1  ;;  %v1898_v14 = vrot.slane %v1894_v38, 1  ;;  %vm1995_vm15 = vcmp.lt.s32.totalorder %v2842_v21, 78 }
 0x4a9   : > { %v1875_v34 = vadd.f32 %v1871_v10, %v1864_v44  ;;  %v1899_v42 = vrot.slane %v1895_v54, 1  ;;  %v1921_v16 = vmul.f32 %v1920_v5, %v1915_v8  ;;  %v1922_v35 = vmul.f32 %v1920_v5, %v1916_v62 }
 0x4aa   : > { %v1821_v19 = vadd.f32 %v1819_v57, %v1794_v30  ;;  %v1846_v46 = vsel %vm585_vm1, %v1842_v47, 0.0  ;;  %v1865_v45 = vmul.f32 %v1863_v39, %v1862_v27  ;;  %v1891_v40 = vmul.f32 %v1890_v63, %v1888_v59  ;;  %v1967_v32 = vpop.permute.xlu1 %1966 }
 0x4ab   : > { %v1892_v58 = vmul.f32 %v1890_v63, %v1889_v55  ;;  %v1925_v2 = vrot.slane %v1921_v16, 1  ;;  %v1942_v11 = vsel %vm1941_vm9, %v1938_v20, %v1940_v3  ;;  %v1943_v5 = vsel %vm1941_vm9, %v1940_v3, %v1938_v20 }
 0x4ac   : > { %v1847_v51 = vsel %vm4363_vm11, %v1843_v49, 0.0  ;;  %v1876_v61 = vadd.f32 %v1872_v53, %v1865_v45  ;;  %v1902_v39 = vadd.f32 %v1898_v14, %v1891_v40  ;;  %v1918_v27 = vmul.f32 %v1917_v9, %v1915_v8  ;;  %vm4478_vm11 = vmand %vm1853_vm14, %vm580_vm3 }
 0x4ad   : > { %vm2022_vm0 = vcmp.lt.s32.totalorder %v2842_v21, 77  ;;  %v1822_v63 = vadd.f32 %v1820_v37, %v1795_v12  ;;  %v1879_v55 = vsel %vm547_vm7, %v1875_v34, 0.0  ;;  %v1903_v26 = vadd.f32 %v1899_v42, %v1892_v58  ;;  %v1992_v37 = vpop.permute.xlu0 %1991  ;;  %vm2040_vm3 = vmand %vm1853_vm14, %vm586_vm5 }
 0x4ae   : > { %v1926_v15 = vrot.slane %v1922_v35, 1  ;;  %v1848_v20 = vadd.f32 %v1846_v46, %v1821_v19  ;;  %vm4846_vm9 = vcmp.ge.s32.totalorder %v2997_v7, 2  ;;  %v1929_v12 = vadd.f32 %v1925_v2, %v1918_v27  ;;  %v1994_v35 = vpop.permute.xlu1 %1993 }
 0x4af   : > { %vm4402_vm4 = vmand %vm1853_vm14, %vm4846_vm9  ;;  %v1948_v33 = vmul.f32 %v1947_v36, %v1942_v11  ;;  %v1949_v10 = vmul.f32 %v1947_v36, %v1943_v5  ;;  %v1849_v47 = vadd.f32 %v1847_v51, %v1822_v63  ;;  %v1919_v38 = vmul.f32 %v1917_v9, %v1916_v62 }
 0x4b0   : > { %v1969_v54 = vsel %vm1968_vm13, %v1965_v43, %v1967_v32  ;;  %v1970_v60 = vsel %vm1968_vm13, %v1967_v32, %v1965_v43  ;;  %v1880_v57 = vsel %vm4392_vm10, %v1876_v61, 0.0  ;;  %v1881_v44 = vadd.f32 %v1879_v55, %v1848_v20 }
 0x4b1   : > { %vm4849_vm7 = vcmp.ge.s32.totalorder %v2994_v6, 2  ;;  %v1953_v36 = vrot.slane %v1949_v10, 1  ;;  %v1907_v9 = vsel %vm4402_vm4, %v1903_v26, 0.0  ;;  %v1930_v62 = vadd.f32 %v1926_v15, %v1919_v38  ;;  %v2019_v59 = vpop.permute.xlu0 %2018 }
 0x4b2   : > { %v1906_v8 = vsel %vm4849_vm7, %v1902_v39, 0.0  ;;  %v1975_v49 = vmul.f32 %v1974_v13, %v1969_v54  ;;  %v1976_v53 = vmul.f32 %v1974_v13, %v1970_v60  ;;  %vm4850_vm8 = vcmp.ge.s32.totalorder %v2997_v7, 1  ;;  %v2021_v26 = vpop.permute.xlu1 %2020 }
 0x4b3   : > { %vm4430_vm13 = vmand %vm1853_vm14, %vm4850_vm8  ;;  %vm4853_vm6 = vcmp.ge.s32.totalorder %v2994_v6, 1  ;;  %v1946_v34 = vmul.f32 %v1944_v48, %v1943_v5  ;;  %v1952_v42 = vrot.slane %v1948_v33, 1  ;;  %v1972_v16 = vmul.f32 %v1971_v17, %v1969_v54 }
 0x4b4   : > { %v1933_v50 = vsel %vm4853_vm6, %v1929_v12, 0.0  ;;  %v1979_v19 = vrot.slane %v1975_v49, 1  ;;  %v1980_v13 = vrot.slane %v1976_v53, 1  ;;  %v1996_v46 = vsel %vm1995_vm15, %v1992_v37, %v1994_v35 }
 0x4b5   : > { %v1997_v45 = vsel %vm1995_vm15, %v1994_v35, %v1992_v37  ;;  %v1908_v40 = vadd.f32 %v1906_v8, %v1881_v44  ;;  %v1945_v43 = vmul.f32 %v1944_v48, %v1942_v11  ;;  %v1957_v3 = vadd.f32 %v1953_v36, %v1946_v34  ;;  %vm4458_vm15 = vmand %vm1853_vm14, %vm574_vm12 }
 0x4b6   : > { %v1973_v58 = vmul.f32 %v1971_v17, %v1970_v60  ;;  %v1882_v2 = vadd.f32 %v1880_v57, %v1849_v47  ;;  %v1934_v5 = vsel %vm4430_vm13, %v1930_v62, 0.0  ;;  %v1983_v51 = vadd.f32 %v1979_v19, %v1972_v16 }
 0x4b7   : > { %v2002_v61 = vmul.f32 %v2001_v4, %v1996_v46  ;;  %v1935_v39 = vadd.f32 %v1933_v50, %v1908_v40  ;;  %v1956_v27 = vadd.f32 %v1952_v42, %v1945_v43  ;;  %v2003_v55 = vmul.f32 %v2001_v4, %v1997_v45 }
 0x4b8   : > { %v1984_v63 = vadd.f32 %v1980_v13, %v1973_v58  ;;  %v1909_v48 = vadd.f32 %v1907_v9, %v1882_v2  ;;  %v1999_v11 = vmul.f32 %v1998_v56, %v1996_v46  ;;  %v2023_v20 = vsel %vm2022_vm0, %v2019_v59, %v2021_v26 }
 0x4b9   : > { %v2006_v15 = vrot.slane %v2002_v61, 1  ;;  %v1961_v4 = vsel %vm1853_vm14, %v1957_v3, 0.0  ;;  %v2000_v30 = vmul.f32 %v1998_v56, %v1997_v45  ;;  %v2007_v12 = vrot.slane %v2003_v55, 1 }
 0x4ba   : > { %v2024_v33 = vsel %vm2022_vm0, %v2021_v26, %v2019_v59  ;;  %v1936_v10 = vadd.f32 %v1934_v5, %v1909_v48  ;;  %vm4856_vm12 = vcmp.lt.s32.totalorder %v2994_v6, 15  ;;  %v2029_v56 = vmul.f32 %v2028_v41, %v2023_v20 }
 0x4bb   : > { %v1987_v32 = vsel %vm4856_vm12, %v1983_v51, 0.0  ;;  %v2010_v38 = vadd.f32 %v2006_v15, %v1999_v11  ;;  %v1962_v54 = vadd.f32 %v1956_v27, %v1935_v39  ;;  %v1988_v21 = vsel %vm4458_vm15, %v1984_v63, 0.0 }
 0x4bc   : > { %v2011_v60 = vadd.f32 %v2007_v12, %v2000_v30  ;;  %v2030_v57 = vmul.f32 %v2028_v41, %v2024_v33  ;;  %v1963_v44 = vadd.f32 %v1961_v4, %v1936_v10  ;;  %v2026_v36 = vmul.f32 %v2025_v31, %v2023_v20 }
 0x4bd   : > { %v2014_v8 = vsel %vm579_vm2, %v2010_v38, 0.0  ;;  %v2033_v37 = vrot.slane %v2029_v56, 1  ;;  %v1989_v9 = vadd.f32 %v1987_v32, %v1962_v54  ;;  %v2027_v49 = vmul.f32 %v2025_v31, %v2024_v33 }
 0x4be   : > { %v2015_v62 = vsel %vm4478_vm11, %v2011_v60, 0.0  ;;  %v2034_v53 = vrot.slane %v2030_v57, 1  ;;  %v1990_v14 = vadd.f32 %v1988_v21, %v1963_v44  ;;  %v2057_v6 = vsub.s32 0, %v2909_v52 }
 0x4bf   : > { %v2037_v41 = vadd.f32 %v2033_v37, %v2026_v36  ;;  %v2016_v50 = vadd.f32 %v2014_v8, %v1989_v9 }
 0x4c0   : > { %v2038_v34 = vadd.f32 %v2034_v53, %v2027_v49  ;;  %v2017_v42 = vadd.f32 %v2015_v62, %v1990_v14 }
 0x4c1   : > { %v2041_v16 = vsel %vm585_vm1, %v2037_v41, 0.0 }
 0x4c2   : > { %v2042_v35 = vsel %vm2040_vm3, %v2038_v34, 0.0  ;;  %v2043_v19 = vadd.f32 %v2041_v16, %v2016_v50 }
 0x4c3   : > { %v2044_v13 = vadd.f32 %v2042_v35, %v2017_v42 }
 0x4c4   : > { %v2045_v46 = vsub.f32 0.0, %v2043_v19 }
 0x4c5   : > { %v2046_v31 = vsub.f32 0.0, %v2044_v13 }
 0x4c6   : > { %v2047_v45 = vmul.f32 1.442695, %v2045_v46 }
 0x4c7   : > { %v2049_v40 = vmul.f32 1.442695, %v2046_v31 }
 0x4c8   : > { %2461 = vpow2.f32 %v2047_v45 }
 0x4c9   : > { %2463 = vpow2.f32 %v2049_v40 }
 0x4d2   : > { %v2462_v18 = vpop.eup %2461 }
 0x4d3   : > { %v2464_v7 = vpop.eup %2463  ;;  %v2051_v43 = vadd.f32 1.0, %v2462_v18 }
 0x4d4   : > { %v2052_v3 = vadd.f32 1.0, %v2464_v7 }
 0x4d5   : > { %2465 = vrcp.f32 %v2051_v43 }
 0x4d6   : > { %2467 = vrcp.f32 %v2052_v3 }
 0x4df   : > { %v2466_v58 = vpop.eup %2465 }
 0x4e0   : > { %v2468_v2 = vpop.eup %2467  ;;  %v2058_v5 = vrot.slane %v2466_v58, %v2057_v6 }
 0x4e1   : > { %v2062_v51 = vrot.slane %v2468_v2, %v2057_v6 }
 0x4e2   : > { %v2063_v61 = vmul.f32 %v2058_v5, %v2875_v24  ;;  %v2065_v39 = vmul.f32 %v2058_v5, %v2869_v22  ;;  %v2067_v27 = vmul.f32 %v2058_v5, %v2891_v0  ;;  %v2069_v63 = vmul.f32 %v2058_v5, %v2881_v28 }
 0x4e3   : > { %v2064_v52 = vmul.f32 %v2062_v51, %v2878_v25  ;;  %v2066_v59 = vmul.f32 %v2062_v51, %v2872_v23  ;;  %v2068_v55 = vmul.f32 %v2062_v51, %v2894_v1  ;;  %v2070_v24 = vmul.f32 %v2062_v51, %v2884_v29 }
 0x4e4   : > { %2071 = vst [vmem:[%s229_s25] sm:$0xff] %v2063_v61  ;;  %2073 = vst [vmem:[%s229_s25 + $0x10] sm:$0xff] %v2065_v39 }
 0x4e5   : > { %2075 = vst [vmem:[%s229_s25 + $0x20] sm:$0xff] %v2067_v27  ;;  %2077 = vst [vmem:[%s229_s25 + $0x30] sm:$0xff] %v2069_v63 }
 0x4e6   : > { %2072 = vst [vmem:[%s229_s25 + $0x8] sm:$0xff] %v2064_v52  ;;  %2074 = vst [vmem:[%s229_s25 + $0x18] sm:$0xff] %v2066_v59 }
 0x4e7   : > { %2076 = vst [vmem:[%s229_s25 + $0x28] sm:$0xff] %v2068_v55  ;;  %2078 = vst [vmem:[%s229_s25 + $0x38] sm:$0xff] %v2070_v24 }
 0x4e8   : > { %2527 = shalt.err (!%p2524_p11)
}
 0x4e9   : > { %s2528_s18 = scalar_lea.hbm %s4513_s1, 1024  ;;  %s2532_s10 = scalar_lea.hbm %s4862_s5, 2048 }
 0x4ea   : > { %p2529_p0 = scmp.ne.s32.totalorder %s4513_s1, %s2528_s18  ;;  %p2533_p6 = scmp.lt.u32.totalorder %s4513_s1, %s4862_s5 }
 0x4eb   : > { %p2534_p3 = scmp.lt.u32.totalorder %s2532_s10, %s2528_s18  ;;  %p2536_p5 = scmp.lt.u32.totalorder %s2528_s18, %s4513_s1 }
 0x4ec   : > { %p2530_p2 = pnand %p2529_p0, %p4864_p12 }
 0x4ed   : > { %p2535_p13 = por %p2534_p3, %p2533_p6 }
 0x4ee   : > { %p2531_p7 = pneg %p2530_p2 }
 0x4ef   : > { %p2537_p8 = por %p2536_p5, %p2535_p13 }
 0x4f1   : > { %p2538_p9 = pnand %p2537_p8, %p2531_p7 }
 0x4f3   : > { %2541 = shalt.err (!%p2538_p9)
}
 0x4f4   : > { %s2642_s19 = smov 256   ;;  %s4865_s20 = smov 16  }
 0x4f5   : > { %2340 = dma.vmem_to_hbm [thread:$0]  (%p4864_p12), %s4519_s9, 1024, %s4513_s1, %s2080_s6, %s2642_s19, %s2642_s19, %s4865_s20  }
 0x4f6 PF: > { %s4866_s24 = sld [smem:[#allocation11_spill]]  ;;  %s4867_s26 = sld [smem:[#allocation19_spill]] }
 0x4f7   : > { %s4868_s8 = sld [smem:[#allocation14_spill]] }
 0x4fc   : > { %s2108_s16 = sand.u32 1, %s4866_s24   ;;  %p4869_p10 = scmp.ne.s32.totalorder %s4867_s26, 0 }
 0x4fd   : > { %p4870_p1 = scmp.ge.s32.totalorder %s4868_s8, 2  ;;  %s2109_s27 = scalar_lea.sflag [#allocation4], %s2108_s16 }
 0x4ff   : > { %p2351_p4 = pnand %p4870_p1, %p4869_p10 }
 0x501   : > { %2567 = dma.done.wait (!%p2351_p4), %s2109_s27, 1024  }
 0x502   : > { %2569 = vsyncadd (!%p2351_p4), %s2109_s27, 4294966272  ;;  %s4871_s18 = sld [smem:[#allocation16_spill]]  ;;  %s4872_s15 = sld [smem:[#allocation12_spill]] }
 0x503   : > { %s4873_s16 = sld [smem:[#allocation13_spill]]  ;;  %s4874_s17 = sld [smem:[#allocation17_spill]] }
 0x508   : > { %p18_p11 = scmp.ge.s32.totalorder %s4871_s18, 4  }
 0x50a   :  { %20 = sbr.rel (!%p18_p11) target bundleno = 12 (0xc), region = 86 }
 0x511   :  { %2114 = vsyncpa [#allocation3], 1 }
 0x512   :  { %2116 = vsyncpa [#allocation3 + $0x1], 1 }
 0x513   :  { %2117 = vsyncpa [#allocation4], 1 }
 0x514   :  { %2119 = vsyncpa [#allocation4 + $0x1], 1 }
 0x515   :  { %2120 = vsyncpa [#allocation5], 1 }
 0x516   :  { %2122 = vsyncpa [#allocation5 + $0x1], 1 }

</bundles_post_ra>
